<compile_context>
chip_gen: v6e
topology: v6e:2x2x1
jax: 0.10.0
libtpu: 0.0.40
codegen_flags: <defaults>
</compile_context>

<pallas_src>
import numpy as np
import jax
import jax.numpy as jnp
from jax.experimental import pallas as pl
from jax.experimental.pallas import tpu as pltpu


# --------------------------------------------------------------------------
# Pallas kernel: fused RootedGraphPredictor + LabelClassifier hot path.
#   per grid step (tb sentences):
#     dep    = emb0 @ W_arc^T                                   (tb, L, Dd)
#     dist   = [dep,1,||dep||^2] @ [-2*dep,||dep||^2,1]^T       (tb, L, L)
#     logits = where(pos < len, emb1 @ W_lbl^T, -inf)           (tb, L, NL)
# --------------------------------------------------------------------------
def depprobe_kernel(lens_ref, emb0_ref, emb1_ref, warc_ref, wlbl_ref,
                    dep_ref, dist_ref, logit_ref):
    tb, L, De = emb0_ref.shape
    Dd = warc_ref.shape[1]
    NL = wlbl_ref.shape[1]
    b = pl.program_id(0)

    # ---- RootedGraphPredictor._transform (Linear, no bias).
    # bf16 cast happens here (not in the wrapper) so HBM streams f32 only once.
    x0 = emb0_ref[...].astype(jnp.bfloat16).reshape(tb * L, De)
    dep = jnp.dot(x0, warc_ref[...], preferred_element_type=jnp.float32)
    dep3 = dep.reshape(tb, L, Dd)                                # (tb, L, Dd) f32
    dep_ref[...] = dep3

    # ---- pairwise squared distances via a single augmented MXU matmul:
    #   dist_ij = ||d_i||^2 + ||d_j||^2 - 2 d_i . d_j
    sq = jnp.sum(dep3 * dep3, axis=-1, keepdims=True)            # (tb, L, 1)
    ones = jnp.ones_like(sq)
    lhs = jnp.concatenate([dep3, ones, sq], axis=-1).astype(jnp.bfloat16)
    rhs = jnp.concatenate([-2.0 * dep3, sq, ones], axis=-1).astype(jnp.bfloat16)
    dist = jnp.einsum('bik,bjk->bij', lhs, rhs,
                      preferred_element_type=jnp.float32)        # (tb, L, L)
    dist_ref[...] = jnp.maximum(dist, 0.0)     # clamp tiny negatives (i == j)

    # ---- LabelClassifier._mlp (Linear, no bias) + -inf on padded tokens.
    x1 = emb1_ref[...].astype(jnp.bfloat16).reshape(tb * L, De)
    logits = jnp.dot(x1, wlbl_ref[...],
                     preferred_element_type=jnp.float32).reshape(tb, L, NL)
    pos = jax.lax.broadcasted_iota(jnp.int32, (L, NL), 0)        # token position
    masked = [jnp.where(pos < lens_ref[b * tb + t], logits[t], -jnp.inf)
              for t in range(tb)]                                # tb small & static
    logit_ref[...] = jnp.stack(masked, axis=0)                   # single dense store


def _pad_to(x, target, axis):
    pad = target - x.shape[axis]
    if pad == 0:
        return x
    widths = [(0, 0)] * x.ndim
    widths[axis] = (0, pad)
    return jnp.pad(x, widths)


def depprobe_forward_core(emb0, emb1, att, w_arc, w_lbl, tb=4):
    """Returns (dependency_embeddings, distances, label_logits) -- all f32."""
    B, L, De = emb0.shape
    Dd = w_arc.shape[0]
    NL = w_lbl.shape[0]

    # Lane-dense sequence axis (dist's last dim).
    Lp = ((L + 127) // 128) * 128

    # v7x VMEM budget guard: the double-buffered (tb, Lp, Lp) f32 dist block is
    # the term that grows with L.  Keep it <= 16 MiB by shrinking tb.
    # TODO(synk): for very long sequences add a second grid axis tiling the
    # column (j) dimension of the distance matrix instead of only shrinking tb.
    while tb > 1 and 2 * tb * Lp * Lp * 4 > 16 * 1024 * 1024:
        tb //= 2

    # Keep grid = Bp // tb >= 2 (and even when possible) so both v7x TCs work.
    Bp = ((B + tb - 1) // tb) * tb

    # NOTE / TODO(synk): att is assumed to be a contiguous prefix padding mask
    # (standard tokenizer output); per-sentence lengths are scalar-prefetched
    # into SMEM and the mask is rebuilt in-kernel.  A non-prefix mask would
    # need the full bool mask streamed instead.
    lengths = _pad_to(jnp.sum(att.astype(jnp.int32), axis=-1), Bp, 0)

    # Activations streamed as f32 (bf16 cast done in-kernel, no wrapper copy);
    # weights are tiny: pre-transposed + bf16.
    emb0_p = _pad_to(_pad_to(emb0, Lp, 1), Bp, 0)
    emb1_p = _pad_to(_pad_to(emb1, Lp, 1), Bp, 0)
    warc_t = jnp.transpose(w_arc).astype(jnp.bfloat16)           # (De, Dd)
    wlbl_t = jnp.transpose(w_lbl).astype(jnp.bfloat16)           # (De, NL)

    out_shapes = (
        jax.ShapeDtypeStruct((Bp, Lp, Dd), jnp.float32),   # dependency_embeddings
        # Distances kept f32: greedy decode argmins over them; switch to bf16
        # here (halves the dominant writeback) only if near-tie flips are OK.
        jax.ShapeDtypeStruct((Bp, Lp, Lp), jnp.float32),   # distances
        jax.ShapeDtypeStruct((Bp, Lp, NL), jnp.float32),   # label_logits
    )

    dep, dist, logits = pl.pallas_call(
        depprobe_kernel,
        out_shape=out_shapes,
        grid_spec=pltpu.PrefetchScalarGridSpec(
            num_scalar_prefetch=1,
            grid=(Bp // tb,),
            in_specs=[
                pl.BlockSpec((tb, Lp, De), lambda b, lens: (b, 0, 0)),  # emb_layers[0]
                pl.BlockSpec((tb, Lp, De), lambda b, lens: (b, 0, 0)),  # emb_layers[1]
                pl.BlockSpec((De, Dd), lambda b, lens: (0, 0)),         # W_arc^T (full)
                pl.BlockSpec((De, NL), lambda b, lens: (0, 0)),         # W_lbl^T (full)
            ],
            out_specs=[
                pl.BlockSpec((tb, Lp, Dd), lambda b, lens: (b, 0, 0)),
                pl.BlockSpec((tb, Lp, Lp), lambda b, lens: (b, 0, 0)),
                pl.BlockSpec((tb, Lp, NL), lambda b, lens: (b, 0, 0)),
            ],
        ),
        compiler_params=pltpu.CompilerParams(
            dimension_semantics=("parallel",),
        ),
    )(lengths, emb0_p, emb1_p, warc_t, wlbl_t)

    return dep[:B, :L], dist[:B, :L, :L], logits[:B, :L]


# --------------------------------------------------------------------------
# Decode path (LabelClassifier.get_labels / RootedGraphPredictor.to_graph).
# TODO(synk): greedy graph decoding is sequential and data-dependent (Prim-style
# tree growth); kept as host-side numpy glue, semantics copied from torch.
# --------------------------------------------------------------------------
def get_labels_np(lbl_logits, root_label):
    x = np.asarray(lbl_logits, dtype=np.float64)
    with np.errstate(invalid="ignore", over="ignore"):
        m = np.max(x, axis=-1, keepdims=True)
        shifted = x - m                                   # all -inf rows -> nan
        lse = np.log(np.sum(np.exp(shifted), axis=-1, keepdims=True))
        logsm = shifted - lse
    logsm = np.nan_to_num(logsm, nan=-np.inf)
    roots = np.argmax(logsm[:, :, root_label], axis=-1)
    noroot = x.copy()
    noroot[:, :, root_label] = -np.inf
    labels = np.argmax(noroot, axis=-1).astype(np.int64)
    labels[np.arange(x.shape[0]), roots] = root_label
    labels[x[:, :, 0] == -np.inf] = -1
    return roots, labels


def to_graph_np(roots, distances, mask):
    distances = np.asarray(distances)
    mask = np.asarray(mask)
    graphs = np.full(mask.shape, -2, dtype=np.int64)
    for sidx in range(graphs.shape[0]):
        sen_len = int(mask[sidx].sum())
        sen_root = int(roots[sidx])
        graphs[sidx, sen_root] = -1
        tree_nodes = [sen_root]
        free_nodes = [n for n in range(sen_len) if n != sen_root]
        while free_nodes:
            cur = distances[sidx][np.ix_(tree_nodes, free_nodes)]
            min_idx = int(np.argmin(cur))
            min_tree = tree_nodes[min_idx // len(free_nodes)]
            min_free = free_nodes[min_idx % len(free_nodes)]
            graphs[sidx, min_free] = min_tree
            tree_nodes.append(min_free)
            free_nodes.remove(min_free)
    return graphs


def depprobe_forward(emb0, emb1, att, w_arc, w_lbl, root_label, decode=True, tb=4):
    dep_emb, distances, lbl_logits = depprobe_forward_core(
        emb0, emb1, att, w_arc, w_lbl, tb=tb)
    results = {
        "dependency_embeddings": dep_emb,
        "distances": distances,
        "label_logits": lbl_logits,
    }
    if decode:
        roots, labels = get_labels_np(lbl_logits, root_label)
        graphs = to_graph_np(roots, distances, np.asarray(att))
        results["graphs"] = graphs
        results["labels"] = labels
    return results


if __name__ == "__main__":
    # Synthetic setup consistent with DepProbe.__init__:
    #   emb_model.emb_dim = 32, dep_dim = 16, dep_rels (8 labels, 'root' at idx 2).
    # L chosen as 128 (lane-dense); B=8 with TB=4 -> grid of 2 (balances v7x TCs).
    B, L, EMB_DIM, DEP_DIM, TB = 8, 128, 32, 16, 4
    dep_rels = ["det", "nsubj", "root", "obj", "amod", "advmod", "punct", "case"]
    NUM_LABELS = len(dep_rels)
    root_label = dep_rels.index("root")

    key = jax.random.PRNGKey(0)
    k0, k1, k2, k3 = jax.random.split(key, 4)

    # Synthetic "emb_model" outputs: two embedding layers + padding mask.
    emb_layer0 = jax.random.normal(k0, (B, L, EMB_DIM), dtype=jnp.float32)
    emb_layer1 = jax.random.normal(k1, (B, L, EMB_DIM), dtype=jnp.float32)
    lengths = np.array([128, 96, 64, 100, 17, 55, 5, 77])
    att = jnp.asarray(np.arange(L)[None, :] < lengths[:, None])        # (B, L) bool

    # Probe parameters (nn.Linear(in, out, bias=False): weight is (out, in)).
    w_arc = jax.random.normal(k2, (DEP_DIM, EMB_DIM), dtype=jnp.float32) * 0.1
    w_lbl = jax.random.normal(k3, (NUM_LABELS, EMB_DIM), dtype=jnp.float32) * 0.1

    results = depprobe_forward(emb_layer0, emb_layer1, att, w_arc, w_lbl,
                               root_label, decode=True, tb=TB)
    jax.block_until_ready(results["dependency_embeddings"])
    jax.block_until_ready(results["distances"])
    jax.block_until_ready(results["label_logits"])

    # Reference check (numpy).  Inputs are bf16-rounded to mirror the kernel's
    # in-kernel bf16 casts; accumulation is f32 in both paths.
    e0 = np.asarray(emb_layer0.astype(jnp.bfloat16).astype(jnp.float32))
    e1 = np.asarray(emb_layer1.astype(jnp.bfloat16).astype(jnp.float32))
    wa = np.asarray(w_arc.astype(jnp.bfloat16).astype(jnp.float32))
    wl = np.asarray(w_lbl.astype(jnp.bfloat16).astype(jnp.float32))
    m = np.asarray(att)
    dep_ref = e0 @ wa.T
    dist_ref = ((dep_ref[:, :, None, :] - dep_ref[:, None, :, :]) ** 2).sum(-1)
    logit_ref = np.where(m[:, :, None], e1 @ wl.T, -np.inf)

    assert np.allclose(np.asarray(results["dependency_embeddings"]), dep_ref,
                       atol=1e-3), "dep mismatch"
    # Augmented-Gram form with bf16 operands on the MXU: algebraically equal to
    # the exact expansion, not bit-identical; tolerance loosened accordingly.
    assert np.allclose(np.asarray(results["distances"]), dist_ref,
                       atol=0.5, rtol=5e-2), "dist mismatch"
    assert np.allclose(np.asarray(results["label_logits"]), logit_ref,
                       atol=1e-3), "logits mismatch"
    assert results["graphs"].shape == (B, L)
    assert results["labels"].shape == (B, L)

    print("KERNEL_OK")
</pallas_src>

<mosaic_0001>
module attributes {stable_mosaic.version = 11 : i64} {
  func.func @depprobe_kernel(%arg0: i32, %arg1: memref<8xi32, #tpu.memory_space<smem>>, %arg2: memref<4x128x32xf32, #tpu.memory_space<vmem>>, %arg3: memref<4x128x32xf32, #tpu.memory_space<vmem>>, %arg4: memref<32x16xbf16, #tpu.memory_space<vmem>>, %arg5: memref<32x8xbf16, #tpu.memory_space<vmem>>, %arg6: memref<4x128x16xf32, #tpu.memory_space<vmem>>, %arg7: memref<4x128x128xf32, #tpu.memory_space<vmem>>, %arg8: memref<4x128x8xf32, #tpu.memory_space<vmem>>) attributes {dimension_semantics = [#tpu.dimension_semantics<parallel>], iteration_bounds = array<i64: 2>, scalar_prefetch = 1 : i64, scratch_operands = 0 : i64, tpu.core_type = #tpu.core_type<tc>, window_params = [{transform_indices = @transform_0, window_bounds = array<i64: 4, 128, 32>}, {transform_indices = @transform_1, window_bounds = array<i64: 4, 128, 32>}, {pipeline_mode = #tpu.pipeline_mode<synchronous>, transform_indices = @transform_2, window_bounds = array<i64: 32, 16>}, {pipeline_mode = #tpu.pipeline_mode<synchronous>, transform_indices = @transform_3, window_bounds = array<i64: 32, 8>}, {transform_indices = @transform_4, window_bounds = array<i64: 4, 128, 16>}, {transform_indices = @transform_5, window_bounds = array<i64: 4, 128, 128>}, {transform_indices = @transform_6, window_bounds = array<i64: 4, 128, 8>}]} {
    %c0 = arith.constant 0 : index
    %c0_0 = arith.constant 0 : index
    %c0_1 = arith.constant 0 : index
    %0 = vector.load %arg2[%c0, %c0_0, %c0_1] : memref<4x128x32xf32, #tpu.memory_space<vmem>>, vector<4x128x32xf32>
    %1 = arith.truncf %0 : vector<4x128x32xf32> to vector<4x128x32xbf16>
    %2 = vector.shape_cast %1 : vector<4x128x32xbf16> to vector<512x32xbf16>
    %c0_2 = arith.constant 0 : index
    %c0_3 = arith.constant 0 : index
    %3 = vector.load %arg4[%c0_2, %c0_3] : memref<32x16xbf16, #tpu.memory_space<vmem>>, vector<32x16xbf16>
    %cst = arith.constant dense<0.000000e+00> : vector<512x16xf32>
    %4 = tpu.matmul %2, %3, %cst {dimension_numbers = #tpu.dot_dimension_numbers<[1], [0], [0], [1], [0, 0, 1, 1], [], []>} : vector<512x32xbf16>, vector<32x16xbf16>, vector<512x16xf32> -> vector<512x16xf32>
    %5 = vector.shape_cast %4 : vector<512x16xf32> to vector<4x128x16xf32>
    %c0_4 = arith.constant 0 : index
    %c0_5 = arith.constant 0 : index
    %c0_6 = arith.constant 0 : index
    %6 = vector.load %arg6[%c0_4, %c0_5, %c0_6] : memref<4x128x16xf32, #tpu.memory_space<vmem>>, vector<4x128x16xf32>
    tpu.vector_store %arg6[%c0_4, %c0_5, %c0_6], %5 {strides = array<i32>} : memref<4x128x16xf32, #tpu.memory_space<vmem>>, vector<4x128x16xf32>,
    %7 = arith.mulf %5, %5 : vector<4x128x16xf32>
    %cst_7 = arith.constant dense<0.000000e+00> : vector<4x128xf32>
    %8 = vector.multi_reduction <add>, %7, %cst_7 [2] : vector<4x128x16xf32> to vector<4x128xf32>
    %9 = vector.shape_cast %8 : vector<4x128xf32> to vector<4x128x1xf32>
    %cst_8 = arith.constant 1.000000e+00 : f32
    %10 = vector.broadcast %cst_8 : f32 to vector<4x128x1xf32>
    %11 = tpu.concatenate %5, %10, %9 in 2 : vector<4x128x16xf32>, vector<4x128x1xf32>, vector<4x128x1xf32> -> vector<4x128x18xf32>
    %12 = arith.truncf %11 : vector<4x128x18xf32> to vector<4x128x18xbf16>
    %cst_9 = arith.constant -2.000000e+00 : f32
    %13 = vector.broadcast %cst_9 : f32 to vector<4x128x16xf32>
    %14 = arith.mulf %13, %5 : vector<4x128x16xf32>
    %15 = tpu.concatenate %14, %9, %10 in 2 : vector<4x128x16xf32>, vector<4x128x1xf32>, vector<4x128x1xf32> -> vector<4x128x18xf32>
    %16 = arith.truncf %15 : vector<4x128x18xf32> to vector<4x128x18xbf16>
    "tpu.trace_start"() <{level = 10 : i32, message = "bik,bjk->bij"}> : () -> ()
    %cst_10 = arith.constant dense<0.000000e+00> : vector<4x128x128xf32>
    %17 = tpu.matmul %12, %16, %cst_10 {dimension_numbers = #tpu.dot_dimension_numbers<[2], [2], [1], [1], [0, 0, 0, 1, 1, 1], [0], [0]>} : vector<4x128x18xbf16>, vector<4x128x18xbf16>, vector<4x128x128xf32> -> vector<4x128x128xf32>
    "tpu.trace_stop"() : () -> ()
    %cst_11 = arith.constant 0.000000e+00 : f32
    %18 = vector.broadcast %cst_11 : f32 to vector<4x128x128xf32>
    %19 = arith.maximumf %17, %18 : vector<4x128x128xf32>
    %c0_12 = arith.constant 0 : index
    %c0_13 = arith.constant 0 : index
    %c0_14 = arith.constant 0 : index
    %20 = vector.load %arg7[%c0_12, %c0_13, %c0_14] : memref<4x128x128xf32, #tpu.memory_space<vmem>>, vector<4x128x128xf32>
    tpu.vector_store %arg7[%c0_12, %c0_13, %c0_14], %19 {strides = array<i32>} : memref<4x128x128xf32, #tpu.memory_space<vmem>>, vector<4x128x128xf32>,
    %c0_15 = arith.constant 0 : index
    %c0_16 = arith.constant 0 : index
    %c0_17 = arith.constant 0 : index
    %21 = vector.load %arg3[%c0_15, %c0_16, %c0_17] : memref<4x128x32xf32, #tpu.memory_space<vmem>>, vector<4x128x32xf32>
    %22 = arith.truncf %21 : vector<4x128x32xf32> to vector<4x128x32xbf16>
    %23 = vector.shape_cast %22 : vector<4x128x32xbf16> to vector<512x32xbf16>
    %c0_18 = arith.constant 0 : index
    %c0_19 = arith.constant 0 : index
    %24 = vector.load %arg5[%c0_18, %c0_19] : memref<32x8xbf16, #tpu.memory_space<vmem>>, vector<32x8xbf16>
    %cst_20 = arith.constant dense<0.000000e+00> : vector<512x8xf32>
    %25 = tpu.matmul %23, %24, %cst_20 {dimension_numbers = #tpu.dot_dimension_numbers<[1], [0], [0], [1], [0, 0, 1, 1], [], []>} : vector<512x32xbf16>, vector<32x8xbf16>, vector<512x8xf32> -> vector<512x8xf32>
    %26 = vector.shape_cast %25 : vector<512x8xf32> to vector<4x128x8xf32>
    %27 = tpu.iota {dimensions = array<i32: 0>} : vector<128x8xi32>
    %c4_i32 = arith.constant 4 : i32
    %28 = arith.muli %arg0, %c4_i32 : i32
    %c0_i32 = arith.constant 0 : i32
    %29 = arith.addi %28, %c0_i32 : i32
    %30 = arith.index_cast %29 : i32 to index
    %31 = memref.load %arg1[%30] : memref<8xi32, #tpu.memory_space<smem>>
    %32 = vector.broadcast %31 : i32 to vector<128x8xi32>
    %33 = arith.cmpi slt, %27, %32 : vector<128x8xi32>
    %34 = vector.extract_strided_slice %26 {offsets = [0, 0, 0], sizes = [1, 128, 8], strides = [1, 1, 1]} : vector<4x128x8xf32> to vector<1x128x8xf32>
    %35 = vector.shape_cast %34 : vector<1x128x8xf32> to vector<128x8xf32>
    %cst_21 = arith.constant 0xFF800000 : f32
    %36 = vector.broadcast %cst_21 : f32 to vector<128x8xf32>
    %37 = arith.select %33, %35, %36 : vector<128x8xi1>, vector<128x8xf32>
    %c4_i32_22 = arith.constant 4 : i32
    %38 = arith.muli %arg0, %c4_i32_22 : i32
    %c1_i32 = arith.constant 1 : i32
    %39 = arith.addi %38, %c1_i32 : i32
    %40 = arith.index_cast %39 : i32 to index
    %41 = memref.load %arg1[%40] : memref<8xi32, #tpu.memory_space<smem>>
    %42 = vector.broadcast %41 : i32 to vector<128x8xi32>
    %43 = arith.cmpi slt, %27, %42 : vector<128x8xi32>
    %44 = vector.extract_strided_slice %26 {offsets = [1, 0, 0], sizes = [1, 128, 8], strides = [1, 1, 1]} : vector<4x128x8xf32> to vector<1x128x8xf32>
    %45 = vector.shape_cast %44 : vector<1x128x8xf32> to vector<128x8xf32>
    %cst_23 = arith.constant 0xFF800000 : f32
    %46 = vector.broadcast %cst_23 : f32 to vector<128x8xf32>
    %47 = arith.select %43, %45, %46 : vector<128x8xi1>, vector<128x8xf32>
    %c4_i32_24 = arith.constant 4 : i32
    %48 = arith.muli %arg0, %c4_i32_24 : i32
    %c2_i32 = arith.constant 2 : i32
    %49 = arith.addi %48, %c2_i32 : i32
    %50 = arith.index_cast %49 : i32 to index
    %51 = memref.load %arg1[%50] : memref<8xi32, #tpu.memory_space<smem>>
    %52 = vector.broadcast %51 : i32 to vector<128x8xi32>
    %53 = arith.cmpi slt, %27, %52 : vector<128x8xi32>
    %54 = vector.extract_strided_slice %26 {offsets = [2, 0, 0], sizes = [1, 128, 8], strides = [1, 1, 1]} : vector<4x128x8xf32> to vector<1x128x8xf32>
    %55 = vector.shape_cast %54 : vector<1x128x8xf32> to vector<128x8xf32>
    %cst_25 = arith.constant 0xFF800000 : f32
    %56 = vector.broadcast %cst_25 : f32 to vector<128x8xf32>
    %57 = arith.select %53, %55, %56 : vector<128x8xi1>, vector<128x8xf32>
    %c4_i32_26 = arith.constant 4 : i32
    %58 = arith.muli %arg0, %c4_i32_26 : i32
    %c3_i32 = arith.constant 3 : i32
    %59 = arith.addi %58, %c3_i32 : i32
    %60 = arith.index_cast %59 : i32 to index
    %61 = memref.load %arg1[%60] : memref<8xi32, #tpu.memory_space<smem>>
    %62 = vector.broadcast %61 : i32 to vector<128x8xi32>
    %63 = arith.cmpi slt, %27, %62 : vector<128x8xi32>
    %64 = vector.extract_strided_slice %26 {offsets = [3, 0, 0], sizes = [1, 128, 8], strides = [1, 1, 1]} : vector<4x128x8xf32> to vector<1x128x8xf32>
    %65 = vector.shape_cast %64 : vector<1x128x8xf32> to vector<128x8xf32>
    %cst_27 = arith.constant 0xFF800000 : f32
    %66 = vector.broadcast %cst_27 : f32 to vector<128x8xf32>
    %67 = arith.select %63, %65, %66 : vector<128x8xi1>, vector<128x8xf32>
    %68 = vector.shape_cast %37 : vector<128x8xf32> to vector<1x128x8xf32>
    %69 = vector.shape_cast %47 : vector<128x8xf32> to vector<1x128x8xf32>
    %70 = vector.shape_cast %57 : vector<128x8xf32> to vector<1x128x8xf32>
    %71 = vector.shape_cast %67 : vector<128x8xf32> to vector<1x128x8xf32>
    %72 = tpu.concatenate %68, %69, %70, %71 in 0 : vector<1x128x8xf32>, vector<1x128x8xf32>, vector<1x128x8xf32>, vector<1x128x8xf32> -> vector<4x128x8xf32>
    %c0_28 = arith.constant 0 : index
    %c0_29 = arith.constant 0 : index
    %c0_30 = arith.constant 0 : index
    %73 = vector.load %arg8[%c0_28, %c0_29, %c0_30] : memref<4x128x8xf32, #tpu.memory_space<vmem>>, vector<4x128x8xf32>
    tpu.vector_store %arg8[%c0_28, %c0_29, %c0_30], %72 {strides = array<i32>} : memref<4x128x8xf32, #tpu.memory_space<vmem>>, vector<4x128x8xf32>,
    return
  }
  func.func @transform_0(%arg0: i32, %arg1: memref<8xi32, #tpu.memory_space<smem>>) -> (i32, i32, i32) {
    %c0_i32 = arith.constant 0 : i32
    %c0_i32_0 = arith.constant 0 : i32
    %c0_i32_1 = arith.constant 0 : i32
    return %arg0, %c0_i32, %c0_i32_0 : i32, i32, i32
  }
  func.func @transform_1(%arg0: i32, %arg1: memref<8xi32, #tpu.memory_space<smem>>) -> (i32, i32, i32) {
    %c0_i32 = arith.constant 0 : i32
    %c0_i32_0 = arith.constant 0 : i32
    %c0_i32_1 = arith.constant 0 : i32
    return %arg0, %c0_i32, %c0_i32_0 : i32, i32, i32
  }
  func.func @transform_2(%arg0: i32, %arg1: memref<8xi32, #tpu.memory_space<smem>>) -> (i32, i32) {
    %c0_i32 = arith.constant 0 : i32
    %c0_i32_0 = arith.constant 0 : i32
    %c0_i32_1 = arith.constant 0 : i32
    return %c0_i32, %c0_i32_0 : i32, i32
  }
  func.func @transform_3(%arg0: i32, %arg1: memref<8xi32, #tpu.memory_space<smem>>) -> (i32, i32) {
    %c0_i32 = arith.constant 0 : i32
    %c0_i32_0 = arith.constant 0 : i32
    %c0_i32_1 = arith.constant 0 : i32
    return %c0_i32, %c0_i32_0 : i32, i32
  }
  func.func @transform_4(%arg0: i32, %arg1: memref<8xi32, #tpu.memory_space<smem>>) -> (i32, i32, i32) {
    %c0_i32 = arith.constant 0 : i32
    %c0_i32_0 = arith.constant 0 : i32
    %c0_i32_1 = arith.constant 0 : i32
    return %arg0, %c0_i32, %c0_i32_0 : i32, i32, i32
  }
  func.func @transform_5(%arg0: i32, %arg1: memref<8xi32, #tpu.memory_space<smem>>) -> (i32, i32, i32) {
    %c0_i32 = arith.constant 0 : i32
    %c0_i32_0 = arith.constant 0 : i32
    %c0_i32_1 = arith.constant 0 : i32
    return %arg0, %c0_i32, %c0_i32_0 : i32, i32, i32
  }
  func.func @transform_6(%arg0: i32, %arg1: memref<8xi32, #tpu.memory_space<smem>>) -> (i32, i32, i32) {
    %c0_i32 = arith.constant 0 : i32
    %c0_i32_0 = arith.constant 0 : i32
    %c0_i32_1 = arith.constant 0 : i32
    return %arg0, %c0_i32, %c0_i32_0 : i32, i32, i32
  }
}

</mosaic_0001>

<bundles_post_ra>
// kernel: tpu_custom_call.1
= control target key start
LH: loop header
LB: loop body
LE: loop exit
PB: predicated region body
PF: predicated region fallthrough
CT: control target
= control target key end

     0   :  { %s5875_s0 = inlined_call_operand.vmem [shape: s32[8], index: 0, kind: input, shape index: {}]   ;;  %s5876_s1 = inlined_call_operand.vmem [shape: f32[8,128,32], index: 1, kind: input, shape index: {}]   ;;  %s5877_s2 = inlined_call_operand.vmem [shape: f32[8,128,32], index: 2, kind: input, shape index: {}]   ;;  %s5878_s3 = inlined_call_operand.vmem [shape: bf16[32,16], index: 3, kind: input, shape index: {}]   ;;  %s5879_s4 = inlined_call_operand.vmem [shape: bf16[32,8], index: 4, kind: input, shape index: {}]   ;;  %s5880_s5 = inlined_call_operand.vmem [shape: f32[8,128,16], index: 5, kind: output, shape index: {0}]   ;;  %s5881_s6 = inlined_call_operand.hbm [shape: f32[8,128,128], index: 6, kind: output, shape index: {1}]   ;;  %s5882_s7 = inlined_call_operand.vmem [shape: f32[8,128,8], index: 7, kind: output, shape index: {2}]  }
   0x1   :  { %s13_s26 = sshll.u32 %s5875_s0, 4  ;;  %s14_s26 = int_to_ptr.vmem [resolvable:$true] %s13_s26 }
   0x2   :  { %s3721_s27 = scalar_lea.vmem %s14_s26, 16  ;;  %p3726_p1 = scmp.lt.s32.totalorder %s14_s26, %s14_s26 }
   0x3   :  { %p3722_p0 = scmp.ne.s32.totalorder %s14_s26, %s3721_s27  ;;  %p3727_p2 = scmp.lt.s32.totalorder %s3721_s27, %s3721_s27 }
   0x5   :  { %p3728_p3 = por %p3727_p2, %p3726_p1 }
   0x7   :  { %p3729_p4 = pnand %p3728_p3, %p3722_p0 }
   0x9   :  { %3732 = shalt.err (!%p3729_p4)  }
   0xa   :  { %s3797_s28 = smov [#allocation3]  }
   0xb   :  { %16 = dma.vmem_to_smem %s14_s26, 16, %s3797_s28, [#allocation2] }
   0xc   :  { %3775 = dma.done.wait [#allocation2], 16 }
   0xd   :  { %3776 = vsyncadd [#allocation2], 4294967280 }
   0xe   :  { %18 = sfence }
   0xf   :  { %19 = vsyncpa [#allocation5], 0 }
  0x10   :  { %21 = vsyncpa [#allocation5 + $0x1], 0  ;;  %s3844_s29 = smov 0   ;;  %s3846_s30 = smov 0  }
  0x11   :  { %s3848_s0 = smov 0   ;;  %s3850_s8 = smov 0  }
  0x12 LB: > { %s3865_s9 = sadd.s32 4294967295, %s3795_s8   ;;  %s3113_s10 = sadd.s32 4294967294, %s3795_s8   ;;  %s3795_s8 = sphi %s3850_s8, %s6005_s8   ;;  %s3791_s0 = sphi %s3848_s0, %s6004_s0   ;;  %s3787_s30 = sphi %s3846_s30, %s6003_s30   ;;  %s3783_s29 = sphi %s3844_s29, %s6002_s29  }
  0x13   : > { %s3869_s11 = sadd.s32 1, %s3795_s8   ;;  %s154_s12 = sadd.s32 1, %s3791_s0 }
  0x14   : > { %s151_s13 = ssub.s32 %s3795_s8, %s3869_s11  ;;  %p164_p5 = scmp.ne.s32.totalorder %s3791_s0, %s3787_s30 }
  0x15   : > { %p152_p6 = scmp.eq.s32.totalorder %s151_s13, 0  ;;  %p165_p7 = scmp.eq.s32.totalorder %s3865_s9, 1 }
  0x16   : > { %p170_p8 = scmp.ne.s32.totalorder %s3787_s30, %s3783_s29  ;;  %p171_p9 = scmp.eq.s32.totalorder %s3113_s10, 1 }
  0x17   : > { %s3880_s14 = scalar_select %p152_p6, %s3791_s0, %s154_s12  }
  0x18   : > { %p3882_p10 = por %p165_p7, %p164_p5  ;;  %p3886_p11 = por %p171_p9, %p170_p8 }
  0x19   : > { %p3116_p12 = scmp.ge.s32.totalorder %s3795_s8, 1  ;;  %p241_p13 = scmp.lt.s32.totalorder %s3795_s8, 3 }
  0x1b   : > { %p242_p0 = pnand %p3116_p12, %p241_p13 }
  0x1d   : > { %245 = sbr.rel (%p242_p0) target bundleno = 843 (0x34b), region = 36 }
  0x22   : > { %v3717_v0 = vld [vmem:[%s5878_s3 + $0x8] sm:$0xff]   ;;  %s3896_s19 = sshll.u32 %s3865_s9, 2  ;;  %v3718_v1 = vld [vmem:[%s5878_s3] sm:$0xff]   ;;  %vm432_vm0 = vcmask 261120   ;;  %vm818_vm1 = vcmask 130048   ;;  %vm1203_vm2 = vcmask 138240  }
  0x23   : > { %p291_p1 = scmp.lt.s32.totalorder %s3896_s19, 7  ;;  %3375 = vmatprep.subr.bf16.mxu0 %v3717_v0  ;;  %3639 = vmatprep.subr.bf16.mxu1 %v3717_v0  ;;  %vm1524_vm3 = vcmask 146432   ;;  %s279_s24 = sand.u32 1, %s3787_s30   ;;  %vm2887_vm5 = vcmask 64512  }
  0x24   : > { %3376 = vmatpush3.bf16.msra.mxu0 %v3717_v0  ;;  %3641 = vmatpush3.bf16.msra.mxu1 %v3717_v0  ;;  %s3117_s25 = sshll.u32 %s279_s24, 9  ;;  %s2748_s27 = sld [smem:[#allocation3 + %s3896_s19]] }
  0x25   : > { %s292_s22 = scalar_select %p291_p1, %s3896_s19, 7  ;;  %3377 = vmatprep.subr.bf16.mxu0 %v3718_v1  ;;  %3640 = vmatprep.subr.bf16.mxu1 %v3718_v1 }
  0x26   : > { %s2817_s17 = sadd.s32 2, %s3896_s19  ;;  %s2852_s20 = sadd.s32 3, %s3896_s19 }
  0x27   : > { %s3903_s23 = sshll.u32 %s292_s22, 7  ;;  %s2818_s18 = sld [smem:[#allocation3 + %s2817_s17]] }
  0x28   : > { %s3909_s26 = scalar_lea.vmem %s5876_s1, %s3903_s23  ;;  %3378 = vmatpush3.bf16.msra.mxu0 %v3718_v1  ;;  %3642 = vmatpush3.bf16.msra.mxu1 %v3718_v1  ;;  %s4011_s10 = scalar_lea.vmem %s5880_s5, %s3903_s23 }
  0x29   : > { %v320_v2 = vld [vmem:[%s3909_s26] sm:$0xff]  ;;  %v321_v3 = vld [vmem:[%s3909_s26 + $0x8] sm:$0xff]  ;;  %v322_v7 = vld [vmem:[%s3909_s26 + $0x10] sm:$0xff]  ;;  %s5013_s22 = scalar_lea.vmem %s5877_s2, %s3903_s23  ;;  %s5486_s12 = scalar_lea.vmem %s5882_s7, %s3903_s23 }
  0x2a   : > { %v352_v4 = vld [vmem:[%s3909_s26 + $0x100] sm:$0xff]  ;;  %v384_v5 = vpack.c.bf16 %v321_v3, %v320_v2  ;;  %v353_v6 = vld [vmem:[%s3909_s26 + $0x108] sm:$0xff]  ;;  %v323_v8 = vld [vmem:[%s3909_s26 + $0x18] sm:$0xff]  ;;  %s2782_s23 = sadd.s32 1, %s3896_s19  ;;  %s2853_s21 = sld [smem:[#allocation3 + %s2852_s20]] }
  0x2b   : > { %v400_v9 = vpack.c.bf16 %v353_v6, %v352_v4  ;;  %v385_v10 = vpack.c.bf16 %v323_v8, %v322_v7  ;;  %v354_v11 = vld [vmem:[%s3909_s26 + $0x110] sm:$0xff]  ;;  %v355_v12 = vld [vmem:[%s3909_s26 + $0x118] sm:$0xff]  ;;  %v324_v13 = vld [vmem:[%s3909_s26 + $0x20] sm:$0xff]  ;;  %s2783_s13 = sld [smem:[#allocation3 + %s2782_s23]]  ;;  %s3242_s19 = sshll.u32 %s3865_s9, 13 }
  0x2c   : > { %3379 = vmatprep.mubr.msk.bf16.mxu0 %vm432_vm0, %v384_v5  ;;  %v401_v14 = vpack.c.bf16 %v355_v12, %v354_v11  ;;  %v325_v15 = vld [vmem:[%s3909_s26 + $0x28] sm:$0xff]  ;;  %v356_v16 = vld [vmem:[%s3909_s26 + $0x120] sm:$0xff]  ;;  %v326_v20 = vld [vmem:[%s3909_s26 + $0x30] sm:$0xff]  ;;  %s5835_s28 = scalar_lea.sflag [#allocation5], %s279_s24  ;;  %s3798_s23 = smov [#allocation4]  }
  0x2d   : > { %v357_v17 = vld [vmem:[%s3909_s26 + $0x128] sm:$0xff]  ;;  %3411 = vmatprep.mubr.msk.bf16.mxu1 %vm432_vm0, %v400_v9  ;;  %3380 = vmatmul.mubr.msk.bf16.vlgmr.msra.gmra.mxu0 %vm432_vm0, %v385_v10  ;;  %v386_v18 = vpack.c.bf16 %v325_v15, %v324_v13  ;;  %v327_v21 = vld [vmem:[%s3909_s26 + $0x38] sm:$0xff]  ;;  %v358_v22 = vld [vmem:[%s3909_s26 + $0x130] sm:$0xff] }
  0x2e   : > { %v402_v19 = vpack.c.bf16 %v357_v17, %v356_v16  ;;  %3412 = vmatmul.mubr.msk.bf16.vlgmr.msra.gmra.mxu1 %vm432_vm0, %v401_v14  ;;  %v359_v23 = vld [vmem:[%s3909_s26 + $0x138] sm:$0xff]  ;;  %v328_v24 = vld [vmem:[%s3909_s26 + $0x40] sm:$0xff]  ;;  %v329_v25 = vld [vmem:[%s3909_s26 + $0x48] sm:$0xff]  ;;  %v387_v28 = vpack.c.bf16 %v327_v21, %v326_v20 }
  0x2f   : > { %3383 = vmatprep.mubr.msk.bf16.mxu0 %vm432_vm0, %v386_v18  ;;  %v360_v26 = vld [vmem:[%s3909_s26 + $0x140] sm:$0xff]  ;;  %v361_v27 = vld [vmem:[%s3909_s26 + $0x148] sm:$0xff]  ;;  %v403_v29 = vpack.c.bf16 %v359_v23, %v358_v22  ;;  %v388_v30 = vpack.c.bf16 %v329_v25, %v328_v24  ;;  %v330_v32 = vld [vmem:[%s3909_s26 + $0x50] sm:$0xff] }
  0x30   : > { %3415 = vmatprep.mubr.msk.bf16.mxu1 %vm432_vm0, %v402_v19  ;;  %v404_v31 = vpack.c.bf16 %v361_v27, %v360_v26  ;;  %v331_v33 = vld [vmem:[%s3909_s26 + $0x58] sm:$0xff]  ;;  %v362_v34 = vld [vmem:[%s3909_s26 + $0x150] sm:$0xff]  ;;  %v332_v36 = vld [vmem:[%s3909_s26 + $0x60] sm:$0xff] }
  0x31   : > { %v363_v35 = vld [vmem:[%s3909_s26 + $0x158] sm:$0xff]  ;;  %v333_v37 = vld [vmem:[%s3909_s26 + $0x68] sm:$0xff]  ;;  %v364_v38 = vld [vmem:[%s3909_s26 + $0x160] sm:$0xff]  ;;  %v389_v40 = vpack.c.bf16 %v331_v33, %v330_v32 }
  0x32   : > { %v365_v39 = vld [vmem:[%s3909_s26 + $0x168] sm:$0xff]  ;;  %v405_v41 = vpack.c.bf16 %v363_v35, %v362_v34  ;;  %v390_v42 = vpack.c.bf16 %v333_v37, %v332_v36  ;;  %v334_v44 = vld [vmem:[%s3909_s26 + $0x70] sm:$0xff]  ;;  %v335_v45 = vld [vmem:[%s3909_s26 + $0x78] sm:$0xff] }
  0x33   : > { %v406_v43 = vpack.c.bf16 %v365_v39, %v364_v38  ;;  %v366_v46 = vld [vmem:[%s3909_s26 + $0x170] sm:$0xff]  ;;  %v367_v47 = vld [vmem:[%s3909_s26 + $0x178] sm:$0xff]  ;;  %v336_v48 = vld [vmem:[%s3909_s26 + $0x80] sm:$0xff]  ;;  %v391_v52 = vpack.c.bf16 %v335_v45, %v334_v44 }
  0x34   : > { %v337_v49 = vld [vmem:[%s3909_s26 + $0x88] sm:$0xff]  ;;  %v368_v50 = vld [vmem:[%s3909_s26 + $0x180] sm:$0xff]  ;;  %v407_v53 = vpack.c.bf16 %v367_v47, %v366_v46  ;;  %v338_v56 = vld [vmem:[%s3909_s26 + $0x90] sm:$0xff] }
  0x35   : > { %3384 = vmatmul.mubr.msk.bf16.gmra.mxu0 %vm432_vm0, %v387_v28  ;;  %v369_v51 = vld [vmem:[%s3909_s26 + $0x188] sm:$0xff]  ;;  %v392_v54 = vpack.c.bf16 %v337_v49, %v336_v48  ;;  %v339_v57 = vld [vmem:[%s3909_s26 + $0x98] sm:$0xff]  ;;  %v340_v58 = vld [vmem:[%s3909_s26 + $0xa0] sm:$0xff] }
  0x36   : > { %3416 = vmatmul.mubr.msk.bf16.gmra.mxu1 %vm432_vm0, %v403_v29  ;;  %3387 = vmatprep.mubr.msk.bf16.mxu0 %vm432_vm0, %v388_v30  ;;  %v408_v55 = vpack.c.bf16 %v369_v51, %v368_v50  ;;  %v341_v59 = vld [vmem:[%s3909_s26 + $0xa8] sm:$0xff]  ;;  %v370_v60 = vld [vmem:[%s3909_s26 + $0x190] sm:$0xff]  ;;  %v371_v61 = vld [vmem:[%s3909_s26 + $0x198] sm:$0xff]  ;;  %v393_v0 = vpack.c.bf16 %v339_v57, %v338_v56 }
  0x37   : > { %3419 = vmatprep.mubr.msk.bf16.mxu1 %vm432_vm0, %v404_v31  ;;  %v372_v62 = vld [vmem:[%s3909_s26 + $0x1a0] sm:$0xff]  ;;  %v373_v63 = vld [vmem:[%s3909_s26 + $0x1a8] sm:$0xff]  ;;  %v394_v1 = vpack.c.bf16 %v341_v59, %v340_v58  ;;  %v409_v2 = vpack.c.bf16 %v371_v61, %v370_v60  ;;  %v342_v4 = vld [vmem:[%s3909_s26 + $0xb0] sm:$0xff] }
  0x38   : > { %v410_v3 = vpack.c.bf16 %v373_v63, %v372_v62  ;;  %v343_v5 = vld [vmem:[%s3909_s26 + $0xb8] sm:$0xff]  ;;  %v344_v6 = vld [vmem:[%s3909_s26 + $0xc0] sm:$0xff]  ;;  %v345_v7 = vld [vmem:[%s3909_s26 + $0xc8] sm:$0xff] }
  0x39   : > { %v374_v8 = vld [vmem:[%s3909_s26 + $0x1b0] sm:$0xff]  ;;  %v375_v9 = vld [vmem:[%s3909_s26 + $0x1b8] sm:$0xff]  ;;  %v376_v10 = vld [vmem:[%s3909_s26 + $0x1c0] sm:$0xff]  ;;  %v395_v12 = vpack.c.bf16 %v343_v5, %v342_v4  ;;  %v396_v13 = vpack.c.bf16 %v345_v7, %v344_v6 }
  0x3a   : > { %v377_v11 = vld [vmem:[%s3909_s26 + $0x1c8] sm:$0xff]  ;;  %v411_v14 = vpack.c.bf16 %v375_v9, %v374_v8  ;;  %v346_v16 = vld [vmem:[%s3909_s26 + $0xd0] sm:$0xff]  ;;  %v347_v17 = vld [vmem:[%s3909_s26 + $0xd8] sm:$0xff] }
  0x3b   : > { %v412_v15 = vpack.c.bf16 %v377_v11, %v376_v10  ;;  %v348_v18 = vld [vmem:[%s3909_s26 + $0xe0] sm:$0xff]  ;;  %v349_v19 = vld [vmem:[%s3909_s26 + $0xe8] sm:$0xff]  ;;  %v378_v20 = vld [vmem:[%s3909_s26 + $0x1d0] sm:$0xff]  ;;  %v397_v24 = vpack.c.bf16 %v347_v17, %v346_v16 }
  0x3c   : > { %v379_v21 = vld [vmem:[%s3909_s26 + $0x1d8] sm:$0xff]  ;;  %v380_v22 = vld [vmem:[%s3909_s26 + $0x1e0] sm:$0xff]  ;;  %v381_v23 = vld [vmem:[%s3909_s26 + $0x1e8] sm:$0xff]  ;;  %v398_v25 = vpack.c.bf16 %v349_v19, %v348_v18 }
  0x3d   : > { %3388 = vmatmul.mubr.msk.bf16.gmra.mxu0 %vm432_vm0, %v389_v40  ;;  %v413_v26 = vpack.c.bf16 %v379_v21, %v378_v20  ;;  %v414_v27 = vpack.c.bf16 %v381_v23, %v380_v22  ;;  %v350_v28 = vld [vmem:[%s3909_s26 + $0xf0] sm:$0xff]  ;;  %v351_v29 = vld [vmem:[%s3909_s26 + $0xf8] sm:$0xff] }
  0x3e   : > { %3420 = vmatmul.mubr.msk.bf16.gmra.mxu1 %vm432_vm0, %v405_v41  ;;  %3391 = vmatprep.mubr.msk.bf16.mxu0 %vm432_vm0, %v390_v42  ;;  %v382_v30 = vld [vmem:[%s3909_s26 + $0x1f0] sm:$0xff]  ;;  %v383_v31 = vld [vmem:[%s3909_s26 + $0x1f8] sm:$0xff]  ;;  %v399_v32 = vpack.c.bf16 %v351_v29, %v350_v28  ;;  %s5437_s26 = scalar_lea.vmem [#allocation4], %s3117_s25 }
  0x3f   : > { %3423 = vmatprep.mubr.msk.bf16.mxu1 %vm432_vm0, %v406_v43  ;;  %v415_v33 = vpack.c.bf16 %v383_v31, %v382_v30 }
  0x45   : > { %3392 = vmatmul.mubr.msk.bf16.gmra.mxu0 %vm432_vm0, %v391_v52 }
  0x46   : > { %3424 = vmatmul.mubr.msk.bf16.gmra.mxu1 %vm432_vm0, %v407_v53  ;;  %3395 = vmatprep.mubr.msk.bf16.mxu0 %vm432_vm0, %v392_v54 }
  0x47   : > { %3427 = vmatprep.mubr.msk.bf16.mxu1 %vm432_vm0, %v408_v55 }
  0x4d   : > { %3396 = vmatmul.mubr.msk.bf16.gmra.mxu0 %vm432_vm0, %v393_v0 }
  0x4e   : > { %3399 = vmatprep.mubr.msk.bf16.mxu0 %vm432_vm0, %v394_v1  ;;  %3428 = vmatmul.mubr.msk.bf16.gmra.mxu1 %vm432_vm0, %v409_v2 }
  0x4f   : > { %3431 = vmatprep.mubr.msk.bf16.mxu1 %vm432_vm0, %v410_v3 }
  0x55   : > { %3400 = vmatmul.mubr.msk.bf16.gmra.mxu0 %vm432_vm0, %v395_v12 }
  0x56   : > { %3403 = vmatprep.mubr.msk.bf16.mxu0 %vm432_vm0, %v396_v13  ;;  %3432 = vmatmul.mubr.msk.bf16.gmra.mxu1 %vm432_vm0, %v411_v14 }
  0x57   : > { %3435 = vmatprep.mubr.msk.bf16.mxu1 %vm432_vm0, %v412_v15 }
  0x5d   : > { %3404 = vmatmul.mubr.msk.bf16.gmra.mxu0 %vm432_vm0, %v397_v24 }
  0x5e   : > { %3407 = vmatprep.mubr.msk.bf16.mxu0 %vm432_vm0, %v398_v25  ;;  %3436 = vmatmul.mubr.msk.bf16.gmra.mxu1 %vm432_vm0, %v413_v26 }
  0x5f   : > { %3439 = vmatprep.mubr.msk.bf16.mxu1 %vm432_vm0, %v414_v27 }
  0x65   : > { %3408 = vmatmul.mubr.msk.bf16.gmra.mxu0 %vm432_vm0, %v399_v32 }
  0x66   : > { %3440 = vmatmul.mubr.msk.bf16.gmra.mxu1 %vm432_vm0, %v415_v33 }
  0xed   : > { %v4013_v34 = vpop.f32.mrf.mxu0 }
  0xee   : > { %821 = vst.msk [vmem:[%s4011_s10 + $0x10] sm:$0xff] %vm818_vm1, %v4013_v34  ;;  %v4018_v35 = vpop.f32.mrf.mxu1 }
  0xef   : > { %v4020_v36 = vpop.f32.mrf.mxu0  ;;  %853 = vst.msk [vmem:[%s4011_s10 + $0x110] sm:$0xff] %vm818_vm1, %v4018_v35 }
  0xf0   : > { %819 = vst.msk [vmem:[%s4011_s10] sm:$0xff] %vm818_vm1, %v4020_v36  ;;  %v4025_v37 = vpop.f32.mrf.mxu1 }
  0xf1   : > { %v4027_v38 = vpop.f32.mrf.mxu0  ;;  %851 = vst.msk [vmem:[%s4011_s10 + $0x100] sm:$0xff] %vm818_vm1, %v4025_v37 }
  0xf2   : > { %822 = vst.msk [vmem:[%s4011_s10 + $0x18] sm:$0xff] %vm818_vm1, %v4027_v38  ;;  %v4032_v39 = vpop.f32.mrf.mxu1 }
  0xf3   : > { %v4034_v40 = vpop.f32.mrf.mxu0  ;;  %854 = vst.msk [vmem:[%s4011_s10 + $0x118] sm:$0xff] %vm818_vm1, %v4032_v39 }
  0xf4   : > { %820 = vst.msk [vmem:[%s4011_s10 + $0x8] sm:$0xff] %vm818_vm1, %v4034_v40  ;;  %v4039_v41 = vpop.f32.mrf.mxu1 }
  0xf5   : > { %5933 = vst [vmem:[#allocation8_spill] sm:$0xff] %v4039_v41  ;;  %v4041_v42 = vpop.f32.mrf.mxu0  ;;  %852 = vst.msk [vmem:[%s4011_s10 + $0x108] sm:$0xff] %vm818_vm1, %v4039_v41 }
  0xf6   : > { %5934 = vst [vmem:[#allocation9_spill] sm:$0xff] %v4041_v42  ;;  %825 = vst.msk [vmem:[%s4011_s10 + $0x30] sm:$0xff] %vm818_vm1, %v4041_v42  ;;  %v4046_v43 = vpop.f32.mrf.mxu1 }
  0xf7   : > { %5935 = vst [vmem:[#allocation10_spill] sm:$0xff] %v4046_v43  ;;  %v4048_v44 = vpop.f32.mrf.mxu0  ;;  %857 = vst.msk [vmem:[%s4011_s10 + $0x130] sm:$0xff] %vm818_vm1, %v4046_v43 }
  0xf8   : > { %5936 = vst [vmem:[#allocation11_spill] sm:$0xff] %v4048_v44  ;;  %823 = vst.msk [vmem:[%s4011_s10 + $0x20] sm:$0xff] %vm818_vm1, %v4048_v44  ;;  %v4053_v45 = vpop.f32.mrf.mxu1 }
  0xf9   : > { %v4055_v46 = vpop.f32.mrf.mxu0  ;;  %855 = vst.msk [vmem:[%s4011_s10 + $0x120] sm:$0xff] %vm818_vm1, %v4053_v45 }
  0xfa   : > { %5937 = vst [vmem:[#allocation12_spill] sm:$0xff] %v4055_v46  ;;  %826 = vst.msk [vmem:[%s4011_s10 + $0x38] sm:$0xff] %vm818_vm1, %v4055_v46  ;;  %v4060_v47 = vpop.f32.mrf.mxu1 }
  0xfb   : > { %5938 = vst [vmem:[#allocation13_spill] sm:$0xff] %v4060_v47  ;;  %v4062_v48 = vpop.f32.mrf.mxu0  ;;  %858 = vst.msk [vmem:[%s4011_s10 + $0x138] sm:$0xff] %vm818_vm1, %v4060_v47 }
  0xfc   : > { %5939 = vst [vmem:[#allocation14_spill] sm:$0xff] %v4062_v48  ;;  %824 = vst.msk [vmem:[%s4011_s10 + $0x28] sm:$0xff] %vm818_vm1, %v4062_v48  ;;  %v4067_v49 = vpop.f32.mrf.mxu1 }
  0xfd   : > { %v4069_v50 = vpop.f32.mrf.mxu0  ;;  %856 = vst.msk [vmem:[%s4011_s10 + $0x128] sm:$0xff] %vm818_vm1, %v4067_v49 }
  0xfe   : > { %829 = vst.msk [vmem:[%s4011_s10 + $0x50] sm:$0xff] %vm818_vm1, %v4069_v50  ;;  %v4074_v51 = vpop.f32.mrf.mxu1  ;;  %v893_v24 = vmul.f32 %v4069_v50, %v4069_v50 }
  0xff   : > { %v4076_v52 = vpop.f32.mrf.mxu0  ;;  %v925_v32 = vmul.f32 %v4074_v51, %v4074_v51  ;;  %861 = vst.msk [vmem:[%s4011_s10 + $0x150] sm:$0xff] %vm818_vm1, %v4074_v51 }
 0x100   : > { %827 = vst.msk [vmem:[%s4011_s10 + $0x40] sm:$0xff] %vm818_vm1, %v4076_v52  ;;  %v4081_v53 = vpop.f32.mrf.mxu1  ;;  %v977_v31 = vsel %vm818_vm1, %v893_v24, 0.0 }
 0x101   : > { %5940 = vst [vmem:[#allocation15_spill] sm:$0xff] %v4081_v53  ;;  %v4083_v54 = vpop.f32.mrf.mxu0  ;;  %859 = vst.msk [vmem:[%s4011_s10 + $0x140] sm:$0xff] %vm818_vm1, %v4081_v53 }
 0x102   : > { %830 = vst.msk [vmem:[%s4011_s10 + $0x58] sm:$0xff] %vm818_vm1, %v4083_v54  ;;  %v4088_v55 = vpop.f32.mrf.mxu1  ;;  %v894_v28 = vmul.f32 %v4083_v54, %v4083_v54 }
 0x103   : > { %v4090_v56 = vpop.f32.mrf.mxu0  ;;  %862 = vst.msk [vmem:[%s4011_s10 + $0x158] sm:$0xff] %vm818_vm1, %v4088_v55 }
 0x104   : > { %5941 = vst [vmem:[#allocation16_spill] sm:$0xff] %v4090_v56  ;;  %828 = vst.msk [vmem:[%s4011_s10 + $0x48] sm:$0xff] %vm818_vm1, %v4090_v56  ;;  %v4095_v57 = vpop.f32.mrf.mxu1 }
 0x105   : > { %5942 = vst [vmem:[#allocation17_spill] sm:$0xff] %v4095_v57  ;;  %v4097_v58 = vpop.f32.mrf.mxu0  ;;  %860 = vst.msk [vmem:[%s4011_s10 + $0x148] sm:$0xff] %vm818_vm1, %v4095_v57 }
 0x106   : > { %833 = vst.msk [vmem:[%s4011_s10 + $0x70] sm:$0xff] %vm818_vm1, %v4097_v58  ;;  %v4102_v59 = vpop.f32.mrf.mxu1  ;;  %v897_v60 = vmul.f32 %v4097_v58, %v4097_v58 }
 0x107   : > { %v4106_v61 = vpop.f32.mrf.mxu0  ;;  %v929_v62 = vmul.f32 %v4102_v59, %v4102_v59  ;;  %865 = vst.msk [vmem:[%s4011_s10 + $0x170] sm:$0xff] %vm818_vm1, %v4102_v59 }
 0x108   : > { %831 = vst.msk [vmem:[%s4011_s10 + $0x60] sm:$0xff] %vm818_vm1, %v4106_v61  ;;  %v4113_v63 = vpop.f32.mrf.mxu1  ;;  %v989_v0 = vsel %vm818_vm1, %v897_v60, 0.0  ;;  %v895_v9 = vmul.f32 %v4106_v61, %v4106_v61  ;;  %v980_v60 = vsel %vm818_vm1, %v894_v28, 0.0 }
 0x109   : > { %v1085_v1 = vsel %vm818_vm1, %v929_v62, 0.0  ;;  %990 = vadd.xlane.f32.xlu0 %v989_v0  ;;  %v4117_v2 = vpop.f32.mrf.mxu0  ;;  %v927_v16 = vmul.f32 %v4113_v63, %v4113_v63  ;;  %v926_v0 = vmul.f32 %v4088_v55, %v4088_v55  ;;  %863 = vst.msk [vmem:[%s4011_s10 + $0x160] sm:$0xff] %vm818_vm1, %v4113_v63 }
 0x10a   : > { %1086 = vadd.xlane.f32.xlu1 %v1085_v1  ;;  %v4119_v3 = vpop.f32.mrf.mxu1  ;;  %834 = vst.msk [vmem:[%s4011_s10 + $0x78] sm:$0xff] %vm818_vm1, %v4117_v2  ;;  %v898_v4 = vmul.f32 %v4117_v2, %v4117_v2  ;;  %v983_v15 = vsel %vm818_vm1, %v895_v9, 0.0 }
 0x10b   : > { %v4126_v5 = vpop.f32.mrf.mxu0  ;;  %v930_v6 = vmul.f32 %v4119_v3, %v4119_v3  ;;  %v1079_v23 = vsel %vm818_vm1, %v927_v16, 0.0  ;;  %866 = vst.msk [vmem:[%s4011_s10 + $0x178] sm:$0xff] %vm818_vm1, %v4119_v3 }
 0x10c   : > { %832 = vst.msk [vmem:[%s4011_s10 + $0x68] sm:$0xff] %vm818_vm1, %v4126_v5  ;;  %v4133_v7 = vpop.f32.mrf.mxu1  ;;  %v992_v8 = vsel %vm818_vm1, %v898_v4, 0.0  ;;  %v896_v12 = vmul.f32 %v4126_v5, %v4126_v5 }
 0x10d   : > { %v1088_v10 = vsel %vm818_vm1, %v930_v6, 0.0  ;;  %993 = vadd.xlane.f32.xlu0 %v992_v8  ;;  %v4139_v11 = vpop.f32.mrf.mxu0  ;;  %v928_v20 = vmul.f32 %v4133_v7, %v4133_v7  ;;  %v1073_v6 = vsel %vm818_vm1, %v925_v32, 0.0  ;;  %v891_v8 = vmul.f32 %v4076_v52, %v4076_v52  ;;  %864 = vst.msk [vmem:[%s4011_s10 + $0x168] sm:$0xff] %vm818_vm1, %v4133_v7 }
 0x10e   : > { %1089 = vadd.xlane.f32.xlu1 %v1088_v10  ;;  %837 = vst.msk [vmem:[%s4011_s10 + $0x90] sm:$0xff] %vm818_vm1, %v4139_v11  ;;  %v4146_v13 = vpop.f32.mrf.mxu1  ;;  %v986_v18 = vsel %vm818_vm1, %v896_v12, 0.0  ;;  %v1076_v10 = vsel %vm818_vm1, %v926_v0, 0.0 }
 0x10f   : > { %5943 = vst [vmem:[#allocation18_spill] sm:$0xff] %v4146_v13  ;;  %v4151_v14 = vpop.f32.mrf.mxu0  ;;  %869 = vst.msk [vmem:[%s4011_s10 + $0x190] sm:$0xff] %vm818_vm1, %v4146_v13  ;;  %v1082_v26 = vsel %vm818_vm1, %v928_v20, 0.0  ;;  %v971_v20 = vsel %vm818_vm1, %v891_v8, 0.0 }
 0x110   : > { %835 = vst.msk [vmem:[%s4011_s10 + $0x80] sm:$0xff] %vm818_vm1, %v4151_v14  ;;  %v4162_v17 = vpop.f32.mrf.mxu1 }
 0x111   : > { %5944 = vst [vmem:[#allocation19_spill] sm:$0xff] %v4162_v17  ;;  %984 = vadd.xlane.f32.xlu0 %v983_v15  ;;  %v4168_v19 = vpop.f32.mrf.mxu0  ;;  %867 = vst.msk [vmem:[%s4011_s10 + $0x180] sm:$0xff] %vm818_vm1, %v4162_v17  ;;  %v892_v15 = vmul.f32 %v4090_v56, %v4090_v56 }
 0x112   : > { %987 = vadd.xlane.f32.xlu1 %v986_v18  ;;  %838 = vst.msk [vmem:[%s4011_s10 + $0x98] sm:$0xff] %vm818_vm1, %v4168_v19  ;;  %v4178_v21 = vpop.f32.mrf.mxu1 }
 0x113   : > { %5945 = vst [vmem:[#allocation20_spill] sm:$0xff] %v4178_v21  ;;  %v4183_v22 = vpop.f32.mrf.mxu0  ;;  %870 = vst.msk [vmem:[%s4011_s10 + $0x198] sm:$0xff] %vm818_vm1, %v4178_v21 }
 0x114   : > { %836 = vst.msk [vmem:[%s4011_s10 + $0x88] sm:$0xff] %vm818_vm1, %v4183_v22  ;;  %v4194_v25 = vpop.f32.mrf.mxu1 }
 0x115   : > { %5946 = vst [vmem:[#allocation21_spill] sm:$0xff] %v4194_v25  ;;  %1080 = vadd.xlane.f32.xlu0 %v1079_v23  ;;  %v4200_v27 = vpop.f32.mrf.mxu0  ;;  %868 = vst.msk [vmem:[%s4011_s10 + $0x188] sm:$0xff] %vm818_vm1, %v4194_v25  ;;  %v923_v23 = vmul.f32 %v4081_v53, %v4081_v53 }
 0x116   : > { %1083 = vadd.xlane.f32.xlu1 %v1082_v26  ;;  %841 = vst.msk [vmem:[%s4011_s10 + $0xb0] sm:$0xff] %vm818_vm1, %v4200_v27  ;;  %v4210_v29 = vpop.f32.mrf.mxu1  ;;  %v974_v26 = vsel %vm818_vm1, %v892_v15, 0.0 }
 0x117   : > { %5947 = vst [vmem:[#allocation22_spill] sm:$0xff] %v4210_v29  ;;  %v4215_v30 = vpop.f32.mrf.mxu0  ;;  %873 = vst.msk [vmem:[%s4011_s10 + $0x1b0] sm:$0xff] %vm818_vm1, %v4210_v29  ;;  %v1067_v0 = vsel %vm818_vm1, %v923_v23, 0.0 }
 0x118   : > { %839 = vst.msk [vmem:[%s4011_s10 + $0xa0] sm:$0xff] %vm818_vm1, %v4215_v30  ;;  %v4226_v33 = vpop.f32.mrf.mxu1 }
 0x119   : > { %5948 = vst [vmem:[#allocation23_spill] sm:$0xff] %v4226_v33  ;;  %978 = vadd.xlane.f32.xlu0 %v977_v31  ;;  %v4232_v62 = vpop.f32.mrf.mxu0  ;;  %871 = vst.msk [vmem:[%s4011_s10 + $0x1a0] sm:$0xff] %vm818_vm1, %v4226_v33  ;;  %v924_v31 = vmul.f32 %v4095_v57, %v4095_v57  ;;  %v888_v57 = vmul.f32 %v4062_v48, %v4062_v48 }
 0x11a   : > { %981 = vadd.xlane.f32.xlu1 %v980_v60  ;;  %842 = vst.msk [vmem:[%s4011_s10 + $0xb8] sm:$0xff] %vm818_vm1, %v4232_v62  ;;  %v4242_v1 = vpop.f32.mrf.mxu1 }
 0x11b   : > { %5949 = vst [vmem:[#allocation24_spill] sm:$0xff] %v4242_v1  ;;  %v4247_v4 = vpop.f32.mrf.mxu0  ;;  %874 = vst.msk [vmem:[%s4011_s10 + $0x1b8] sm:$0xff] %vm818_vm1, %v4242_v1  ;;  %v962_v56 = vsel %vm818_vm1, %v888_v57, 0.0  ;;  %v917_v57 = vmul.f32 %v4018_v35, %v4018_v35 }
 0x11c   : > { %840 = vst.msk [vmem:[%s4011_s10 + $0xa8] sm:$0xff] %vm818_vm1, %v4247_v4  ;;  %v4258_v9 = vpop.f32.mrf.mxu1 }
 0x11d   : > { %5950 = vst [vmem:[#allocation25_spill] sm:$0xff] %v4258_v9  ;;  %1074 = vadd.xlane.f32.xlu0 %v1073_v6  ;;  %v4264_v12 = vpop.f32.mrf.mxu0  ;;  %872 = vst.msk [vmem:[%s4011_s10 + $0x1a8] sm:$0xff] %vm818_vm1, %v4258_v9  ;;  %v889_v6 = vmul.f32 %v4041_v42, %v4041_v42 }
 0x11e   : > { %1077 = vadd.xlane.f32.xlu1 %v1076_v10  ;;  %845 = vst.msk [vmem:[%s4011_s10 + $0xd0] sm:$0xff] %vm818_vm1, %v4264_v12  ;;  %v4274_v16 = vpop.f32.mrf.mxu1  ;;  %v1070_v10 = vsel %vm818_vm1, %v924_v31, 0.0 }
 0x11f   : > { %5951 = vst [vmem:[#allocation26_spill] sm:$0xff] %v4274_v16  ;;  %v4279_v18 = vpop.f32.mrf.mxu0  ;;  %877 = vst.msk [vmem:[%s4011_s10 + $0x1d0] sm:$0xff] %vm818_vm1, %v4274_v16  ;;  %v965_v31 = vsel %vm818_vm1, %v889_v6, 0.0  ;;  %v922_v6 = vmul.f32 %v4060_v47, %v4060_v47 }
 0x120   : > { %843 = vst.msk [vmem:[%s4011_s10 + $0xc0] sm:$0xff] %vm818_vm1, %v4279_v18  ;;  %v4290_v24 = vpop.f32.mrf.mxu1 }
 0x121   : > { %5952 = vst [vmem:[#allocation27_spill] sm:$0xff] %v4290_v24  ;;  %972 = vadd.xlane.f32.xlu0 %v971_v20  ;;  %v4296_v28 = vpop.f32.mrf.mxu0  ;;  %875 = vst.msk [vmem:[%s4011_s10 + $0x1c0] sm:$0xff] %vm818_vm1, %v4290_v24  ;;  %v890_v20 = vmul.f32 %v4055_v46, %v4055_v46  ;;  %v1064_v47 = vsel %vm818_vm1, %v922_v6, 0.0  ;;  %v920_v6 = vmul.f32 %v4067_v49, %v4067_v49 }
 0x122   : > { %975 = vadd.xlane.f32.xlu1 %v974_v26  ;;  %846 = vst.msk [vmem:[%s4011_s10 + $0xd8] sm:$0xff] %vm818_vm1, %v4296_v28  ;;  %v4306_v32 = vpop.f32.mrf.mxu1 }
 0x123   : > { %5953 = vst [vmem:[#allocation28_spill] sm:$0xff] %v4306_v32  ;;  %v4311_v60 = vpop.f32.mrf.mxu0  ;;  %878 = vst.msk [vmem:[%s4011_s10 + $0x1d8] sm:$0xff] %vm818_vm1, %v4306_v32  ;;  %v968_v46 = vsel %vm818_vm1, %v890_v20, 0.0  ;;  %v1058_v48 = vsel %vm818_vm1, %v920_v6, 0.0  ;;  %v883_v6 = vmul.f32 %v4020_v36, %v4020_v36 }
 0x124   : > { %844 = vst.msk [vmem:[%s4011_s10 + $0xc8] sm:$0xff] %vm818_vm1, %v4311_v60  ;;  %v4322_v8 = vpop.f32.mrf.mxu1 }
 0x125   : > { %5954 = vst [vmem:[#allocation29_spill] sm:$0xff] %v4322_v8  ;;  %1068 = vadd.xlane.f32.xlu0 %v1067_v0  ;;  %v4328_v15 = vpop.f32.mrf.mxu0  ;;  %876 = vst.msk [vmem:[%s4011_s10 + $0x1c8] sm:$0xff] %vm818_vm1, %v4322_v8  ;;  %v921_v0 = vmul.f32 %v4046_v43, %v4046_v43 }
 0x126   : > { %1071 = vadd.xlane.f32.xlu1 %v1070_v10  ;;  %849 = vst.msk [vmem:[%s4011_s10 + $0xf0] sm:$0xff] %vm818_vm1, %v4328_v15  ;;  %v4338_v23 = vpop.f32.mrf.mxu1 }
 0x127   : > { %v4343_v26 = vpop.f32.mrf.mxu0  ;;  %881 = vst.msk [vmem:[%s4011_s10 + $0x1f0] sm:$0xff] %vm818_vm1, %v4338_v23  ;;  %v1061_v20 = vsel %vm818_vm1, %v921_v0, 0.0 }
 0x128   : > { %847 = vst.msk [vmem:[%s4011_s10 + $0xe0] sm:$0xff] %vm818_vm1, %v4343_v26  ;;  %v4354_v10 = vpop.f32.mrf.mxu1 }
 0x129   : > { %966 = vadd.xlane.f32.xlu0 %v965_v31  ;;  %v4360_v42 = vpop.f32.mrf.mxu0  ;;  %879 = vst.msk [vmem:[%s4011_s10 + $0x1e0] sm:$0xff] %vm818_vm1, %v4354_v10 }
 0x12a   : > { %5955 = vst [vmem:[#allocation30_spill] sm:$0xff] %v4360_v42  ;;  %969 = vadd.xlane.f32.xlu1 %v968_v46  ;;  %850 = vst.msk [vmem:[%s4011_s10 + $0xf8] sm:$0xff] %vm818_vm1, %v4360_v42  ;;  %v4375_v31 = vpop.f32.mrf.mxu1  ;;  %v887_v46 = vmul.f32 %v4048_v44, %v4048_v44  ;;  %v919_v44 = vmul.f32 %v4053_v45, %v4053_v45 }
 0x12b   : > { %v4373_v43 = vpop.f32.mrf.mxu0  ;;  %882 = vst.msk [vmem:[%s4011_s10 + $0x1f8] sm:$0xff] %vm818_vm1, %v4375_v31 }
 0x12c   : > { %848 = vst.msk [vmem:[%s4011_s10 + $0xe8] sm:$0xff] %vm818_vm1, %v4373_v43  ;;  %v4392_v53 = vpop.f32.mrf.mxu1  ;;  %v959_v0 = vsel %vm818_vm1, %v887_v46, 0.0  ;;  %v886_v46 = vmul.f32 %v4027_v38, %v4027_v38 }
 0x12d   : > { %1062 = vadd.xlane.f32.xlu0 %v1061_v20  ;;  %5956 = vst [vmem:[#allocation31_spill] sm:$0xff] %v4392_v53  ;;  %880 = vst.msk [vmem:[%s4011_s10 + $0x1e8] sm:$0xff] %vm818_vm1, %v4392_v53  ;;  %v1055_v20 = vsel %vm818_vm1, %v919_v44, 0.0  ;;  %v918_v44 = vmul.f32 %v4032_v39, %v4032_v39 }
 0x12e   : > { %1065 = vadd.xlane.f32.xlu1 %v1064_v47  ;;  %v885_v47 = vmul.f32 %v4013_v34, %v4013_v34 }
 0x131   : > { %960 = vadd.xlane.f32.xlu0 %v959_v0  ;;  %v953_v0 = vsel %vm818_vm1, %v885_v47, 0.0  ;;  %v884_v47 = vmul.f32 %v4034_v40, %v4034_v40 }
 0x132   : > { %963 = vadd.xlane.f32.xlu1 %v962_v56  ;;  %v956_v56 = vsel %vm818_vm1, %v886_v46, 0.0  ;;  %v915_v46 = vmul.f32 %v4025_v37, %v4025_v37 }
 0x135   : > { %1056 = vadd.xlane.f32.xlu0 %v1055_v20  ;;  %v1049_v20 = vsel %vm818_vm1, %v917_v57, 0.0  ;;  %v916_v57 = vmul.f32 %v4039_v41, %v4039_v41  ;;  %v911_v41 = vmul.f32 %v4343_v26, %v4343_v26 }
 0x136   : > { %1059 = vadd.xlane.f32.xlu1 %v1058_v48  ;;  %v1052_v48 = vsel %vm818_vm1, %v918_v44, 0.0  ;;  %v914_v44 = vmul.f32 %v4360_v42, %v4360_v42 }
 0x137   : > { %v1031_v42 = vsel %vm818_vm1, %v911_v41, 0.0  ;;  %v908_v41 = vmul.f32 %v4311_v60, %v4311_v60 }
 0x139   : > { %954 = vadd.xlane.f32.xlu0 %v953_v0  ;;  %v947_v0 = vsel %vm818_vm1, %v883_v6, 0.0  ;;  %v1046_v6 = vsel %vm818_vm1, %v916_v57, 0.0 }
 0x13a   : > { %957 = vadd.xlane.f32.xlu1 %v956_v56  ;;  %v950_v56 = vsel %vm818_vm1, %v884_v47, 0.0  ;;  %v1040_v47 = vsel %vm818_vm1, %v914_v44, 0.0 }
 0x13d   : > { %1050 = vadd.xlane.f32.xlu0 %v1049_v20  ;;  %v913_v20 = vmul.f32 %v4328_v15, %v4328_v15 }
 0x13e   : > { %1053 = vadd.xlane.f32.xlu1 %v1052_v48  ;;  %v1043_v48 = vsel %vm818_vm1, %v915_v46, 0.0  ;;  %v909_v46 = vmul.f32 %v4264_v12, %v4264_v12 }
 0x140   : > { %v1025_v44 = vsel %vm818_vm1, %v909_v46, 0.0 }
 0x141   : > { %948 = vadd.xlane.f32.xlu0 %v947_v0  ;;  %v1037_v0 = vsel %vm818_vm1, %v913_v20, 0.0  ;;  %v910_v20 = vmul.f32 %v4296_v28, %v4296_v28 }
 0x142   : > { %951 = vadd.xlane.f32.xlu1 %v950_v56  ;;  %v912_v56 = vmul.f32 %v4373_v43, %v4373_v43 }
 0x144   : > { %v1034_v57 = vsel %vm818_vm1, %v912_v56, 0.0  ;;  %v906_v56 = vmul.f32 %v4232_v62, %v4232_v62 }
 0x145   : > { %1044 = vadd.xlane.f32.xlu0 %v1043_v48  ;;  %v907_v48 = vmul.f32 %v4279_v18, %v4279_v18 }
 0x146   : > { %1047 = vadd.xlane.f32.xlu1 %v1046_v6  ;;  %v1028_v6 = vsel %vm818_vm1, %v910_v20, 0.0  ;;  %v1016_v20 = vsel %vm818_vm1, %v906_v56, 0.0 }
 0x149   : > { %1038 = vadd.xlane.f32.xlu0 %v1037_v0  ;;  %v905_v0 = vmul.f32 %v4200_v27, %v4200_v27 }
 0x14a   : > { %1041 = vadd.xlane.f32.xlu1 %v1040_v47  ;;  %v1022_v47 = vsel %vm818_vm1, %v908_v41, 0.0 }
 0x14b   : > { %v1013_v46 = vsel %vm818_vm1, %v905_v0, 0.0 }
 0x14d   : > { %1032 = vadd.xlane.f32.xlu0 %v1031_v42  ;;  %v1019_v42 = vsel %vm818_vm1, %v907_v48, 0.0 }
 0x14e   : > { %1035 = vadd.xlane.f32.xlu1 %v1034_v57  ;;  %v903_v57 = vmul.f32 %v4215_v30, %v4215_v30 }
 0x150   : > { %v1007_v48 = vsel %vm818_vm1, %v903_v57, 0.0  ;;  %v945_v57 = vmul.f32 %v4338_v23, %v4338_v23 }
 0x151   : > { %1026 = vadd.xlane.f32.xlu0 %v1025_v44  ;;  %v904_v44 = vmul.f32 %v4247_v4, %v4247_v4 }
 0x152   : > { %1029 = vadd.xlane.f32.xlu1 %v1028_v6  ;;  %v901_v6 = vmul.f32 %v4139_v11, %v4139_v11 }
 0x153   : > { %v1010_v41 = vsel %vm818_vm1, %v904_v44, 0.0 }
 0x154   : > { %v1001_v0 = vsel %vm818_vm1, %v901_v6, 0.0  ;;  %v1133_v6 = vsel %vm818_vm1, %v945_v57, 0.0  ;;  %v942_v57 = vmul.f32 %v4306_v32, %v4306_v32 }
 0x155   : > { %1020 = vadd.xlane.f32.xlu0 %v1019_v42  ;;  %v902_v42 = vmul.f32 %v4168_v19, %v4168_v19 }
 0x156   : > { %1023 = vadd.xlane.f32.xlu1 %v1022_v47  ;;  %v899_v47 = vmul.f32 %v4151_v14, %v4151_v14 }
 0x157   : > { %v1004_v56 = vsel %vm818_vm1, %v902_v42, 0.0 }
 0x158   : > { %v995_v44 = vsel %vm818_vm1, %v899_v47, 0.0  ;;  %v941_v47 = vmul.f32 %v4274_v16, %v4274_v16 }
 0x159   : > { %1014 = vadd.xlane.f32.xlu0 %v1013_v46  ;;  %v900_v46 = vmul.f32 %v4183_v22, %v4183_v22 }
 0x15a   : > { %1017 = vadd.xlane.f32.xlu1 %v1016_v20  ;;  %v946_v20 = vmul.f32 %v4375_v31, %v4375_v31 }
 0x15c   : > { %v1136_v42 = vsel %vm818_vm1, %v946_v20, 0.0  ;;  %v939_v20 = vmul.f32 %v4290_v24, %v4290_v24 }
 0x15d   : > { %1008 = vadd.xlane.f32.xlu0 %v1007_v48  ;;  %v998_v48 = vsel %vm818_vm1, %v900_v46, 0.0 }
 0x15e   : > { %1011 = vadd.xlane.f32.xlu1 %v1010_v41  ;;  %v943_v41 = vmul.f32 %v4354_v10, %v4354_v10 }
 0x161   : > { %1002 = vadd.xlane.f32.xlu0 %v1001_v0  ;;  %v944_v0 = vmul.f32 %v4392_v53, %v4392_v53 }
 0x162   : > { %1005 = vadd.xlane.f32.xlu1 %v1004_v56  ;;  %v1127_v56 = vsel %vm818_vm1, %v943_v41, 0.0  ;;  %v1115_v41 = vsel %vm818_vm1, %v939_v20, 0.0 }
 0x163   : > { %v1130_v46 = vsel %vm818_vm1, %v944_v0, 0.0 }
 0x165   : > { %996 = vadd.xlane.f32.xlu0 %v995_v44  ;;  %v1121_v44 = vsel %vm818_vm1, %v941_v47, 0.0 }
 0x166   : > { %999 = vadd.xlane.f32.xlu1 %v998_v48  ;;  %v1124_v48 = vsel %vm818_vm1, %v942_v57, 0.0  ;;  %v935_v57 = vmul.f32 %v4226_v33, %v4226_v33 }
 0x168   : > { %v1103_v20 = vsel %vm818_vm1, %v935_v57, 0.0 }
 0x169   : > { %1134 = vadd.xlane.f32.xlu0 %v1133_v6  ;;  %v940_v6 = vmul.f32 %v4322_v8, %v4322_v8 }
 0x16a   : > { %1137 = vadd.xlane.f32.xlu1 %v1136_v42  ;;  %v937_v42 = vmul.f32 %v4210_v29, %v4210_v29 }
 0x16b   : > { %v1118_v0 = vsel %vm818_vm1, %v940_v6, 0.0 }
 0x16c   : > { %v1109_v47 = vsel %vm818_vm1, %v937_v42, 0.0 }
 0x16d   : > { %1128 = vadd.xlane.f32.xlu0 %v1127_v56  ;;  %v938_v56 = vmul.f32 %v4242_v1, %v4242_v1 }
 0x16e   : > { %1131 = vadd.xlane.f32.xlu1 %v1130_v46 }
 0x16f   : > { %v1112_v46 = vsel %vm818_vm1, %v938_v56, 0.0 }
 0x171   : > { %1122 = vadd.xlane.f32.xlu0 %v1121_v44  ;;  %v936_v44 = vmul.f32 %v4258_v9, %v4258_v9 }
 0x172   : > { %1125 = vadd.xlane.f32.xlu1 %v1124_v48  ;;  %v933_v48 = vmul.f32 %v4146_v13, %v4146_v13 }
 0x173   : > { %v1106_v6 = vsel %vm818_vm1, %v936_v44, 0.0  ;;  %v1314_v44 = vmul.f32 -2.0, %v4097_v58 }
 0x174   : > { %v1097_v42 = vsel %vm818_vm1, %v933_v48, 0.0 }
 0x175   : > { %1116 = vadd.xlane.f32.xlu0 %v1115_v41  ;;  %v934_v41 = vmul.f32 %v4178_v21, %v4178_v21 }
 0x176   : > { %1119 = vadd.xlane.f32.xlu1 %v1118_v0  ;;  %v931_v0 = vmul.f32 %v4162_v17, %v4162_v17  ;;  %v1186_v17 = vsel %vm818_vm1, %v4119_v3, 1.0 }
 0x177   : > { %v1100_v56 = vsel %vm818_vm1, %v934_v41, 0.0 }
 0x179   : > { %1110 = vadd.xlane.f32.xlu0 %v1109_v47  ;;  %v932_v47 = vmul.f32 %v4194_v25, %v4194_v25 }
 0x17a   : > { %1113 = vadd.xlane.f32.xlu1 %v1112_v46  ;;  %v1091_v46 = vsel %vm818_vm1, %v931_v0, 0.0  ;;  %v1346_v0 = vmul.f32 -2.0, %v4102_v59 }
 0x17b   : > { %v1094_v57 = vsel %vm818_vm1, %v932_v47, 0.0 }
 0x17d   : > { %1104 = vadd.xlane.f32.xlu0 %v1103_v20  ;;  %v1153_v20 = vsel %vm818_vm1, %v4097_v58, 1.0  ;;  %v1347_v58 = vmul.f32 -2.0, %v4119_v3 }
 0x17e   : > { %1107 = vadd.xlane.f32.xlu1 %v1106_v6  ;;  %v1185_v6 = vsel %vm818_vm1, %v4102_v59, 1.0 }
 0x181   : > { %1098 = vadd.xlane.f32.xlu0 %v1097_v42 }
 0x182   : > { %1101 = vadd.xlane.f32.xlu1 %v1100_v56 }
 0x185   : > { %1092 = vadd.xlane.f32.xlu0 %v1091_v46  ;;  %v1312_v46 = vmul.f32 -2.0, %v4106_v61 }
 0x186   : > { %1095 = vadd.xlane.f32.xlu1 %v1094_v57  ;;  %v1315_v57 = vmul.f32 -2.0, %v4117_v2 }
 0x192   : > { %v991_v48 = vpop.xlane.xlu0 %990 }
 0x193   : > { %v1087_v41 = vpop.xlane.xlu1 %1086  ;;  %v4531_v42 = vsel %vm1203_vm2, %v1153_v20, %v991_v48  ;;  %v1378_v47 = vsel %vm818_vm1, %v1314_v44, %v991_v48  ;;  %v1154_v20 = vsel %vm818_vm1, %v4117_v2, 1.0 }
 0x194   : > { %v4535_v56 = vsel %vm1203_vm2, %v1185_v6, %v1087_v41  ;;  %v1410_v25 = vsel %vm818_vm1, %v1346_v0, %v1087_v41  ;;  %v1442_v6 = vsel %vm1203_vm2, %v1378_v47, 1.0 }
 0x195   : > { %v1474_v0 = vsel %vm1203_vm2, %v1410_v25, 1.0  ;;  %v1152_v25 = vsel %vm818_vm1, %v4126_v5, 1.0 }
 0x196   : > { %v994_v59 = vpop.xlane.xlu0 %993 }
 0x197   : > { %v1090_v21 = vpop.xlane.xlu1 %1089  ;;  %v4548_v44 = vsel %vm1203_vm2, %v1154_v20, %v994_v59  ;;  %v1379_v48 = vsel %vm818_vm1, %v1315_v57, %v994_v59  ;;  %v1313_v57 = vmul.f32 -2.0, %v4126_v5 }
 0x198   : > { %v4552_v13 = vsel %vm1203_vm2, %v1186_v17, %v1090_v21  ;;  %v1411_v41 = vsel %vm818_vm1, %v1347_v58, %v1090_v21  ;;  %v1443_v2 = vsel %vm1203_vm2, %v1379_v48, 1.0  ;;  %v1151_v17 = vsel %vm818_vm1, %v4106_v61, 1.0 }
 0x199   : > { %v1475_v20 = vsel %vm1203_vm2, %v1411_v41, 1.0  ;;  %v1499_v9 = vpack.c.bf16 %v1443_v2, %v1442_v6 }
 0x19a   : > { %v1515_v59 = vpack.c.bf16 %v1475_v20, %v1474_v0  ;;  %v985_v21 = vpop.xlane.xlu0 %984  ;;  %v1344_v0 = vmul.f32 -2.0, %v4113_v63 }
 0x19b   : > { %v4566_v58 = vsel %vm1203_vm2, %v1151_v17, %v985_v21  ;;  %v1376_v48 = vsel %vm818_vm1, %v1312_v46, %v985_v21  ;;  %v988_v3 = vpop.xlane.xlu1 %987  ;;  %3643 = vmatprep.subr.msk.bf16.mxu1 %vm1524_vm3, %v1499_v9  ;;  %v1571_v6 = vsel %vm1524_vm3, %v1499_v9, 0  ;;  %v1345_v9 = vmul.f32 -2.0, %v4133_v7 }
 0x19c   : > { %v1440_v41 = vsel %vm1203_vm2, %v1376_v48, 1.0  ;;  %v4575_v2 = vsel %vm1203_vm2, %v1152_v25, %v988_v3  ;;  %v1377_v61 = vsel %vm818_vm1, %v1313_v57, %v988_v3  ;;  %3659 = vmatprep.subr.msk.bf16.mxu0 %vm1524_vm3, %v1515_v59  ;;  %3444 = vmatpush3.bf16.xpose.msra.mxu1 %v1571_v6  ;;  %v1861_v46 = vsel %vm1524_vm3, %v1515_v59, 0 }
 0x19d   : > { %v1441_v20 = vsel %vm1203_vm2, %v1377_v61, 1.0  ;;  %3508 = vmatpush3.bf16.xpose.msra.mxu0 %v1861_v46  ;;  %v1183_v21 = vsel %vm818_vm1, %v4113_v63, 1.0  ;;  %v1184_v48 = vsel %vm818_vm1, %v4133_v7, 1.0  ;;  %v1310_v63 = vmul.f32 -2.0, %v4069_v50 }
 0x19e   : > { %v1498_v17 = vpack.c.bf16 %v1441_v20, %v1440_v41  ;;  %v1081_v3 = vpop.xlane.xlu0 %1080  ;;  %v1311_v20 = vmul.f32 -2.0, %v4083_v54 }
 0x19f   : > { %v4588_v57 = vsel %vm1203_vm2, %v1183_v21, %v1081_v3  ;;  %v1408_v59 = vsel %vm818_vm1, %v1344_v0, %v1081_v3  ;;  %v1084_v25 = vpop.xlane.xlu1 %1083  ;;  %v1149_v21 = vsel %vm818_vm1, %v4069_v50, 1.0 }
 0x1a0   : > { %v1472_v6 = vsel %vm1203_vm2, %v1408_v59, 1.0  ;;  %v4595_v61 = vsel %vm1203_vm2, %v1184_v48, %v1084_v25  ;;  %v1409_v41 = vsel %vm818_vm1, %v1345_v9, %v1084_v25  ;;  %3644 = vmatprep.subr.msk.bf16.mxu1 %vm1524_vm3, %v1498_v17  ;;  %v1150_v48 = vsel %vm818_vm1, %v4083_v54, 1.0 }
 0x1a1   : > { %v1473_v0 = vsel %vm1203_vm2, %v1409_v41, 1.0  ;;  %v1568_v47 = vsel %vm1524_vm3, %v1498_v17, 0  ;;  %v1343_v17 = vmul.f32 -2.0, %v4088_v55 }
 0x1a2   : > { %v1514_v7 = vpack.c.bf16 %v1473_v0, %v1472_v6  ;;  %v979_v3 = vpop.xlane.xlu0 %978 }
 0x1a3   : > { %v4607_v59 = vsel %vm1203_vm2, %v1149_v21, %v979_v3  ;;  %v1374_v9 = vsel %vm818_vm1, %v1310_v63, %v979_v3  ;;  %v982_v25 = vpop.xlane.xlu1 %981  ;;  %v1342_v63 = vmul.f32 -2.0, %v4074_v51  ;;  %v1181_v3 = vsel %vm818_vm1, %v4074_v51, 1.0 }
 0x1a4   : > { %v1438_v41 = vsel %vm1203_vm2, %v1374_v9, 1.0  ;;  %v4615_v46 = vsel %vm1203_vm2, %v1150_v48, %v982_v25  ;;  %v1375_v6 = vsel %vm818_vm1, %v1311_v20, %v982_v25  ;;  %3660 = vmatprep.subr.msk.bf16.mxu0 %vm1524_vm3, %v1514_v7  ;;  %3446 = vmatpush3.bf16.xpose.msra.mxu1 %v1568_v47  ;;  %v1858_v50 = vsel %vm1524_vm3, %v1514_v7, 0 }
 0x1a5   : > { %v1439_v0 = vsel %vm1203_vm2, %v1375_v6, 1.0  ;;  %3510 = vmatpush3.bf16.xpose.msra.mxu0 %v1858_v50  ;;  %v1182_v7 = vsel %vm818_vm1, %v4088_v55, 1.0  ;;  %v1308_v51 = vmul.f32 -2.0, %v4076_v52 }
 0x1a6   : > { %v1497_v21 = vpack.c.bf16 %v1439_v0, %v1438_v41  ;;  %v1075_v20 = vpop.xlane.xlu0 %1074  ;;  %v5957_v0 = vld [vmem:[#allocation16_spill] sm:$0xff] }
 0x1a7   : > { %v4628_v9 = vsel %vm1203_vm2, %v1181_v3, %v1075_v20  ;;  %v1406_v47 = vsel %vm818_vm1, %v1342_v63, %v1075_v20  ;;  %v1078_v48 = vpop.xlane.xlu1 %1077  ;;  %v1309_v3 = vmul.f32 -2.0, %v5957_v0  ;;  %v1147_v20 = vsel %vm818_vm1, %v4076_v52, 1.0 }
 0x1a8   : > { %v1470_v25 = vsel %vm1203_vm2, %v1406_v47, 1.0  ;;  %v4635_v6 = vsel %vm1203_vm2, %v1182_v7, %v1078_v48  ;;  %v1407_v41 = vsel %vm818_vm1, %v1343_v17, %v1078_v48  ;;  %3645 = vmatprep.subr.msk.bf16.mxu1 %vm1524_vm3, %v1497_v21  ;;  %v1148_v48 = vsel %vm818_vm1, %v5957_v0, 1.0 }
 0x1a9   : > { %v1471_v63 = vsel %vm1203_vm2, %v1407_v41, 1.0  ;;  %v1565_v50 = vsel %vm1524_vm3, %v1497_v21, 0  ;;  %v5959_v21 = vld [vmem:[#allocation17_spill] sm:$0xff] }
 0x1aa   : > { %v1513_v55 = vpack.c.bf16 %v1471_v63, %v1470_v25  ;;  %v973_v47 = vpop.xlane.xlu0 %972  ;;  %v5958_v63 = vld [vmem:[#allocation15_spill] sm:$0xff] }
 0x1ab   : > { %v4647_v7 = vsel %vm1203_vm2, %v1147_v20, %v973_v47  ;;  %v1372_v17 = vsel %vm818_vm1, %v1308_v51, %v973_v47  ;;  %v976_v5 = vpop.xlane.xlu1 %975  ;;  %v1340_v51 = vmul.f32 -2.0, %v5958_v63  ;;  %v1341_v47 = vmul.f32 -2.0, %v5959_v21 }
 0x1ac   : > { %v1436_v41 = vsel %vm1203_vm2, %v1372_v17, 1.0  ;;  %v4655_v54 = vsel %vm1203_vm2, %v1148_v48, %v976_v5  ;;  %v1373_v25 = vsel %vm818_vm1, %v1309_v3, %v976_v5  ;;  %3661 = vmatprep.subr.msk.bf16.mxu0 %vm1524_vm3, %v1513_v55  ;;  %3448 = vmatpush3.bf16.xpose.msra.mxu1 %v1565_v50  ;;  %v1855_v52 = vsel %vm1524_vm3, %v1513_v55, 0 }
 0x1ad   : > { %v1437_v20 = vsel %vm1203_vm2, %v1373_v25, 1.0  ;;  %3512 = vmatpush3.bf16.xpose.msra.mxu0 %v1855_v52  ;;  %v1179_v48 = vsel %vm818_vm1, %v5958_v63, 1.0  ;;  %v1180_v55 = vsel %vm818_vm1, %v5959_v21, 1.0  ;;  %v5960_v52 = vld [vmem:[#allocation9_spill] sm:$0xff] }
 0x1ae   : > { %v1496_v17 = vpack.c.bf16 %v1437_v20, %v1436_v41  ;;  %v1069_v5 = vpop.xlane.xlu0 %1068  ;;  %v1306_v63 = vmul.f32 -2.0, %v5960_v52 }
 0x1af   : > { %v4668_v3 = vsel %vm1203_vm2, %v1179_v48, %v1069_v5  ;;  %v1404_v50 = vsel %vm818_vm1, %v1340_v51, %v1069_v5  ;;  %v1072_v33 = vpop.xlane.xlu1 %1071  ;;  %v5961_v48 = vld [vmem:[#allocation12_spill] sm:$0xff] }
 0x1b0   : > { %v1468_v0 = vsel %vm1203_vm2, %v1404_v50, 1.0  ;;  %v4675_v25 = vsel %vm1203_vm2, %v1180_v55, %v1072_v33  ;;  %v1405_v41 = vsel %vm818_vm1, %v1341_v47, %v1072_v33  ;;  %3646 = vmatprep.subr.msk.bf16.mxu1 %vm1524_vm3, %v1496_v17  ;;  %v1307_v5 = vmul.f32 -2.0, %v5961_v48 }
 0x1b1   : > { %v1469_v51 = vsel %vm1203_vm2, %v1405_v41, 1.0  ;;  %v1145_v50 = vsel %vm818_vm1, %v5960_v52, 1.0  ;;  %v1146_v47 = vsel %vm818_vm1, %v5961_v48, 1.0  ;;  %v1562_v20 = vsel %vm1524_vm3, %v1496_v17, 0  ;;  %v5963_v17 = vld [vmem:[#allocation13_spill] sm:$0xff] }
 0x1b2   : > { %v1512_v21 = vpack.c.bf16 %v1469_v51, %v1468_v0  ;;  %v967_v1 = vpop.xlane.xlu0 %966  ;;  %v5962_v51 = vld [vmem:[#allocation10_spill] sm:$0xff] }
 0x1b3   : > { %v4687_v55 = vsel %vm1203_vm2, %v1145_v50, %v967_v1  ;;  %v1370_v33 = vsel %vm818_vm1, %v1306_v63, %v967_v1  ;;  %v970_v29 = vpop.xlane.xlu1 %969  ;;  %v1338_v1 = vmul.f32 -2.0, %v5962_v51  ;;  %v1339_v50 = vmul.f32 -2.0, %v5963_v17 }
 0x1b4   : > { %v1434_v41 = vsel %vm1203_vm2, %v1370_v33, 1.0  ;;  %v4695_v8 = vsel %vm1203_vm2, %v1146_v47, %v970_v29  ;;  %v1371_v0 = vsel %vm818_vm1, %v1307_v5, %v970_v29  ;;  %3662 = vmatprep.subr.msk.bf16.mxu0 %vm1524_vm3, %v1512_v21  ;;  %3450 = vmatpush3.bf16.xpose.msra.mxu1 %v1562_v20  ;;  %v1852_v52 = vsel %vm1524_vm3, %v1512_v21, 0 }
 0x1b5   : > { %v1435_v48 = vsel %vm1203_vm2, %v1371_v0, 1.0  ;;  %3514 = vmatpush3.bf16.xpose.msra.mxu0 %v1852_v52  ;;  %v1177_v47 = vsel %vm818_vm1, %v5962_v51, 1.0  ;;  %v1178_v21 = vsel %vm818_vm1, %v5963_v17, 1.0  ;;  %v5964_v52 = vld [vmem:[#allocation11_spill] sm:$0xff] }
 0x1b6   : > { %v1495_v33 = vpack.c.bf16 %v1435_v48, %v1434_v41  ;;  %v1063_v29 = vpop.xlane.xlu0 %1062  ;;  %v1304_v51 = vmul.f32 -2.0, %v5964_v52 }
 0x1b7   : > { %v4708_v5 = vsel %vm1203_vm2, %v1177_v47, %v1063_v29  ;;  %v1402_v20 = vsel %vm818_vm1, %v1338_v1, %v1063_v29  ;;  %v1066_v24 = vpop.xlane.xlu1 %1065  ;;  %v5965_v47 = vld [vmem:[#allocation14_spill] sm:$0xff] }
 0x1b8   : > { %v1466_v63 = vsel %vm1203_vm2, %v1402_v20, 1.0  ;;  %v4715_v0 = vsel %vm1203_vm2, %v1178_v21, %v1066_v24  ;;  %v1403_v41 = vsel %vm818_vm1, %v1339_v50, %v1066_v24  ;;  %3647 = vmatprep.subr.msk.bf16.mxu1 %vm1524_vm3, %v1495_v33  ;;  %v1305_v29 = vmul.f32 -2.0, %v5965_v47 }
 0x1b9   : > { %v1467_v1 = vsel %vm1203_vm2, %v1403_v41, 1.0  ;;  %v1143_v20 = vsel %vm818_vm1, %v5964_v52, 1.0  ;;  %v1144_v50 = vsel %vm818_vm1, %v5965_v47, 1.0  ;;  %v1559_v48 = vsel %vm1524_vm3, %v1495_v33, 0 }
 0x1ba   : > { %v1511_v17 = vpack.c.bf16 %v1467_v1, %v1466_v63  ;;  %v961_v32 = vpop.xlane.xlu0 %960  ;;  %v1337_v33 = vmul.f32 -2.0, %v4067_v49 }
 0x1bb   : > { %v4727_v21 = vsel %vm1203_vm2, %v1143_v20, %v961_v32  ;;  %v1368_v24 = vsel %vm818_vm1, %v1304_v51, %v961_v32  ;;  %v964_v16 = vpop.xlane.xlu1 %963  ;;  %v1336_v32 = vmul.f32 -2.0, %v4053_v45  ;;  %v1175_v20 = vsel %vm818_vm1, %v4053_v45, 1.0 }
 0x1bc   : > { %v1432_v41 = vsel %vm1203_vm2, %v1368_v24, 1.0  ;;  %v4735_v53 = vsel %vm1203_vm2, %v1144_v50, %v964_v16  ;;  %v1369_v63 = vsel %vm818_vm1, %v1305_v29, %v964_v16  ;;  %3663 = vmatprep.subr.msk.bf16.mxu0 %vm1524_vm3, %v1511_v17  ;;  %3452 = vmatpush3.bf16.xpose.msra.mxu1 %v1559_v48  ;;  %v1849_v52 = vsel %vm1524_vm3, %v1511_v17, 0 }
 0x1bd   : > { %v1433_v1 = vsel %vm1203_vm2, %v1369_v63, 1.0  ;;  %3516 = vmatpush3.bf16.xpose.msra.mxu0 %v1849_v52  ;;  %v1176_v17 = vsel %vm818_vm1, %v4067_v49, 1.0  ;;  %v1302_v45 = vmul.f32 -2.0, %v4013_v34 }
 0x1be   : > { %v1494_v47 = vpack.c.bf16 %v1433_v1, %v1432_v41  ;;  %v1057_v16 = vpop.xlane.xlu0 %1056  ;;  %v1303_v1 = vmul.f32 -2.0, %v4027_v38 }
 0x1bf   : > { %v4748_v29 = vsel %vm1203_vm2, %v1175_v20, %v1057_v16  ;;  %v1400_v48 = vsel %vm818_vm1, %v1336_v32, %v1057_v16  ;;  %v1060_v24 = vpop.xlane.xlu1 %1059  ;;  %v1141_v20 = vsel %vm818_vm1, %v4013_v34, 1.0 }
 0x1c0   : > { %v1464_v50 = vsel %vm1203_vm2, %v1400_v48, 1.0  ;;  %v4755_v63 = vsel %vm1203_vm2, %v1176_v17, %v1060_v24  ;;  %v1401_v41 = vsel %vm818_vm1, %v1337_v33, %v1060_v24  ;;  %3648 = vmatprep.subr.msk.bf16.mxu1 %vm1524_vm3, %v1494_v47  ;;  %v1142_v17 = vsel %vm818_vm1, %v4027_v38, 1.0 }
 0x1c1   : > { %v1465_v32 = vsel %vm1203_vm2, %v1401_v41, 1.0  ;;  %v1556_v52 = vsel %vm1524_vm3, %v1494_v47, 0  ;;  %v1335_v47 = vmul.f32 -2.0, %v4032_v39 }
 0x1c2   : > { %v1510_v49 = vpack.c.bf16 %v1465_v32, %v1464_v50  ;;  %v955_v16 = vpop.xlane.xlu0 %954 }
 0x1c3   : > { %v4767_v48 = vsel %vm1203_vm2, %v1141_v20, %v955_v16  ;;  %v1366_v33 = vsel %vm818_vm1, %v1302_v45, %v955_v16  ;;  %v958_v24 = vpop.xlane.xlu1 %957  ;;  %v1334_v45 = vmul.f32 -2.0, %v4018_v35  ;;  %v1173_v16 = vsel %vm818_vm1, %v4018_v35, 1.0 }
 0x1c4   : > { %v1430_v41 = vsel %vm1203_vm2, %v1366_v33, 1.0  ;;  %v4775_v51 = vsel %vm1203_vm2, %v1142_v17, %v958_v24  ;;  %v1367_v50 = vsel %vm818_vm1, %v1303_v1, %v958_v24  ;;  %3664 = vmatprep.subr.msk.bf16.mxu0 %vm1524_vm3, %v1510_v49  ;;  %3454 = vmatpush3.bf16.xpose.msra.mxu1 %v1556_v52  ;;  %v1846_v34 = vsel %vm1524_vm3, %v1510_v49, 0 }
 0x1c5   : > { %v1431_v32 = vsel %vm1203_vm2, %v1367_v50, 1.0  ;;  %3518 = vmatpush3.bf16.xpose.msra.mxu0 %v1846_v34  ;;  %v1174_v49 = vsel %vm818_vm1, %v4032_v39, 1.0  ;;  %v1300_v35 = vmul.f32 -2.0, %v4020_v36 }
 0x1c6   : > { %v1493_v20 = vpack.c.bf16 %v1431_v32, %v1430_v41  ;;  %v1051_v1 = vpop.xlane.xlu0 %1050  ;;  %v1301_v32 = vmul.f32 -2.0, %v4034_v40 }
 0x1c7   : > { %v4788_v33 = vsel %vm1203_vm2, %v1173_v16, %v1051_v1  ;;  %v1398_v52 = vsel %vm818_vm1, %v1334_v45, %v1051_v1  ;;  %v1054_v17 = vpop.xlane.xlu1 %1053  ;;  %v1139_v16 = vsel %vm818_vm1, %v4020_v36, 1.0 }
 0x1c8   : > { %v1462_v24 = vsel %vm1203_vm2, %v1398_v52, 1.0  ;;  %v4795_v50 = vsel %vm1203_vm2, %v1174_v49, %v1054_v17  ;;  %v1399_v41 = vsel %vm818_vm1, %v1335_v47, %v1054_v17  ;;  %3649 = vmatprep.subr.msk.bf16.mxu1 %vm1524_vm3, %v1493_v20  ;;  %v1140_v49 = vsel %vm818_vm1, %v4034_v40, 1.0  ;;  %v5966_v40 = vld [vmem:[#allocation8_spill] sm:$0xff] }
 0x1c9   : > { %v1463_v45 = vsel %vm1203_vm2, %v1399_v41, 1.0  ;;  %v1553_v38 = vsel %vm1524_vm3, %v1493_v20, 0 }
 0x1ca   : > { %v1509_v39 = vpack.c.bf16 %v1463_v45, %v1462_v24  ;;  %v949_v1 = vpop.xlane.xlu0 %948  ;;  %v1332_v45 = vmul.f32 -2.0, %v4025_v37 }
 0x1cb   : > { %v1204_v52 = vsel %vm1203_vm2, %v1139_v16, %v949_v1  ;;  %v1364_v47 = vsel %vm818_vm1, %v1300_v35, %v949_v1  ;;  %v952_v17 = vpop.xlane.xlu1 %951  ;;  %v1333_v1 = vmul.f32 -2.0, %v5966_v40 }
 0x1cc   : > { %v1428_v34 = vsel %vm1203_vm2, %v1364_v47, 1.0  ;;  %v1205_v41 = vsel %vm1203_vm2, %v1140_v49, %v952_v17  ;;  %v1365_v24 = vsel %vm818_vm1, %v1301_v32, %v952_v17  ;;  %3665 = vmatprep.subr.msk.bf16.mxu0 %vm1524_vm3, %v1509_v39  ;;  %3456 = vmatpush3.bf16.xpose.msra.mxu1 %v1553_v38  ;;  %v1843_v36 = vsel %vm1524_vm3, %v1509_v39, 0 }
 0x1cd   : > { %v1268_v35 = vpack.c.bf16 %v1205_v41, %v1204_v52  ;;  %v1429_v16 = vsel %vm1203_vm2, %v1365_v24, 1.0  ;;  %3520 = vmatpush3.bf16.xpose.msra.mxu0 %v1843_v36  ;;  %v1171_v47 = vsel %vm818_vm1, %v4025_v37, 1.0  ;;  %v1172_v38 = vsel %vm818_vm1, %v5966_v40, 1.0 }
 0x1ce   : > { %v1492_v20 = vpack.c.bf16 %v1429_v16, %v1428_v34  ;;  %v1045_v49 = vpop.xlane.xlu0 %1044  ;;  %v1330_v37 = vmul.f32 -2.0, %v4328_v15  ;;  %v1169_v40 = vsel %vm818_vm1, %v4328_v15, 1.0 }
 0x1cf   : > { %v1236_v32 = vsel %vm1203_vm2, %v1171_v47, %v1045_v49  ;;  %v1396_v17 = vsel %vm818_vm1, %v1332_v45, %v1045_v49  ;;  %3459 = vmatprep.mubr.msk.bf16.mxu1 %vm1524_vm3, %v1268_v35  ;;  %v1048_v39 = vpop.xlane.xlu1 %1047  ;;  %v5967_v45 = vld [vmem:[#allocation30_spill] sm:$0xff]  ;;  %v3719_v49 = vld [vmem:[%s5879_s4 + $0x8] sm:$0xff]  }
 0x1d0   : > { %v1460_v52 = vsel %vm1203_vm2, %v1396_v17, 1.0  ;;  %v1237_v41 = vsel %vm1203_vm2, %v1172_v38, %v1048_v39  ;;  %v1397_v34 = vsel %vm818_vm1, %v1333_v1, %v1048_v39  ;;  %3650 = vmatprep.subr.msk.bf16.mxu1 %vm1524_vm3, %v1492_v20  ;;  %v1331_v16 = vmul.f32 -2.0, %v5967_v45 }
 0x1d1   : > { %v1284_v24 = vpack.c.bf16 %v1237_v41, %v1236_v32  ;;  %v1461_v36 = vsel %vm1203_vm2, %v1397_v34, 1.0  ;;  %v1170_v17 = vsel %vm818_vm1, %v5967_v45, 1.0  ;;  %v1550_v39 = vsel %vm1524_vm3, %v1492_v20, 0 }
 0x1d2   : > { %v1508_v35 = vpack.c.bf16 %v1461_v36, %v1460_v52  ;;  %v1039_v47 = vpop.xlane.xlu0 %1038  ;;  %v1329_v20 = vmul.f32 -2.0, %v4373_v43 }
 0x1d3   : > { %3523 = vmatprep.mubr.msk.bf16.mxu0 %vm1524_vm3, %v1284_v24  ;;  %v4840_v1 = vsel %vm1203_vm2, %v1169_v40, %v1039_v47  ;;  %v1394_v32 = vsel %vm818_vm1, %v1330_v37, %v1039_v47  ;;  %v1042_v38 = vpop.xlane.xlu1 %1041  ;;  %v1328_v37 = vmul.f32 -2.0, %v4343_v26  ;;  %v1167_v40 = vsel %vm818_vm1, %v4343_v26, 1.0 }
 0x1d4   : > { %v1458_v15 = vsel %vm1203_vm2, %v1394_v32, 1.0  ;;  %v4848_v52 = vsel %vm1203_vm2, %v1170_v17, %v1042_v38  ;;  %v1395_v41 = vsel %vm818_vm1, %v1331_v16, %v1042_v38  ;;  %3666 = vmatprep.subr.msk.bf16.mxu0 %vm1524_vm3, %v1508_v35  ;;  %3458 = vmatpush3.bf16.xpose.msra.mxu1 %v1550_v39  ;;  %v1840_v34 = vsel %vm1524_vm3, %v1508_v35, 0 }
 0x1d5   : > { %v1283_v24 = vpack.c.bf16 %v4848_v52, %v4840_v1  ;;  %v1459_v36 = vsel %vm1203_vm2, %v1395_v41, 1.0  ;;  %3522 = vmatpush3.bf16.xpose.msra.mxu0 %v1840_v34  ;;  %v1168_v32 = vsel %vm818_vm1, %v4373_v43, 1.0  ;;  %v1326_v26 = vmul.f32 -2.0, %v4264_v12  ;;  %v2269_v1 = vld [vmem:[%s5013_s22 + $0x120] sm:$0xff]  ;;  %v2270_v52 = vld [vmem:[%s5013_s22 + $0x128] sm:$0xff] }
 0x1d6   : > { %v1507_v45 = vpack.c.bf16 %v1459_v36, %v1458_v15  ;;  %v1033_v16 = vpop.xlane.xlu0 %1032  ;;  %3571 = vmatprep.subr.bf16.mxu0 %v3719_v49  ;;  %v1165_v43 = vsel %vm818_vm1, %v4264_v12, 1.0  ;;  %v3720_v12 = vld [vmem:[%s5879_s4] sm:$0xff]  }
 0x1d7   : > { %v4861_v47 = vsel %vm1203_vm2, %v1167_v40, %v1033_v16  ;;  %v1392_v35 = vsel %vm818_vm1, %v1328_v37, %v1033_v16  ;;  %v1036_v17 = vpop.xlane.xlu1 %1035  ;;  %v1327_v37 = vmul.f32 -2.0, %v4296_v28  ;;  %v1166_v16 = vsel %vm818_vm1, %v4296_v28, 1.0 }
 0x1d8   : > { %v4867_v38 = vsel %vm1203_vm2, %v1168_v32, %v1036_v17  ;;  %v1393_v39 = vsel %vm818_vm1, %v1329_v20, %v1036_v17  ;;  %3651 = vmatprep.subr.msk.bf16.mxu1 %vm1524_vm3, %v1507_v45  ;;  %v1456_v15 = vsel %vm1203_vm2, %v1392_v35, 1.0  ;;  %v5968_v32 = vpack.c.bf16 %v4775_v51, %v4767_v48 }
 0x1d9   : > { %v1282_v41 = vpack.c.bf16 %v4867_v38, %v4861_v47  ;;  %v1457_v34 = vsel %vm1203_vm2, %v1393_v39, 1.0  ;;  %v1716_v17 = vsel %vm1524_vm3, %v1507_v45, 0  ;;  %v5970_v51 = vpack.c.bf16 %v4735_v53, %v4727_v21  ;;  %v2267_v38 = vld [vmem:[%s5013_s22 + $0x110] sm:$0xff] }
 0x1da   : > { %v1027_v36 = vpop.xlane.xlu0 %1026  ;;  %v1506_v39 = vpack.c.bf16 %v1457_v34, %v1456_v15  ;;  %v1324_v48 = vmul.f32 -2.0, %v4279_v18  ;;  %v5971_v34 = vpack.c.bf16 %v4755_v63, %v4748_v29  ;;  %v1163_v53 = vsel %vm818_vm1, %v4279_v18, 1.0 }
 0x1db   : > { %v4880_v40 = vsel %vm1203_vm2, %v1165_v43, %v1027_v36  ;;  %v1390_v20 = vsel %vm818_vm1, %v1326_v26, %v1027_v36  ;;  %v1030_v35 = vpop.xlane.xlu1 %1029  ;;  %3460 = vmatmul.mubr.msk.bf16.vlgmr.msra.gmra.mxu1 %vm1524_vm3, %v5968_v32  ;;  %v5969_v36 = vpack.c.bf16 %v4795_v50, %v4788_v33  ;;  %v1325_v33 = vmul.f32 -2.0, %v4311_v60 }
 0x1dc   : > { %v1454_v43 = vsel %vm1203_vm2, %v1390_v20, 1.0  ;;  %v4895_v26 = vsel %vm1203_vm2, %v1166_v16, %v1030_v35  ;;  %v1391_v28 = vsel %vm818_vm1, %v1327_v37, %v1030_v35  ;;  %3463 = vmatprep.mubr.msk.bf16.mxu1 %vm1524_vm3, %v5970_v51  ;;  %3476 = vmatpush3.bf16.xpose.msra.mxu1 %v1716_v17  ;;  %v1164_v29 = vsel %vm818_vm1, %v4311_v60, 1.0 }
 0x1dd   : > { %3524 = vmatmul.mubr.msk.bf16.vlgmr.msra.gmra.mxu0 %vm1524_vm3, %v5969_v36  ;;  %v1281_v45 = vpack.c.bf16 %v4895_v26, %v4880_v40  ;;  %v1455_v15 = vsel %vm1203_vm2, %v1391_v28, 1.0  ;;  %3652 = vmatprep.subr.msk.bf16.mxu1 %vm1524_vm3, %v1506_v39  ;;  %v1322_v18 = vmul.f32 -2.0, %v4200_v27  ;;  %v1161_v60 = vsel %vm818_vm1, %v4200_v27, 1.0  ;;  %v2265_v40 = vld [vmem:[%s5013_s22 + $0x100] sm:$0xff]  ;;  %v2266_v26 = vld [vmem:[%s5013_s22 + $0x108] sm:$0xff] }
 0x1de   : > { %3527 = vmatprep.mubr.msk.bf16.mxu0 %vm1524_vm3, %v5971_v34  ;;  %v4915_v50 = vpack.c.bf16 %v1455_v15, %v1454_v43  ;;  %3572 = vmatpush3.bf16.msra.mxu0 %v3719_v49  ;;  %v1021_v21 = vpop.xlane.xlu0 %1020  ;;  %v1323_v43 = vmul.f32 -2.0, %v4232_v62  ;;  %v1162_v15 = vsel %vm818_vm1, %v4232_v62, 1.0  ;;  %v5974_v62 = vpack.c.bf16 %v4655_v54, %v4647_v7 }
 0x1df   : > { %v4921_v37 = vsel %vm1203_vm2, %v1163_v53, %v1021_v21  ;;  %v1388_v20 = vsel %vm818_vm1, %v1324_v48, %v1021_v21  ;;  %v1024_v63 = vpop.xlane.xlu1 %1023  ;;  %3573 = vmatprep.subr.bf16.mxu0 %v3720_v12  ;;  %v5973_v21 = vpack.c.bf16 %v4715_v0, %v4708_v5  ;;  %v5975_v5 = vpack.c.bf16 %v4675_v25, %v4668_v3 }
 0x1e0   : > { %v1452_v16 = vsel %vm1203_vm2, %v1388_v20, 1.0  ;;  %v4928_v35 = vsel %vm1203_vm2, %v1164_v29, %v1024_v63  ;;  %v1389_v49 = vsel %vm818_vm1, %v1325_v33, %v1024_v63  ;;  %v5972_v33 = vpack.c.bf16 %v4695_v8, %v4687_v55 }
 0x1e1   : > { %v1280_v32 = vpack.c.bf16 %v4928_v35, %v4921_v37  ;;  %v1453_v17 = vsel %vm1203_vm2, %v1389_v49, 1.0  ;;  %v1713_v8 = vsel %vm1524_vm3, %v1506_v39, 0  ;;  %v1320_v55 = vmul.f32 -2.0, %v4215_v30  ;;  %v2263_v35 = vld [vmem:[%s5013_s22 + $0xf0] sm:$0xff] }
 0x1e2   : > { %v4936_v28 = vpack.c.bf16 %v1453_v17, %v1452_v16  ;;  %v1015_v36 = vpop.xlane.xlu0 %1014  ;;  %3574 = vmatpush3.bf16.msra.mxu0 %v3720_v12  ;;  %v1321_v0 = vmul.f32 -2.0, %v4247_v4  ;;  %v1159_v7 = vsel %vm818_vm1, %v4215_v30, 1.0  ;;  %v1160_v3 = vsel %vm818_vm1, %v4247_v4, 1.0 }
 0x1e3   : > { %v4941_v51 = vsel %vm1203_vm2, %v1161_v60, %v1015_v36  ;;  %v1386_v48 = vsel %vm818_vm1, %v1322_v18, %v1015_v36  ;;  %v1018_v34 = vpop.xlane.xlu1 %1017  ;;  %3464 = vmatmul.mubr.msk.bf16.gmra.mxu1 %vm1524_vm3, %v5972_v33  ;;  %v1318_v30 = vmul.f32 -2.0, %v4139_v11  ;;  %v1319_v36 = vmul.f32 -2.0, %v4168_v19 }
 0x1e4   : > { %v1450_v53 = vsel %vm1203_vm2, %v1386_v48, 1.0  ;;  %v4952_v27 = vsel %vm1203_vm2, %v1162_v15, %v1018_v34  ;;  %v1387_v12 = vsel %vm818_vm1, %v1323_v43, %v1018_v34  ;;  %3467 = vmatprep.mubr.msk.bf16.mxu1 %vm1524_vm3, %v5974_v62  ;;  %3478 = vmatpush3.bf16.xpose.msra.mxu1 %v1713_v8  ;;  %v1157_v4 = vsel %vm818_vm1, %v4139_v11, 1.0 }
 0x1e5   : > { %3528 = vmatmul.mubr.msk.bf16.gmra.mxu0 %vm1524_vm3, %v5973_v21  ;;  %v1279_v20 = vpack.c.bf16 %v4952_v27, %v4941_v51  ;;  %v1451_v29 = vsel %vm1203_vm2, %v1387_v12, 1.0  ;;  %3653 = vmatprep.subr.msk.bf16.mxu1 %vm1524_vm3, %v4915_v50  ;;  %v5976_v21 = vpack.c.bf16 %v4615_v46, %v4607_v59  ;;  %v5977_v8 = vpack.c.bf16 %v4635_v6, %v4628_v9  ;;  %v2261_v51 = vld [vmem:[%s5013_s22 + $0xe0] sm:$0xff]  ;;  %v2262_v27 = vld [vmem:[%s5013_s22 + $0xe8] sm:$0xff] }
 0x1e6   : > { %3531 = vmatprep.mubr.msk.bf16.mxu0 %vm1524_vm3, %v5975_v5  ;;  %v4973_v54 = vpack.c.bf16 %v1451_v29, %v1450_v53  ;;  %v1009_v39 = vpop.xlane.xlu0 %1008  ;;  %v1158_v53 = vsel %vm818_vm1, %v4168_v19, 1.0  ;;  %v5978_v46 = vpack.c.bf16 %v4575_v2, %v4566_v58  ;;  %v1710_v59 = vsel %vm1524_vm3, %v4915_v50, 0 }
 0x1e7   : > { %v4980_v63 = vsel %vm1203_vm2, %v1159_v7, %v1009_v39  ;;  %v1384_v16 = vsel %vm818_vm1, %v1320_v55, %v1009_v39  ;;  %v1012_v25 = vpop.xlane.xlu1 %1011  ;;  %v1316_v55 = vmul.f32 -2.0, %v4151_v14  ;;  %v5979_v9 = vpack.c.bf16 %v4595_v61, %v4588_v57  ;;  %v2234_v7 = vld [vmem:[%s5013_s22 + $0x8] sm:$0xff] }
 0x1e8   : > { %v1448_v49 = vsel %vm1203_vm2, %v1384_v16, 1.0  ;;  %v4987_v18 = vsel %vm1203_vm2, %v1160_v3, %v1012_v25  ;;  %v1385_v17 = vsel %vm818_vm1, %v1321_v0, %v1012_v25  ;;  %v1317_v58 = vmul.f32 -2.0, %v4183_v22  ;;  %v2233_v0 = vld [vmem:[%s5013_s22] sm:$0xff] }
 0x1e9   : > { %v1278_v43 = vpack.c.bf16 %v4987_v18, %v4980_v63  ;;  %v1449_v60 = vsel %vm1203_vm2, %v1385_v17, 1.0  ;;  %v1155_v6 = vsel %vm818_vm1, %v4151_v14, 1.0  ;;  %v1156_v57 = vsel %vm818_vm1, %v4183_v22, 1.0  ;;  %v2259_v18 = vld [vmem:[%s5013_s22 + $0xd0] sm:$0xff] }
 0x1ea   : > { %v4995_v48 = vpack.c.bf16 %v1449_v60, %v1448_v49  ;;  %v1003_v15 = vpop.xlane.xlu0 %1002  ;;  %v1362_v17 = vmul.f32 -2.0, %v4338_v23  ;;  %v2297_v60 = vpack.c.bf16 %v2234_v7, %v2233_v0  ;;  %v1201_v22 = vsel %vm818_vm1, %v4338_v23, 1.0 }
 0x1eb   : > { %v5000_v34 = vsel %vm1203_vm2, %v1157_v4, %v1003_v15  ;;  %v1382_v33 = vsel %vm818_vm1, %v1318_v30, %v1003_v15  ;;  %v1006_v12 = vpop.xlane.xlu1 %1005  ;;  %3468 = vmatmul.mubr.msk.bf16.gmra.mxu1 %vm1524_vm3, %v5976_v21 }
 0x1ec   : > { %v1446_v11 = vsel %vm1203_vm2, %v1382_v33, 1.0  ;;  %v5017_v62 = vsel %vm1203_vm2, %v1158_v53, %v1006_v12  ;;  %v1383_v19 = vsel %vm818_vm1, %v1319_v36, %v1006_v12  ;;  %3471 = vmatprep.mubr.msk.bf16.mxu1 %vm1524_vm3, %v5978_v46  ;;  %3480 = vmatpush3.bf16.xpose.msra.mxu1 %v1710_v59  ;;  %v1363_v36 = vmul.f32 -2.0, %v4375_v31  ;;  %v2235_v59 = vld [vmem:[%s5013_s22 + $0x10] sm:$0xff] }
 0x1ed   : > { %3532 = vmatmul.mubr.msk.bf16.gmra.mxu0 %vm1524_vm3, %v5977_v8  ;;  %v1277_v29 = vpack.c.bf16 %v5017_v62, %v5000_v34  ;;  %v1447_v5 = vsel %vm1203_vm2, %v1383_v19, 1.0  ;;  %3654 = vmatprep.subr.msk.bf16.mxu1 %vm1524_vm3, %v4936_v28  ;;  %v1202_v12 = vsel %vm818_vm1, %v4375_v31, 1.0  ;;  %v5981_v46 = vpack.c.bf16 %v4552_v13, %v4535_v56  ;;  %v2257_v34 = vld [vmem:[%s5013_s22 + $0xc0] sm:$0xff]  ;;  %v2258_v62 = vld [vmem:[%s5013_s22 + $0xc8] sm:$0xff] }
 0x1ee   : > { %3535 = vmatprep.mubr.msk.bf16.mxu0 %vm1524_vm3, %v5979_v9  ;;  %v5039_v2 = vpack.c.bf16 %v1447_v5, %v1446_v11  ;;  %v997_v50 = vpop.xlane.xlu0 %996  ;;  %v5980_v11 = vpack.c.bf16 %v4548_v44, %v4531_v42  ;;  %v1707_v31 = vsel %vm1524_vm3, %v4936_v28, 0  ;;  %v1199_v13 = vsel %vm818_vm1, %v4354_v10, 1.0  ;;  %v2237_v28 = vld [vmem:[%s5013_s22 + $0x20] sm:$0xff]  ;;  %v2238_v9 = vld [vmem:[%s5013_s22 + $0x28] sm:$0xff] }
 0x1ef   : > { %v1220_v39 = vsel %vm1203_vm2, %v1155_v6, %v997_v50  ;;  %v1380_v16 = vsel %vm818_vm1, %v1316_v55, %v997_v50  ;;  %v1000_v61 = vpop.xlane.xlu1 %999  ;;  %v2236_v55 = vld [vmem:[%s5013_s22 + $0x18] sm:$0xff] }
 0x1f0   : > { %v1444_v3 = vsel %vm1203_vm2, %v1380_v16, 1.0  ;;  %v1221_v25 = vsel %vm1203_vm2, %v1156_v57, %v1000_v61  ;;  %v1381_v49 = vsel %vm818_vm1, %v1317_v58, %v1000_v61  ;;  %v5982_v6 = vld [vmem:[#allocation31_spill] sm:$0xff]  ;;  %v5983_v16 = vld [vmem:[#allocation26_spill] sm:$0xff] }
 0x1f1   : > { %v1276_v14 = vpack.c.bf16 %v1221_v25, %v1220_v39  ;;  %v1445_v30 = vsel %vm1203_vm2, %v1381_v49, 1.0  ;;  %v1200_v50 = vsel %vm818_vm1, %v5982_v6, 1.0  ;;  %v2298_v39 = vpack.c.bf16 %v2236_v55, %v2235_v59  ;;  %v5984_v25 = vld [vmem:[#allocation28_spill] sm:$0xff]  ;;  %v5986_v59 = vld [vmem:[#allocation29_spill] sm:$0xff] }
 0x1f2   : > { %v5057_v4 = vpack.c.bf16 %v1445_v30, %v1444_v3  ;;  %v1135_v15 = vpop.xlane.xlu0 %1134  ;;  %v1358_v57 = vmul.f32 -2.0, %v5983_v16  ;;  %v2299_v3 = vpack.c.bf16 %v2238_v9, %v2237_v28  ;;  %v1359_v49 = vmul.f32 -2.0, %v5984_v25  ;;  %v2241_v9 = vld [vmem:[%s5013_s22 + $0x40] sm:$0xff] }
 0x1f3   : > { %v5062_v33 = vsel %vm1203_vm2, %v1201_v22, %v1135_v15  ;;  %v1426_v53 = vsel %vm818_vm1, %v1362_v17, %v1135_v15  ;;  %v1138_v21 = vpop.xlane.xlu1 %1137  ;;  %3472 = vmatmul.mubr.msk.bf16.gmra.mxu1 %vm1524_vm3, %v5980_v11  ;;  %v1197_v17 = vsel %vm818_vm1, %v5983_v16, 1.0  ;;  %v5985_v11 = vld [vmem:[#allocation27_spill] sm:$0xff]  ;;  %v1357_v55 = vmul.f32 -2.0, %v5986_v59 }
 0x1f4   : > { %v1490_v19 = vsel %vm1203_vm2, %v1426_v53, 1.0  ;;  %v5073_v23 = vsel %vm1203_vm2, %v1202_v12, %v1138_v21  ;;  %v1427_v8 = vsel %vm818_vm1, %v1363_v36, %v1138_v21  ;;  %3491 = vmatprep.mubr.msk.bf16.mxu1 %vm1524_vm3, %v1276_v14  ;;  %3482 = vmatpush3.bf16.xpose.msra.mxu1 %v1707_v31  ;;  %v1198_v36 = vsel %vm818_vm1, %v5984_v25, 1.0  ;;  %v2239_v31 = vld [vmem:[%s5013_s22 + $0x30] sm:$0xff] }
 0x1f5   : > { %3536 = vmatmul.mubr.msk.bf16.gmra.mxu0 %vm1524_vm3, %v5981_v46  ;;  %v1491_v44 = vsel %vm1203_vm2, %v1427_v8, 1.0  ;;  %3655 = vmatprep.subr.msk.bf16.mxu1 %vm1524_vm3, %v4973_v54  ;;  %v1704_v21 = vsel %vm1524_vm3, %v4973_v54, 0  ;;  %v1195_v54 = vsel %vm818_vm1, %v5985_v11, 1.0 }
 0x1f6   : > { %3575 = vmatprep.mubr.msk.bf16.mxu0 %vm432_vm0, %v2297_v60  ;;  %v5089_v5 = vpack.c.bf16 %v1491_v44, %v1490_v19  ;;  %v5095_v56 = vpop.xlane.xlu0 %1128  ;;  %v1356_v19 = vmul.f32 -2.0, %v5985_v11  ;;  %v2240_v44 = vld [vmem:[%s5013_s22 + $0x38] sm:$0xff] }
 0x1f7   : > { %v5101_v58 = vsel %vm1203_vm2, %v1199_v13, %v5095_v56  ;;  %v5105_v0 = vpop.xlane.xlu1 %1131 }
 0x1f8   : > { %v5109_v7 = vsel %vm1203_vm2, %v1200_v50, %v5105_v0  ;;  %v2242_v50 = vld [vmem:[%s5013_s22 + $0x48] sm:$0xff] }
 0x1fa   : > { %v1123_v14 = vpop.xlane.xlu0 %1122 }
 0x1fb   : > { %v5118_v30 = vsel %vm1203_vm2, %v1197_v17, %v1123_v14  ;;  %v1422_v60 = vsel %vm818_vm1, %v1358_v57, %v1123_v14  ;;  %v1126_v22 = vpop.xlane.xlu1 %1125  ;;  %v1196_v57 = vsel %vm818_vm1, %v5986_v59, 1.0  ;;  %v2300_v14 = vpack.c.bf16 %v2240_v44, %v2239_v31 }
 0x1fc   : > { %v1486_v15 = vsel %vm1203_vm2, %v1422_v60, 1.0  ;;  %v5125_v53 = vsel %vm1203_vm2, %v1198_v36, %v1126_v22  ;;  %v1423_v12 = vsel %vm818_vm1, %v1359_v49, %v1126_v22  ;;  %3484 = vmatpush3.bf16.xpose.msra.mxu1 %v1704_v21  ;;  %v5987_v60 = vld [vmem:[#allocation22_spill] sm:$0xff]  ;;  %v5988_v21 = vld [vmem:[#allocation24_spill] sm:$0xff]  ;;  %v2250_v22 = vld [vmem:[%s5013_s22 + $0x88] sm:$0xff] }
 0x1fd   : > { %3576 = vmatmul.mubr.msk.bf16.vlgmr.msra.gmra.mxu0 %vm432_vm0, %v2298_v39  ;;  %v1487_v46 = vsel %vm1203_vm2, %v1423_v12, 1.0  ;;  %3656 = vmatprep.subr.msk.bf16.mxu1 %vm1524_vm3, %v4995_v48  ;;  %v1354_v36 = vmul.f32 -2.0, %v5987_v60  ;;  %v2301_v12 = vpack.c.bf16 %v2242_v50, %v2241_v9  ;;  %v1355_v11 = vmul.f32 -2.0, %v5988_v21 }
 0x1fe   : > { %3579 = vmatprep.mubr.msk.bf16.mxu0 %vm432_vm0, %v2299_v3  ;;  %v5139_v13 = vpack.c.bf16 %v1487_v46, %v1486_v15  ;;  %v1117_v28 = vpop.xlane.xlu0 %1116  ;;  %v1193_v46 = vsel %vm818_vm1, %v5987_v60, 1.0  ;;  %v2243_v60 = vld [vmem:[%s5013_s22 + $0x50] sm:$0xff] }
 0x1ff   : > { %v5148_v39 = vsel %vm1203_vm2, %v1195_v54, %v1117_v28  ;;  %v1420_v16 = vsel %vm818_vm1, %v1356_v19, %v1117_v28  ;;  %v1120_v3 = vpop.xlane.xlu1 %1119 }
 0x200   : > { %v1484_v25 = vsel %vm1203_vm2, %v1420_v16, 1.0  ;;  %v5155_v49 = vsel %vm1203_vm2, %v1196_v57, %v1120_v3  ;;  %v1421_v17 = vsel %vm818_vm1, %v1357_v55, %v1120_v3  ;;  %v1194_v55 = vsel %vm818_vm1, %v5988_v21, 1.0  ;;  %v5989_v57 = vld [vmem:[#allocation23_spill] sm:$0xff] }
 0x201   : > { %v1485_v15 = vsel %vm1203_vm2, %v1421_v17, 1.0  ;;  %v1701_v16 = vsel %vm1524_vm3, %v4995_v48, 0  ;;  %v1352_v3 = vmul.f32 -2.0, %v5989_v57  ;;  %v1191_v48 = vsel %vm818_vm1, %v5989_v57, 1.0 }
 0x202   : > { %v5163_v19 = vpack.c.bf16 %v1485_v15, %v1484_v25  ;;  %v1111_v59 = vpop.xlane.xlu0 %1110  ;;  %v5990_v15 = vld [vmem:[#allocation25_spill] sm:$0xff]  ;;  %v2000_v37 = vsel %vm1524_vm3, %v5139_v13, 0 }
 0x203   : > { %v5168_v31 = vsel %vm1203_vm2, %v1193_v46, %v1111_v59  ;;  %v1418_v44 = vsel %vm818_vm1, %v1354_v36, %v1111_v59  ;;  %v1114_v54 = vpop.xlane.xlu1 %1113  ;;  %v2244_v36 = vld [vmem:[%s5013_s22 + $0x58] sm:$0xff]  ;;  %v1353_v21 = vmul.f32 -2.0, %v5990_v15  ;;  %v2245_v46 = vld [vmem:[%s5013_s22 + $0x60] sm:$0xff]  ;;  %v2246_v59 = vld [vmem:[%s5013_s22 + $0x68] sm:$0xff] }
 0x204   : > { %v1482_v28 = vsel %vm1203_vm2, %v1418_v44, 1.0  ;;  %v5175_v9 = vsel %vm1203_vm2, %v1194_v55, %v1114_v54  ;;  %v1419_v50 = vsel %vm818_vm1, %v1355_v11, %v1114_v54  ;;  %3486 = vmatpush3.bf16.xpose.msra.mxu1 %v1701_v16  ;;  %v1192_v55 = vsel %vm818_vm1, %v5990_v15, 1.0 }
 0x205   : > { %3580 = vmatmul.mubr.msk.bf16.gmra.mxu0 %vm432_vm0, %v2300_v14  ;;  %v1483_v17 = vsel %vm1203_vm2, %v1419_v50, 1.0  ;;  %3657 = vmatprep.subr.msk.bf16.mxu1 %vm1524_vm3, %v5039_v2  ;;  %v2302_v57 = vpack.c.bf16 %v2244_v36, %v2243_v60  ;;  %v1997_v47 = vsel %vm1524_vm3, %v5163_v19, 0 }
 0x206   : > { %3583 = vmatprep.mubr.msk.bf16.mxu0 %vm432_vm0, %v2301_v12  ;;  %v5189_v11 = vpack.c.bf16 %v1483_v17, %v1482_v28  ;;  %v1105_v14 = vpop.xlane.xlu0 %1104  ;;  %v5991_v17 = vld [vmem:[#allocation18_spill] sm:$0xff] }
 0x207   : > { %v5198_v44 = vsel %vm1203_vm2, %v1191_v48, %v1105_v14  ;;  %v1416_v12 = vsel %vm818_vm1, %v1352_v3, %v1105_v14  ;;  %v1108_v54 = vpop.xlane.xlu1 %1107  ;;  %v1350_v42 = vmul.f32 -2.0, %v5991_v17  ;;  %v2303_v3 = vpack.c.bf16 %v2246_v59, %v2245_v46  ;;  %v5992_v14 = vld [vmem:[#allocation20_spill] sm:$0xff] }
 0x208   : > { %v1480_v28 = vsel %vm1203_vm2, %v1416_v12, 1.0  ;;  %v5205_v50 = vsel %vm1203_vm2, %v1192_v55, %v1108_v54  ;;  %v1417_v16 = vsel %vm818_vm1, %v1353_v21, %v1108_v54  ;;  %v1351_v8 = vmul.f32 -2.0, %v5992_v14 }
 0x209   : > { %v1481_v61 = vsel %vm1203_vm2, %v1417_v16, 1.0  ;;  %v1189_v12 = vsel %vm818_vm1, %v5991_v17, 1.0  ;;  %v1190_v21 = vsel %vm818_vm1, %v5992_v14, 1.0  ;;  %v5993_v16 = vld [vmem:[#allocation19_spill] sm:$0xff]  ;;  %v1360_v17 = vmul.f32 -2.0, %v4354_v10 }
 0x20a   : > { %v5213_v15 = vpack.c.bf16 %v1481_v61, %v1480_v28  ;;  %v1099_v55 = vpop.xlane.xlu0 %1098  ;;  %v1698_v28 = vsel %vm1524_vm3, %v5039_v2, 0  ;;  %v1187_v2 = vsel %vm818_vm1, %v5993_v16, 1.0 }
 0x20b   : > { %v5218_v60 = vsel %vm1203_vm2, %v1189_v12, %v1099_v55  ;;  %v1414_v36 = vsel %vm818_vm1, %v1350_v42, %v1099_v55  ;;  %v1102_v54 = vpop.xlane.xlu1 %1101  ;;  %v1348_v42 = vmul.f32 -2.0, %v5993_v16  ;;  %v2247_v12 = vld [vmem:[%s5013_s22 + $0x70] sm:$0xff]  ;;  %v2248_v55 = vld [vmem:[%s5013_s22 + $0x78] sm:$0xff] }
 0x20c   : > { %v1478_v46 = vsel %vm1203_vm2, %v1414_v36, 1.0  ;;  %v5225_v61 = vsel %vm1203_vm2, %v1190_v21, %v1102_v54  ;;  %v1415_v59 = vsel %vm818_vm1, %v1351_v8, %v1102_v54  ;;  %3488 = vmatpush3.bf16.xpose.msra.mxu1 %v1698_v28  ;;  %v5994_v36 = vld [vmem:[#allocation21_spill] sm:$0xff]  ;;  %v2249_v54 = vld [vmem:[%s5013_s22 + $0x80] sm:$0xff]  ;;  %v2304_v48 = vpack.c.bf16 %v2248_v55, %v2247_v12  ;;  %v2251_v12 = vld [vmem:[%s5013_s22 + $0x90] sm:$0xff] }
 0x20d   : > { %3584 = vmatmul.mubr.msk.bf16.gmra.mxu0 %vm432_vm0, %v2302_v57  ;;  %v1479_v14 = vsel %vm1203_vm2, %v1415_v59, 1.0  ;;  %v1349_v8 = vmul.f32 -2.0, %v5994_v36  ;;  %3658 = vmatprep.subr.msk.bf16.mxu1 %vm1524_vm3, %v5057_v4  ;;  %v1188_v28 = vsel %vm818_vm1, %v5994_v36, 1.0  ;;  %v2252_v55 = vld [vmem:[%s5013_s22 + $0x98] sm:$0xff] }
 0x20e   : > { %3587 = vmatprep.mubr.msk.bf16.mxu0 %vm432_vm0, %v2303_v3  ;;  %v5239_v21 = vpack.c.bf16 %v1479_v14, %v1478_v46  ;;  %v1093_v57 = vpop.xlane.xlu0 %1092 }
 0x20f   : > { %v5248_v59 = vsel %vm1203_vm2, %v1187_v2, %v1093_v57  ;;  %v1412_v3 = vsel %vm818_vm1, %v1348_v42, %v1093_v57  ;;  %v1096_v46 = vpop.xlane.xlu1 %1095  ;;  %v2305_v57 = vpack.c.bf16 %v2250_v22, %v2249_v54  ;;  %v1424_v22 = vsel %vm818_vm1, %v1360_v17, %v5095_v56  ;;  %v2256_v17 = vld [vmem:[%s5013_s22 + $0xb8] sm:$0xff] }
 0x210   : > { %v1476_v14 = vsel %vm1203_vm2, %v1412_v3, 1.0  ;;  %v5255_v25 = vsel %vm1203_vm2, %v1188_v28, %v1096_v46  ;;  %v1413_v16 = vsel %vm818_vm1, %v1349_v8, %v1096_v46  ;;  %v1361_v3 = vmul.f32 -2.0, %v5982_v6  ;;  %v2253_v6 = vld [vmem:[%s5013_s22 + $0xa0] sm:$0xff] }
 0x211   : > { %v1292_v2 = vpack.c.bf16 %v5255_v25, %v5248_v59  ;;  %v1477_v42 = vsel %vm1203_vm2, %v1413_v16, 1.0  ;;  %v1695_v8 = vsel %vm1524_vm3, %v5057_v4, 0  ;;  %v2306_v4 = vpack.c.bf16 %v2252_v55, %v2251_v12  ;;  %v2271_v59 = vld [vmem:[%s5013_s22 + $0x130] sm:$0xff]  ;;  %v2276_v55 = vld [vmem:[%s5013_s22 + $0x158] sm:$0xff] }
 0x212   : > { %v5261_v36 = vpack.c.bf16 %v1477_v42, %v1476_v14  ;;  %v1425_v10 = vsel %vm818_vm1, %v1361_v3, %v5105_v0  ;;  %v1488_v54 = vsel %vm1203_vm2, %v1424_v22, 1.0  ;;  %v2006_v56 = vsel %vm1524_vm3, %v5089_v5, 0  ;;  %v2255_v0 = vld [vmem:[%s5013_s22 + $0xb0] sm:$0xff]  ;;  %v2273_v42 = vld [vmem:[%s5013_s22 + $0x140] sm:$0xff] }
 0x213   : > { %v1489_v28 = vsel %vm1203_vm2, %v1425_v10, 1.0  ;;  %v2311_v16 = vpack.c.bf16 %v2262_v27, %v2261_v51  ;;  %v1994_v25 = vsel %vm1524_vm3, %v5189_v11, 0  ;;  %v2275_v12 = vld [vmem:[%s5013_s22 + $0x150] sm:$0xff]  ;;  %v2277_v22 = vld [vmem:[%s5013_s22 + $0x160] sm:$0xff]  ;;  %v2278_v10 = vld [vmem:[%s5013_s22 + $0x168] sm:$0xff] }
 0x214   : > { %3490 = vmatpush3.bf16.xpose.msra.mxu1 %v1695_v8  ;;  %v1522_v14 = vpack.c.bf16 %v1489_v28, %v1488_v54  ;;  %v2280_v54 = vld [vmem:[%s5013_s22 + $0x178] sm:$0xff]  ;;  %v2281_v28 = vld [vmem:[%s5013_s22 + $0x180] sm:$0xff]  ;;  %v2290_v27 = vld [vmem:[%s5013_s22 + $0x1c8] sm:$0xff] }
 0x215   : > { %3588 = vmatmul.mubr.msk.bf16.gmra.mxu0 %vm432_vm0, %v2304_v48  ;;  %3667 = vmatprep.subr.msk.bf16.mxu1 %vm1524_vm3, %v5089_v5  ;;  %v2254_v48 = vld [vmem:[%s5013_s22 + $0xa8] sm:$0xff]  ;;  %v2309_v5 = vpack.c.bf16 %v2258_v62, %v2257_v34  ;;  %v2285_v34 = vld [vmem:[%s5013_s22 + $0x1a0] sm:$0xff] }
 0x216   : > { %3591 = vmatprep.mubr.msk.bf16.mxu0 %vm432_vm0, %v2305_v57  ;;  %v2307_v46 = vpack.c.bf16 %v2254_v48, %v2253_v6  ;;  %v2003_v63 = vsel %vm1524_vm3, %v1522_v14, 0  ;;  %v2274_v57 = vld [vmem:[%s5013_s22 + $0x148] sm:$0xff]  ;;  %v2318_v6 = vpack.c.bf16 %v2276_v55, %v2275_v12  ;;  %v2319_v48 = vpack.c.bf16 %v2278_v10, %v2277_v22  ;;  %v2289_v51 = vld [vmem:[%s5013_s22 + $0x1c0] sm:$0xff] }
 0x217   : > { %v2317_v8 = vpack.c.bf16 %v2274_v57, %v2273_v42  ;;  %v2286_v62 = vld [vmem:[%s5013_s22 + $0x1a8] sm:$0xff] }
 0x21b   : > { %3492 = vmatmul.mubr.msk.bf16.vlgmr.msra.gmra.mxu1 %vm1524_vm3, %v1277_v29  ;;  %v2308_v29 = vpack.c.bf16 %v2256_v17, %v2255_v0  ;;  %v2283_v0 = vld [vmem:[%s5013_s22 + $0x190] sm:$0xff]  ;;  %v2284_v17 = vld [vmem:[%s5013_s22 + $0x198] sm:$0xff] }
 0x21c   : > { %3495 = vmatprep.mubr.msk.bf16.mxu1 %vm1524_vm3, %v1278_v43  ;;  %3540 = vmatpush3.bf16.xpose.msra.mxu1 %v2006_v56  ;;  %v2260_v43 = vld [vmem:[%s5013_s22 + $0xd8] sm:$0xff] }
 0x21d   : > { %3592 = vmatmul.mubr.msk.bf16.gmra.mxu0 %vm432_vm0, %v2306_v4  ;;  %3668 = vmatprep.subr.msk.bf16.mxu1 %vm1524_vm3, %v1522_v14  ;;  %v2279_v4 = vld [vmem:[%s5013_s22 + $0x170] sm:$0xff] }
 0x21e   : > { %3595 = vmatprep.mubr.msk.bf16.mxu0 %vm432_vm0, %v2307_v46  ;;  %v2282_v46 = vld [vmem:[%s5013_s22 + $0x188] sm:$0xff]  ;;  %v2320_v14 = vpack.c.bf16 %v2280_v54, %v2279_v4 }
 0x21f   : > { %v2321_v56 = vpack.c.bf16 %v2282_v46, %v2281_v28 }
 0x223   : > { %3496 = vmatmul.mubr.msk.bf16.gmra.mxu1 %vm1524_vm3, %v1279_v20  ;;  %v2310_v20 = vpack.c.bf16 %v2260_v43, %v2259_v18  ;;  %v2287_v18 = vld [vmem:[%s5013_s22 + $0x1b0] sm:$0xff]  ;;  %v2288_v43 = vld [vmem:[%s5013_s22 + $0x1b8] sm:$0xff] }
 0x224   : > { %3499 = vmatprep.mubr.msk.bf16.mxu1 %vm1524_vm3, %v1280_v32  ;;  %3542 = vmatpush3.bf16.xpose.msra.mxu1 %v2003_v63  ;;  %v2264_v32 = vld [vmem:[%s5013_s22 + $0xf8] sm:$0xff]  ;;  %v5995_v63 = vpack.c.bf16 %v5225_v61, %v5218_v60  ;;  %v2325_v60 = vpack.c.bf16 %v2290_v27, %v2289_v51  ;;  %v5997_v61 = vpack.c.bf16 %v5175_v9, %v5168_v31 }
 0x225   : > { %3596 = vmatmul.mubr.msk.bf16.gmra.mxu0 %vm432_vm0, %v2308_v29  ;;  %3669 = vmatprep.subr.msk.bf16.mxu1 %vm1524_vm3, %v5139_v13  ;;  %v2313_v13 = vpack.c.bf16 %v2266_v26, %v2265_v40  ;;  %v2322_v29 = vpack.c.bf16 %v2284_v17, %v2283_v0  ;;  %v5999_v9 = vpack.c.bf16 %v5125_v53, %v5118_v30  ;;  %v2296_v40 = vld [vmem:[%s5013_s22 + $0x1f8] sm:$0xff] }
 0x226   : > { %3599 = vmatprep.mubr.msk.bf16.mxu0 %vm432_vm0, %v2309_v5  ;;  %v2323_v5 = vpack.c.bf16 %v2286_v62, %v2285_v34  ;;  %v2730_v62 = vlaneseq }
 0x22b   : > { %3500 = vmatmul.mubr.msk.bf16.gmra.mxu1 %vm1524_vm3, %v1281_v45  ;;  %v2312_v45 = vpack.c.bf16 %v2264_v32, %v2263_v35  ;;  %v2294_v35 = vld [vmem:[%s5013_s22 + $0x1e8] sm:$0xff] }
 0x22c   : > { %3503 = vmatprep.mubr.msk.bf16.mxu1 %vm1524_vm3, %v1282_v41  ;;  %3544 = vmatpush3.bf16.xpose.msra.mxu1 %v2000_v37  ;;  %v2268_v41 = vld [vmem:[%s5013_s22 + $0x118] sm:$0xff]  ;;  %v2293_v37 = vld [vmem:[%s5013_s22 + $0x1e0] sm:$0xff] }
 0x22d   : > { %3600 = vmatmul.mubr.msk.bf16.gmra.mxu0 %vm432_vm0, %v2310_v20  ;;  %3670 = vmatprep.subr.msk.bf16.mxu1 %vm1524_vm3, %v5163_v19  ;;  %v2315_v19 = vpack.c.bf16 %v2270_v52, %v2269_v1  ;;  %v2324_v20 = vpack.c.bf16 %v2288_v43, %v2287_v18  ;;  %v2327_v31 = vpack.c.bf16 %v2294_v35, %v2293_v37 }
 0x22e   : > { %3603 = vmatprep.mubr.msk.bf16.mxu0 %vm432_vm0, %v2311_v16  ;;  %v2292_v16 = vld [vmem:[%s5013_s22 + $0x1d8] sm:$0xff] }
 0x233   : > { %3504 = vmatmul.mubr.msk.bf16.gmra.mxu1 %vm1524_vm3, %v1283_v24  ;;  %v2314_v24 = vpack.c.bf16 %v2268_v41, %v2267_v38 }
 0x234   : > { %3546 = vmatpush3.bf16.xpose.msra.mxu1 %v1997_v47  ;;  %3555 = vmatprep.mubr.msk.bf16.mxu1 %vm1524_vm3, %v1292_v2  ;;  %v2272_v2 = vld [vmem:[%s5013_s22 + $0x138] sm:$0xff] }
 0x235   : > { %3604 = vmatmul.mubr.msk.bf16.gmra.mxu0 %vm432_vm0, %v2312_v45  ;;  %3671 = vmatprep.subr.msk.bf16.mxu1 %vm1524_vm3, %v5189_v11  ;;  %v2316_v3 = vpack.c.bf16 %v2272_v2, %v2271_v59  ;;  %v1991_v11 = vsel %vm1524_vm3, %v5213_v15, 0  ;;  %v6001_v45 = vpack.c.bf16 %v5073_v23, %v5062_v33 }
 0x236   : > { %3607 = vmatprep.mubr.msk.bf16.mxu0 %vm432_vm0, %v2313_v13 }
 0x23c   : > { %3548 = vmatpush3.bf16.xpose.msra.mxu1 %v1994_v25 }
 0x23d   : > { %3608 = vmatmul.mubr.msk.bf16.gmra.mxu0 %vm432_vm0, %v2314_v24  ;;  %3672 = vmatprep.subr.msk.bf16.mxu1 %vm1524_vm3, %v5213_v15  ;;  %v1988_v15 = vsel %vm1524_vm3, %v5239_v21, 0 }
 0x23e   : > { %3611 = vmatprep.mubr.msk.bf16.mxu0 %vm432_vm0, %v2315_v19 }
 0x244   : > { %3550 = vmatpush3.bf16.xpose.msra.mxu1 %v1991_v11 }
 0x245   : > { %3612 = vmatmul.mubr.msk.bf16.gmra.mxu0 %vm432_vm0, %v2316_v3  ;;  %3673 = vmatprep.subr.msk.bf16.mxu1 %vm1524_vm3, %v5239_v21  ;;  %v1985_v21 = vsel %vm1524_vm3, %v5261_v36, 0 }
 0x246   : > { %3615 = vmatprep.mubr.msk.bf16.mxu0 %vm432_vm0, %v2317_v8 }
 0x24c   : > { %3552 = vmatpush3.bf16.xpose.msra.mxu1 %v1988_v15 }
 0x24d   : > { %3616 = vmatmul.mubr.msk.bf16.gmra.mxu0 %vm432_vm0, %v2318_v6  ;;  %3674 = vmatprep.subr.msk.bf16.mxu1 %vm1524_vm3, %v5261_v36  ;;  %v5996_v36 = vpack.c.bf16 %v5205_v50, %v5198_v44  ;;  %v5998_v44 = vpack.c.bf16 %v5155_v49, %v5148_v39  ;;  %v2291_v50 = vld [vmem:[%s5013_s22 + $0x1d0] sm:$0xff]  ;;  %v6000_v39 = vpack.c.bf16 %v5109_v7, %v5101_v58 }
 0x24e   : > { %3619 = vmatprep.mubr.msk.bf16.mxu0 %vm432_vm0, %v2319_v48  ;;  %v2326_v32 = vpack.c.bf16 %v2292_v16, %v2291_v50  ;;  %v2295_v49 = vld [vmem:[%s5013_s22 + $0x1f0] sm:$0xff]  ;;  %s2983_s22 = sshll.u32 %s5437_s26, 4  ;;  %s5827_s22 = int_to_ptr.vmem [resolvable:$true] %s2983_s22 }
 0x24f   : > { %v2328_v26 = vpack.c.bf16 %v2296_v40, %v2295_v49  ;;  %v5471_v49 = vstv %s2748_s27  ;;  %s5825_s27 = scalar_lea.hbm %s5881_s6, %s3242_s19  ;;  %s3733_s10 = scalar_lea.vmem %s5827_s22, 8192 }
 0x250   : > { %p3734_p2 = scmp.ne.s32.totalorder %s5827_s22, %s3733_s10 }
 0x252   : > { %p3735_p3 = pnand %p3734_p2, %p3882_p10 }
 0x254   : > { %3554 = vmatpush3.bf16.xpose.msra.mxu1 %v1985_v21  ;;  %p3736_p4 = pneg %p3735_p3 }
 0x255   : > { %3620 = vmatmul.mubr.msk.bf16.gmra.mxu0 %vm432_vm0, %v2320_v14 }
 0x256   : > { %3623 = vmatprep.mubr.msk.bf16.mxu0 %vm432_vm0, %v2321_v56 }
 0x25b   : > { %3556 = vmatmul.mubr.msk.bf16.vlgmr.msra.gmra.mxu1 %vm1524_vm3, %v5995_v63 }
 0x25c   : > { %3559 = vmatprep.mubr.msk.bf16.mxu1 %vm1524_vm3, %v5996_v36 }
 0x25d   : > { %3624 = vmatmul.mubr.msk.bf16.gmra.mxu0 %vm432_vm0, %v2322_v29 }
 0x25e   : > { %3627 = vmatprep.mubr.msk.bf16.mxu0 %vm432_vm0, %v2323_v5 }
 0x263   : > { %3560 = vmatmul.mubr.msk.bf16.gmra.mxu1 %vm1524_vm3, %v5997_v61 }
 0x264   : > { %3563 = vmatprep.mubr.msk.bf16.mxu1 %vm1524_vm3, %v5998_v44 }
 0x265   : > { %3628 = vmatmul.mubr.msk.bf16.gmra.mxu0 %vm432_vm0, %v2324_v20  ;;  %v5461_v20 = vshrl.u32 %v2730_v62, 7 }
 0x266   : > { %3631 = vmatprep.mubr.msk.bf16.mxu0 %vm432_vm0, %v2325_v60 }
 0x267   : > { %vm2750_vm6 = vcmp.lt.s32.totalorder %v5461_v20, %v5471_v49  ;;  %v5571_v62 = vadd.s32 120, %v5461_v20 }
 0x26b   : > { %3564 = vmatmul.mubr.msk.bf16.gmra.mxu1 %vm1524_vm3, %v5999_v9 }
 0x26c   : > { %3567 = vmatprep.mubr.msk.bf16.mxu1 %vm1524_vm3, %v6000_v39 }
 0x26d   : > { %3632 = vmatmul.mubr.msk.bf16.gmra.mxu0 %vm432_vm0, %v2326_v32 }
 0x26e   : > { %3635 = vmatprep.mubr.msk.bf16.mxu0 %vm432_vm0, %v2327_v31  ;;  %v5468_v31 = vadd.s32 16, %v5461_v20 }
 0x270   : > { %vm2752_vm4 = vcmp.lt.s32.totalorder %v5468_v31, %v5471_v49 }
 0x273   : > { %3568 = vmatmul.mubr.msk.bf16.gmra.mxu1 %vm1524_vm3, %v6001_v45  ;;  %vm2765_vm3 = vcmp.lt.s32.totalorder %v5571_v62, %v5471_v49 }
 0x275   : > { %3636 = vmatmul.mubr.msk.bf16.gmra.mxu0 %vm432_vm0, %v2328_v26 }
 0x29b   : > { %v3461_v30 = vpop.f32.mrf.mxu1 }
 0x29c   : > { %v2107_v53 = vmax.f32 %v3461_v30, 0.0 }
 0x29d   : > { %v3525_v58 = vpop.f32.mrf.mxu0  ;;  %v1607_v13 = vpop.f32.mrf.mxu1 }
 0x29e   : > { %v2139_v7 = vmax.f32 %v3525_v58, 0.0  ;;  %2171 = vst [vmem:[%s5437_s26 + $0x10] sm:$0xff] %v2107_v53  ;;  %v2105_v33 = vmax.f32 %v1607_v13, 0.0 }
 0x29f   : > { %v1897_v23 = vpop.f32.mrf.mxu0  ;;  %v3462_v38 = vpop.f32.mrf.mxu1 }
 0x2a0   : > { %2203 = vst [vmem:[%s5437_s26 + $0x110] sm:$0xff] %v2139_v7  ;;  %v2137_v47 = vmax.f32 %v1897_v23, 0.0  ;;  %2169 = vst [vmem:[%s5437_s26] sm:$0xff] %v2105_v33  ;;  %v2108_v41 = vmax.f32 %v3462_v38, 0.0  ;;  %v5479_v7 = vadd.s32 24, %v5461_v20  ;;  %v5492_v23 = vadd.s32 8, %v5461_v20 }
 0x2a1   : > { %v3526_v1 = vpop.f32.mrf.mxu0  ;;  %v1610_v24 = vpop.f32.mrf.mxu1 }
 0x2a2   : > { %2201 = vst [vmem:[%s5437_s26 + $0x100] sm:$0xff] %v2137_v47  ;;  %v2140_v52 = vmax.f32 %v3526_v1, 0.0  ;;  %2172 = vst [vmem:[%s5437_s26 + $0x18] sm:$0xff] %v2108_v41  ;;  %v2106_v19 = vmax.f32 %v1610_v24, 0.0  ;;  %vm2753_vm7 = vcmp.lt.s32.totalorder %v5479_v7, %v5471_v49  ;;  %v5500_v41 = vadd.s32 48, %v5461_v20 }
 0x2a3   : > { %v1900_v25 = vpop.f32.mrf.mxu0  ;;  %v3465_v2 = vpop.f32.mrf.mxu1  ;;  %vm2751_vm8 = vcmp.lt.s32.totalorder %v5492_v23, %v5471_v49  ;;  %v5507_v24 = vadd.s32 32, %v5461_v20 }
 0x2a4   : > { %2204 = vst [vmem:[%s5437_s26 + $0x118] sm:$0xff] %v2140_v52  ;;  %v2138_v59 = vmax.f32 %v1900_v25, 0.0  ;;  %2170 = vst [vmem:[%s5437_s26 + $0x8] sm:$0xff] %v2106_v19  ;;  %v2111_v42 = vmax.f32 %v3465_v2, 0.0  ;;  %vm2756_vm9 = vcmp.lt.s32.totalorder %v5500_v41, %v5471_v49 }
 0x2a5   : > { %v3529_v57 = vpop.f32.mrf.mxu0  ;;  %v1623_v8 = vpop.f32.mrf.mxu1  ;;  %vm2754_vm10 = vcmp.lt.s32.totalorder %v5507_v24, %v5471_v49 }
 0x2a6   : > { %2202 = vst [vmem:[%s5437_s26 + $0x108] sm:$0xff] %v2138_v59  ;;  %v2143_v3 = vmax.f32 %v3529_v57, 0.0  ;;  %2175 = vst [vmem:[%s5437_s26 + $0x30] sm:$0xff] %v2111_v42  ;;  %v2109_v11 = vmax.f32 %v1623_v8, 0.0  ;;  %v5514_v59 = vadd.s32 56, %v5461_v20  ;;  %v5521_v57 = vadd.s32 40, %v5461_v20 }
 0x2a7   : > { %v1913_v12 = vpop.f32.mrf.mxu0  ;;  %v3466_v22 = vpop.f32.mrf.mxu1 }
 0x2a8   : > { %2207 = vst [vmem:[%s5437_s26 + $0x130] sm:$0xff] %v2143_v3  ;;  %v2141_v55 = vmax.f32 %v1913_v12, 0.0  ;;  %2173 = vst [vmem:[%s5437_s26 + $0x20] sm:$0xff] %v2109_v11  ;;  %v2112_v10 = vmax.f32 %v3466_v22, 0.0  ;;  %vm2757_vm11 = vcmp.lt.s32.totalorder %v5514_v59, %v5471_v49  ;;  %v5528_v11 = vadd.s32 80, %v5461_v20 }
 0x2a9   : > { %v3530_v6 = vpop.f32.mrf.mxu0  ;;  %v1626_v15 = vpop.f32.mrf.mxu1  ;;  %vm2755_vm12 = vcmp.lt.s32.totalorder %v5521_v57, %v5471_v49  ;;  %v5535_v22 = vadd.s32 64, %v5461_v20 }
 0x2aa   : > { %2205 = vst [vmem:[%s5437_s26 + $0x120] sm:$0xff] %v2141_v55  ;;  %v2144_v48 = vmax.f32 %v3530_v6, 0.0  ;;  %2176 = vst [vmem:[%s5437_s26 + $0x38] sm:$0xff] %v2112_v10  ;;  %v2110_v4 = vmax.f32 %v1626_v15, 0.0  ;;  %vm2760_vm13 = vcmp.lt.s32.totalorder %v5528_v11, %v5471_v49 }
 0x2ab   : > { %v1916_v54 = vpop.f32.mrf.mxu0  ;;  %v3469_v46 = vpop.f32.mrf.mxu1  ;;  %vm2758_vm14 = vcmp.lt.s32.totalorder %v5535_v22, %v5471_v49 }
 0x2ac   : > { %2208 = vst [vmem:[%s5437_s26 + $0x138] sm:$0xff] %v2144_v48  ;;  %v2142_v28 = vmax.f32 %v1916_v54, 0.0  ;;  %2174 = vst [vmem:[%s5437_s26 + $0x28] sm:$0xff] %v2110_v4  ;;  %v2115_v14 = vmax.f32 %v3469_v46, 0.0  ;;  %v5542_v48 = vadd.s32 88, %v5461_v20  ;;  %v5549_v54 = vadd.s32 72, %v5461_v20 }
 0x2ad   : > { %v3533_v56 = vpop.f32.mrf.mxu0  ;;  %v1639_v0 = vpop.f32.mrf.mxu1 }
 0x2ae   : > { %2206 = vst [vmem:[%s5437_s26 + $0x128] sm:$0xff] %v2142_v28  ;;  %v2147_v21 = vmax.f32 %v3533_v56, 0.0  ;;  %2179 = vst [vmem:[%s5437_s26 + $0x50] sm:$0xff] %v2115_v14  ;;  %v2113_v17 = vmax.f32 %v1639_v0, 0.0  ;;  %vm2761_vm15 = vcmp.lt.s32.totalorder %v5542_v48, %v5471_v49  ;;  %v5557_v14 = vadd.s32 112, %v5461_v20 }
 0x2af   : > { %v1929_v34 = vpop.f32.mrf.mxu0  ;;  %v3470_v5 = vpop.f32.mrf.mxu1  ;;  %vm2759_vm0 = vcmp.lt.s32.totalorder %v5549_v54, %v5471_v49  ;;  %v5564_v0 = vadd.s32 96, %v5461_v20 }
 0x2b0   : > { %2211 = vst [vmem:[%s5437_s26 + $0x150] sm:$0xff] %v2147_v21  ;;  %v2145_v29 = vmax.f32 %v1929_v34, 0.0  ;;  %2177 = vst [vmem:[%s5437_s26 + $0x40] sm:$0xff] %v2113_v17  ;;  %v2116_v63 = vmax.f32 %v3470_v5, 0.0  ;;  %vm2764_vm1 = vcmp.lt.s32.totalorder %v5557_v14, %v5471_v49 }
 0x2b1   : > { %v3534_v36 = vpop.f32.mrf.mxu0  ;;  %v1642_v43 = vpop.f32.mrf.mxu1  ;;  %vm2762_vm2 = vcmp.lt.s32.totalorder %v5564_v0, %v5471_v49 }
 0x2b2   : > { %2209 = vst [vmem:[%s5437_s26 + $0x140] sm:$0xff] %v2145_v29  ;;  %v2148_v18 = vmax.f32 %v3534_v36, 0.0  ;;  %2180 = vst [vmem:[%s5437_s26 + $0x58] sm:$0xff] %v2116_v63  ;;  %v2114_v51 = vmax.f32 %v1642_v43, 0.0  ;;  %v5578_v63 = vadd.s32 104, %v5461_v20 }
 0x2b3   : > { %v1932_v27 = vpop.f32.mrf.mxu0  ;;  %v3473_v61 = vpop.f32.mrf.mxu1 }
 0x2b4   : > { %2212 = vst [vmem:[%s5437_s26 + $0x158] sm:$0xff] %v2148_v18  ;;  %v2146_v60 = vmax.f32 %v1932_v27, 0.0  ;;  %2178 = vst [vmem:[%s5437_s26 + $0x48] sm:$0xff] %v2114_v51  ;;  %v2119_v44 = vmax.f32 %v3473_v61, 0.0  ;;  %v5584_v51 = vstv %s2783_s13  ;;  %s3737_s13 = sshll.u32 %s3798_s23, 4  ;;  %s3738_s13 = int_to_ptr.vmem [resolvable:$false] %s3737_s13 }
 0x2b5   : > { %v3537_v50 = vpop.f32.mrf.mxu0  ;;  %v1655_v37 = vpop.f32.mrf.mxu1  ;;  %s3739_s17 = scalar_lea.vmem %s3738_s13, 16384  ;;  %p3740_p5 = scmp.lt.s32.totalorder %s5827_s22, %s3738_s13 }
 0x2b6   : > { %2210 = vst [vmem:[%s5437_s26 + $0x148] sm:$0xff] %v2146_v60  ;;  %v2151_v16 = vmax.f32 %v3537_v50, 0.0  ;;  %2183 = vst [vmem:[%s5437_s26 + $0x70] sm:$0xff] %v2119_v44  ;;  %v2117_v35 = vmax.f32 %v1655_v37, 0.0  ;;  %p3741_p6 = scmp.lt.s32.totalorder %s3739_s17, %s3733_s10 }
 0x2b7   : > { %v1945_v32 = vpop.f32.mrf.mxu0  ;;  %v3474_v39 = vpop.f32.mrf.mxu1 }
 0x2b8   : > { %2215 = vst [vmem:[%s5437_s26 + $0x170] sm:$0xff] %v2151_v16  ;;  %v2149_v9 = vmax.f32 %v1945_v32, 0.0  ;;  %2181 = vst [vmem:[%s5437_s26 + $0x60] sm:$0xff] %v2117_v35  ;;  %v2120_v40 = vmax.f32 %v3474_v39, 0.0  ;;  %p3742_p7 = por %p3741_p6, %p3740_p5 }
 0x2b9   : > { %v3538_v26 = vpop.f32.mrf.mxu0  ;;  %v1658_v30 = vpop.f32.mrf.mxu1 }
 0x2ba   : > { %2213 = vst [vmem:[%s5437_s26 + $0x160] sm:$0xff] %v2149_v9  ;;  %v2152_v45 = vmax.f32 %v3538_v26, 0.0  ;;  %2184 = vst [vmem:[%s5437_s26 + $0x78] sm:$0xff] %v2120_v40  ;;  %v2118_v53 = vmax.f32 %v1658_v30, 0.0  ;;  %p3743_p8 = pnand %p3742_p7, %p3736_p4 }
 0x2bb   : > { %v1948_v58 = vpop.f32.mrf.mxu0 }
 0x2bc   : > { %2216 = vst [vmem:[%s5437_s26 + $0x178] sm:$0xff] %v2152_v45  ;;  %v2150_v13 = vmax.f32 %v1948_v58, 0.0  ;;  %2182 = vst [vmem:[%s5437_s26 + $0x68] sm:$0xff] %v2118_v53 }
 0x2bd   : > { %v3577_v33 = vpop.f32.mrf.mxu0 }
 0x2be   : > { %2214 = vst [vmem:[%s5437_s26 + $0x168] sm:$0xff] %v2150_v13  ;;  %v2768_v47 = vsel %vm2752_vm4, %v3577_v33, -inf  ;;  %vm2763_vm4 = vcmp.lt.s32.totalorder %v5578_v63, %v5471_v49 }
 0x2bf   : > { %2890 = vst.msk [vmem:[%s5486_s12 + $0x10] sm:$0xff] %vm2887_vm5, %v2768_v47  ;;  %v2475_v38 = vpop.f32.mrf.mxu0 }
 0x2c0   : > { %v2766_v1 = vsel %vm2750_vm6, %v2475_v38, -inf  ;;  %vm2787_vm6 = vcmp.lt.s32.totalorder %v5468_v31, %v5584_v51 }
 0x2c1   : > { %2888 = vst.msk [vmem:[%s5486_s12] sm:$0xff] %vm2887_vm5, %v2766_v1  ;;  %v3578_v52 = vpop.f32.mrf.mxu0 }
 0x2c2   : > { %v2769_v19 = vsel %vm2753_vm7, %v3578_v52, -inf  ;;  %vm2785_vm7 = vcmp.lt.s32.totalorder %v5461_v20, %v5584_v51 }
 0x2c3   : > { %2891 = vst.msk [vmem:[%s5486_s12 + $0x18] sm:$0xff] %vm2887_vm5, %v2769_v19  ;;  %v2478_v25 = vpop.f32.mrf.mxu0 }
 0x2c4   : > { %v2767_v2 = vsel %vm2751_vm8, %v2478_v25, -inf  ;;  %vm2788_vm8 = vcmp.lt.s32.totalorder %v5479_v7, %v5584_v51 }
 0x2c5   : > { %2889 = vst.msk [vmem:[%s5486_s12 + $0x8] sm:$0xff] %vm2887_vm5, %v2767_v2  ;;  %v3581_v42 = vpop.f32.mrf.mxu0 }
 0x2c6   : > { %v2772_v3 = vsel %vm2756_vm9, %v3581_v42, -inf  ;;  %vm2786_vm9 = vcmp.lt.s32.totalorder %v5492_v23, %v5584_v51 }
 0x2c7   : > { %2894 = vst.msk [vmem:[%s5486_s12 + $0x30] sm:$0xff] %vm2887_vm5, %v2772_v3  ;;  %v2491_v8 = vpop.f32.mrf.mxu0 }
 0x2c8   : > { %v2770_v12 = vsel %vm2754_vm10, %v2491_v8, -inf  ;;  %vm2791_vm10 = vcmp.lt.s32.totalorder %v5500_v41, %v5584_v51 }
 0x2c9   : > { %2892 = vst.msk [vmem:[%s5486_s12 + $0x20] sm:$0xff] %vm2887_vm5, %v2770_v12  ;;  %v3582_v55 = vpop.f32.mrf.mxu0 }
 0x2ca   : > { %v2773_v10 = vsel %vm2757_vm11, %v3582_v55, -inf  ;;  %vm2789_vm11 = vcmp.lt.s32.totalorder %v5507_v24, %v5584_v51 }
 0x2cb   : > { %2895 = vst.msk [vmem:[%s5486_s12 + $0x38] sm:$0xff] %vm2887_vm5, %v2773_v10  ;;  %v2494_v6 = vpop.f32.mrf.mxu0 }
 0x2cc   : > { %v2771_v15 = vsel %vm2755_vm12, %v2494_v6, -inf  ;;  %vm2792_vm12 = vcmp.lt.s32.totalorder %v5514_v59, %v5584_v51 }
 0x2cd   : > { %2893 = vst.msk [vmem:[%s5486_s12 + $0x28] sm:$0xff] %vm2887_vm5, %v2771_v15  ;;  %v3585_v4 = vpop.f32.mrf.mxu0 }
 0x2ce   : > { %v2776_v28 = vsel %vm2760_vm13, %v3585_v4, -inf  ;;  %vm2790_vm13 = vcmp.lt.s32.totalorder %v5521_v57, %v5584_v51 }
 0x2cf   : > { %2898 = vst.msk [vmem:[%s5486_s12 + $0x50] sm:$0xff] %vm2887_vm5, %v2776_v28  ;;  %v2507_v46 = vpop.f32.mrf.mxu0 }
 0x2d0   : > { %v2774_v56 = vsel %vm2758_vm14, %v2507_v46, -inf  ;;  %vm2795_vm14 = vcmp.lt.s32.totalorder %v5528_v11, %v5584_v51 }
 0x2d1   : > { %2896 = vst.msk [vmem:[%s5486_s12 + $0x40] sm:$0xff] %vm2887_vm5, %v2774_v56  ;;  %v3586_v21 = vpop.f32.mrf.mxu0 }
 0x2d2   : > { %v2777_v17 = vsel %vm2761_vm15, %v3586_v21, -inf  ;;  %vm2793_vm15 = vcmp.lt.s32.totalorder %v5535_v22, %v5584_v51 }
 0x2d3   : > { %2899 = vst.msk [vmem:[%s5486_s12 + $0x58] sm:$0xff] %vm2887_vm5, %v2777_v17  ;;  %v2510_v34 = vpop.f32.mrf.mxu0 }
 0x2d4   : > { %v2775_v29 = vsel %vm2759_vm0, %v2510_v34, -inf  ;;  %vm2796_vm0 = vcmp.lt.s32.totalorder %v5542_v48, %v5584_v51 }
 0x2d5   : > { %2897 = vst.msk [vmem:[%s5486_s12 + $0x48] sm:$0xff] %vm2887_vm5, %v2775_v29  ;;  %v3589_v5 = vpop.f32.mrf.mxu0 }
 0x2d6   : > { %v2780_v36 = vsel %vm2764_vm1, %v3589_v5, -inf  ;;  %vm2794_vm1 = vcmp.lt.s32.totalorder %v5549_v54, %v5584_v51 }
 0x2d7   : > { %2902 = vst.msk [vmem:[%s5486_s12 + $0x70] sm:$0xff] %vm2887_vm5, %v2780_v36  ;;  %v2523_v18 = vpop.f32.mrf.mxu0 }
 0x2d8   : > { %v2778_v43 = vsel %vm2762_vm2, %v2523_v18, -inf  ;;  %vm2799_vm2 = vcmp.lt.s32.totalorder %v5557_v14, %v5584_v51 }
 0x2d9   : > { %2900 = vst.msk [vmem:[%s5486_s12 + $0x60] sm:$0xff] %vm2887_vm5, %v2778_v43  ;;  %v3590_v27 = vpop.f32.mrf.mxu0 }
 0x2da   : > { %v2781_v60 = vsel %vm2765_vm3, %v3590_v27, -inf  ;;  %vm2797_vm3 = vcmp.lt.s32.totalorder %v5564_v0, %v5584_v51 }
 0x2db   : > { %2903 = vst.msk [vmem:[%s5486_s12 + $0x78] sm:$0xff] %vm2887_vm5, %v2781_v60  ;;  %v2526_v61 = vpop.f32.mrf.mxu0  ;;  %v3493_v50 = vpop.f32.mrf.mxu1 }
 0x2dc   : > { %v2779_v44 = vsel %vm2763_vm4, %v2526_v61, -inf  ;;  %v2123_v37 = vmax.f32 %v3493_v50, 0.0  ;;  %vm2800_vm4 = vcmp.lt.s32.totalorder %v5571_v62, %v5584_v51 }
 0x2dd   : > { %2901 = vst.msk [vmem:[%s5486_s12 + $0x68] sm:$0xff] %vm2887_vm5, %v2779_v44  ;;  %v3593_v16 = vpop.f32.mrf.mxu0  ;;  %v1752_v32 = vpop.f32.mrf.mxu1 }
 0x2de   : > { %v2803_v35 = vsel %vm2787_vm6, %v3593_v16, -inf  ;;  %2187 = vst [vmem:[%s5437_s26 + $0x90] sm:$0xff] %v2123_v37  ;;  %v2121_v39 = vmax.f32 %v1752_v32, 0.0  ;;  %vm2798_vm6 = vcmp.lt.s32.totalorder %v5578_v63, %v5584_v51 }
 0x2df   : > { %2906 = vst.msk [vmem:[%s5486_s12 + $0x90] sm:$0xff] %vm2887_vm5, %v2803_v35  ;;  %v2539_v9 = vpop.f32.mrf.mxu0  ;;  %v3494_v40 = vpop.f32.mrf.mxu1 }
 0x2e0   : > { %v2801_v49 = vsel %vm2785_vm7, %v2539_v9, -inf  ;;  %2185 = vst [vmem:[%s5437_s26 + $0x80] sm:$0xff] %v2121_v39  ;;  %v2124_v45 = vmax.f32 %v3494_v40, 0.0 }
 0x2e1   : > { %2904 = vst.msk [vmem:[%s5486_s12 + $0x80] sm:$0xff] %vm2887_vm5, %v2801_v49  ;;  %v3594_v26 = vpop.f32.mrf.mxu0  ;;  %v1755_v53 = vpop.f32.mrf.mxu1 }
 0x2e2   : > { %v2804_v30 = vsel %vm2788_vm8, %v3594_v26, -inf  ;;  %2188 = vst [vmem:[%s5437_s26 + $0x98] sm:$0xff] %v2124_v45  ;;  %v2122_v13 = vmax.f32 %v1755_v53, 0.0  ;;  %v5664_v26 = vstv %s2818_s18 }
 0x2e3   : > { %2907 = vst.msk [vmem:[%s5486_s12 + $0x98] sm:$0xff] %vm2887_vm5, %v2804_v30  ;;  %v2542_v58 = vpop.f32.mrf.mxu0  ;;  %v3497_v47 = vpop.f32.mrf.mxu1  ;;  %vm2822_vm7 = vcmp.lt.s32.totalorder %v5468_v31, %v5664_v26  ;;  %vm2820_vm8 = vcmp.lt.s32.totalorder %v5461_v20, %v5664_v26 }
 0x2e4   : > { %v2802_v33 = vsel %vm2786_vm9, %v2542_v58, -inf  ;;  %2186 = vst [vmem:[%s5437_s26 + $0x88] sm:$0xff] %v2122_v13  ;;  %v2127_v1 = vmax.f32 %v3497_v47, 0.0  ;;  %vm2823_vm9 = vcmp.lt.s32.totalorder %v5479_v7, %v5664_v26 }
 0x2e5   : > { %2905 = vst.msk [vmem:[%s5486_s12 + $0x88] sm:$0xff] %vm2887_vm5, %v2802_v33  ;;  %v3597_v38 = vpop.f32.mrf.mxu0  ;;  %v1768_v19 = vpop.f32.mrf.mxu1 }
 0x2e6   : > { %v2807_v52 = vsel %vm2791_vm10, %v3597_v38, -inf  ;;  %2191 = vst [vmem:[%s5437_s26 + $0xb0] sm:$0xff] %v2127_v1  ;;  %v2125_v2 = vmax.f32 %v1768_v19, 0.0  ;;  %vm2821_vm10 = vcmp.lt.s32.totalorder %v5492_v23, %v5664_v26 }
 0x2e7   : > { %2910 = vst.msk [vmem:[%s5486_s12 + $0xb0] sm:$0xff] %vm2887_vm5, %v2807_v52  ;;  %v2555_v25 = vpop.f32.mrf.mxu0  ;;  %v3498_v3 = vpop.f32.mrf.mxu1 }
 0x2e8   : > { %v2805_v42 = vsel %vm2789_vm11, %v2555_v25, -inf  ;;  %2189 = vst [vmem:[%s5437_s26 + $0xa0] sm:$0xff] %v2125_v2  ;;  %v2128_v12 = vmax.f32 %v3498_v3, 0.0  ;;  %vm2826_vm11 = vcmp.lt.s32.totalorder %v5500_v41, %v5664_v26 }
 0x2e9   : > { %2908 = vst.msk [vmem:[%s5486_s12 + $0xa0] sm:$0xff] %vm2887_vm5, %v2805_v42  ;;  %v3598_v8 = vpop.f32.mrf.mxu0  ;;  %v1771_v10 = vpop.f32.mrf.mxu1 }
 0x2ea   : > { %v2808_v55 = vsel %vm2792_vm12, %v3598_v8, -inf  ;;  %2192 = vst [vmem:[%s5437_s26 + $0xb8] sm:$0xff] %v2128_v12  ;;  %v2126_v15 = vmax.f32 %v1771_v10, 0.0  ;;  %vm2824_vm12 = vcmp.lt.s32.totalorder %v5507_v24, %v5664_v26 }
 0x2eb   : > { %2911 = vst.msk [vmem:[%s5486_s12 + $0xb8] sm:$0xff] %vm2887_vm5, %v2808_v55  ;;  %v2558_v6 = vpop.f32.mrf.mxu0  ;;  %v3501_v28 = vpop.f32.mrf.mxu1 }
 0x2ec   : > { %v2806_v4 = vsel %vm2790_vm13, %v2558_v6, -inf  ;;  %2190 = vst [vmem:[%s5437_s26 + $0xa8] sm:$0xff] %v2126_v15  ;;  %v2131_v56 = vmax.f32 %v3501_v28, 0.0  ;;  %vm2827_vm13 = vcmp.lt.s32.totalorder %v5514_v59, %v5664_v26 }
 0x2ed   : > { %2909 = vst.msk [vmem:[%s5486_s12 + $0xa8] sm:$0xff] %vm2887_vm5, %v2806_v4  ;;  %v3601_v46 = vpop.f32.mrf.mxu0  ;;  %v1784_v17 = vpop.f32.mrf.mxu1 }
 0x2ee   : > { %v2811_v21 = vsel %vm2795_vm14, %v3601_v46, -inf  ;;  %2195 = vst [vmem:[%s5437_s26 + $0xd0] sm:$0xff] %v2131_v56  ;;  %v2129_v29 = vmax.f32 %v1784_v17, 0.0  ;;  %vm2825_vm14 = vcmp.lt.s32.totalorder %v5521_v57, %v5664_v26 }
 0x2ef   : > { %2914 = vst.msk [vmem:[%s5486_s12 + $0xd0] sm:$0xff] %vm2887_vm5, %v2811_v21  ;;  %v2571_v34 = vpop.f32.mrf.mxu0  ;;  %v3502_v36 = vpop.f32.mrf.mxu1 }
 0x2f0   : > { %v2809_v5 = vsel %vm2793_vm15, %v2571_v34, -inf  ;;  %2193 = vst [vmem:[%s5437_s26 + $0xc0] sm:$0xff] %v2129_v29  ;;  %v2132_v43 = vmax.f32 %v3502_v36, 0.0  ;;  %vm2830_vm15 = vcmp.lt.s32.totalorder %v5528_v11, %v5664_v26 }
 0x2f1   : > { %2912 = vst.msk [vmem:[%s5486_s12 + $0xc0] sm:$0xff] %vm2887_vm5, %v2809_v5  ;;  %v3602_v18 = vpop.f32.mrf.mxu0  ;;  %v1787_v60 = vpop.f32.mrf.mxu1 }
 0x2f2   : > { %v2812_v27 = vsel %vm2796_vm0, %v3602_v18, -inf  ;;  %2196 = vst [vmem:[%s5437_s26 + $0xd8] sm:$0xff] %v2132_v43  ;;  %v2130_v44 = vmax.f32 %v1787_v60, 0.0  ;;  %vm2828_vm0 = vcmp.lt.s32.totalorder %v5535_v22, %v5664_v26 }
 0x2f3   : > { %2915 = vst.msk [vmem:[%s5486_s12 + $0xd8] sm:$0xff] %vm2887_vm5, %v2812_v27  ;;  %v2574_v61 = vpop.f32.mrf.mxu0  ;;  %v3505_v16 = vpop.f32.mrf.mxu1 }
 0x2f4   : > { %v2810_v50 = vsel %vm2794_vm1, %v2574_v61, -inf  ;;  %2194 = vst [vmem:[%s5437_s26 + $0xc8] sm:$0xff] %v2130_v44  ;;  %v2135_v35 = vmax.f32 %v3505_v16, 0.0  ;;  %vm2831_vm1 = vcmp.lt.s32.totalorder %v5542_v48, %v5664_v26  ;;  %v5734_v61 = vstv %s2853_s21 }
 0x2f5   : > { %2913 = vst.msk [vmem:[%s5486_s12 + $0xc8] sm:$0xff] %vm2887_vm5, %v2810_v50  ;;  %v3605_v37 = vpop.f32.mrf.mxu0  ;;  %v1800_v9 = vpop.f32.mrf.mxu1 }
 0x2f6   : > { %v2815_v32 = vsel %vm2799_vm2, %v3605_v37, -inf  ;;  %2199 = vst [vmem:[%s5437_s26 + $0xf0] sm:$0xff] %v2135_v35  ;;  %v2133_v49 = vmax.f32 %v1800_v9, 0.0  ;;  %vm2829_vm2 = vcmp.lt.s32.totalorder %v5549_v54, %v5664_v26 }
 0x2f7   : > { %2918 = vst.msk [vmem:[%s5486_s12 + $0xf0] sm:$0xff] %vm2887_vm5, %v2815_v32  ;;  %v2587_v39 = vpop.f32.mrf.mxu0  ;;  %v3506_v45 = vpop.f32.mrf.mxu1 }
 0x2f8   : > { %v2813_v40 = vsel %vm2797_vm3, %v2587_v39, -inf  ;;  %2197 = vst [vmem:[%s5437_s26 + $0xe0] sm:$0xff] %v2133_v49  ;;  %v2136_v53 = vmax.f32 %v3506_v45, 0.0  ;;  %vm2834_vm3 = vcmp.lt.s32.totalorder %v5557_v14, %v5664_v26 }
 0x2f9   : > { %2916 = vst.msk [vmem:[%s5486_s12 + $0xe0] sm:$0xff] %vm2887_vm5, %v2813_v40  ;;  %v3606_v30 = vpop.f32.mrf.mxu0  ;;  %v1803_v13 = vpop.f32.mrf.mxu1 }
 0x2fa   : > { %v2816_v58 = vsel %vm2800_vm4, %v3606_v30, -inf  ;;  %2200 = vst [vmem:[%s5437_s26 + $0xf8] sm:$0xff] %v2136_v53  ;;  %v2134_v47 = vmax.f32 %v1803_v13, 0.0  ;;  %vm2832_vm4 = vcmp.lt.s32.totalorder %v5564_v0, %v5664_v26 }
 0x2fb   : > { %2919 = vst.msk [vmem:[%s5486_s12 + $0xf8] sm:$0xff] %vm2887_vm5, %v2816_v58  ;;  %v2590_v33 = vpop.f32.mrf.mxu0 }
 0x2fc   : > { %v2814_v38 = vsel %vm2798_vm6, %v2590_v33, -inf  ;;  %2198 = vst [vmem:[%s5437_s26 + $0xe8] sm:$0xff] %v2134_v47  ;;  %vm2835_vm6 = vcmp.lt.s32.totalorder %v5571_v62, %v5664_v26 }
 0x2fd   : > { %2917 = vst.msk [vmem:[%s5486_s12 + $0xe8] sm:$0xff] %vm2887_vm5, %v2814_v38  ;;  %v3609_v1 = vpop.f32.mrf.mxu0 }
 0x2fe   : > { %v2838_v51 = vsel %vm2822_vm7, %v3609_v1, -inf  ;;  %vm2833_vm7 = vcmp.lt.s32.totalorder %v5578_v63, %v5664_v26 }
 0x2ff   : > { %2922 = vst.msk [vmem:[%s5486_s12 + $0x110] sm:$0xff] %vm2887_vm5, %v2838_v51  ;;  %v2603_v52 = vpop.f32.mrf.mxu0 }
 0x300   : > { %v2836_v19 = vsel %vm2820_vm8, %v2603_v52, -inf  ;;  %vm2857_vm8 = vcmp.lt.s32.totalorder %v5468_v31, %v5734_v61 }
 0x301   : > { %2920 = vst.msk [vmem:[%s5486_s12 + $0x100] sm:$0xff] %vm2887_vm5, %v2836_v19  ;;  %v3610_v25 = vpop.f32.mrf.mxu0 }
 0x302   : > { %v2839_v2 = vsel %vm2823_vm9, %v3610_v25, -inf  ;;  %vm2855_vm9 = vcmp.lt.s32.totalorder %v5461_v20, %v5734_v61 }
 0x303   : > { %2923 = vst.msk [vmem:[%s5486_s12 + $0x118] sm:$0xff] %vm2887_vm5, %v2839_v2  ;;  %v2606_v42 = vpop.f32.mrf.mxu0 }
 0x304   : > { %v2837_v3 = vsel %vm2821_vm10, %v2606_v42, -inf  ;;  %vm2858_vm10 = vcmp.lt.s32.totalorder %v5479_v7, %v5734_v61 }
 0x305   : > { %2921 = vst.msk [vmem:[%s5486_s12 + $0x108] sm:$0xff] %vm2887_vm5, %v2837_v3  ;;  %v3613_v8 = vpop.f32.mrf.mxu0 }
 0x306   : > { %v2842_v12 = vsel %vm2826_vm11, %v3613_v8, -inf  ;;  %vm2856_vm11 = vcmp.lt.s32.totalorder %v5492_v23, %v5734_v61 }
 0x307   : > { %2926 = vst.msk [vmem:[%s5486_s12 + $0x130] sm:$0xff] %vm2887_vm5, %v2842_v12  ;;  %v2619_v55 = vpop.f32.mrf.mxu0 }
 0x308   : > { %v2840_v10 = vsel %vm2824_vm12, %v2619_v55, -inf  ;;  %vm2861_vm12 = vcmp.lt.s32.totalorder %v5500_v41, %v5734_v61 }
 0x309   : > { %2924 = vst.msk [vmem:[%s5486_s12 + $0x120] sm:$0xff] %vm2887_vm5, %v2840_v10  ;;  %v3614_v6 = vpop.f32.mrf.mxu0 }
 0x30a   : > { %v2843_v15 = vsel %vm2827_vm13, %v3614_v6, -inf  ;;  %vm2859_vm13 = vcmp.lt.s32.totalorder %v5507_v24, %v5734_v61 }
 0x30b   : > { %2927 = vst.msk [vmem:[%s5486_s12 + $0x138] sm:$0xff] %vm2887_vm5, %v2843_v15  ;;  %v2622_v4 = vpop.f32.mrf.mxu0 }
 0x30c   : > { %v2841_v28 = vsel %vm2825_vm14, %v2622_v4, -inf  ;;  %vm2862_vm14 = vcmp.lt.s32.totalorder %v5514_v59, %v5734_v61 }
 0x30d   : > { %2925 = vst.msk [vmem:[%s5486_s12 + $0x128] sm:$0xff] %vm2887_vm5, %v2841_v28  ;;  %v3617_v46 = vpop.f32.mrf.mxu0 }
 0x30e   : > { %v2846_v56 = vsel %vm2830_vm15, %v3617_v46, -inf  ;;  %vm2860_vm15 = vcmp.lt.s32.totalorder %v5521_v57, %v5734_v61 }
 0x30f   : > { %2930 = vst.msk [vmem:[%s5486_s12 + $0x150] sm:$0xff] %vm2887_vm5, %v2846_v56  ;;  %v2635_v21 = vpop.f32.mrf.mxu0 }
 0x310   : > { %v2844_v17 = vsel %vm2828_vm0, %v2635_v21, -inf  ;;  %vm2865_vm0 = vcmp.lt.s32.totalorder %v5528_v11, %v5734_v61 }
 0x311   : > { %2928 = vst.msk [vmem:[%s5486_s12 + $0x140] sm:$0xff] %vm2887_vm5, %v2844_v17  ;;  %v3618_v34 = vpop.f32.mrf.mxu0 }
 0x312   : > { %v2847_v29 = vsel %vm2831_vm1, %v3618_v34, -inf  ;;  %vm2863_vm1 = vcmp.lt.s32.totalorder %v5535_v22, %v5734_v61 }
 0x313   : > { %2931 = vst.msk [vmem:[%s5486_s12 + $0x158] sm:$0xff] %vm2887_vm5, %v2847_v29  ;;  %v2638_v5 = vpop.f32.mrf.mxu0 }
 0x314   : > { %v2845_v36 = vsel %vm2829_vm2, %v2638_v5, -inf  ;;  %vm2866_vm2 = vcmp.lt.s32.totalorder %v5542_v48, %v5734_v61 }
 0x315   : > { %2929 = vst.msk [vmem:[%s5486_s12 + $0x148] sm:$0xff] %vm2887_vm5, %v2845_v36  ;;  %v3621_v18 = vpop.f32.mrf.mxu0 }
 0x316   : > { %v2850_v43 = vsel %vm2834_vm3, %v3621_v18, -inf  ;;  %vm2864_vm3 = vcmp.lt.s32.totalorder %v5549_v54, %v5734_v61 }
 0x317   : > { %2934 = vst.msk [vmem:[%s5486_s12 + $0x170] sm:$0xff] %vm2887_vm5, %v2850_v43  ;;  %v2651_v27 = vpop.f32.mrf.mxu0 }
 0x318   : > { %v2848_v60 = vsel %vm2832_vm4, %v2651_v27, -inf  ;;  %vm2869_vm4 = vcmp.lt.s32.totalorder %v5557_v14, %v5734_v61 }
 0x319   : > { %2932 = vst.msk [vmem:[%s5486_s12 + $0x160] sm:$0xff] %vm2887_vm5, %v2848_v60  ;;  %v3622_v44 = vpop.f32.mrf.mxu0 }
 0x31a   : > { %v2851_v50 = vsel %vm2835_vm6, %v3622_v44, -inf  ;;  %vm2867_vm6 = vcmp.lt.s32.totalorder %v5564_v0, %v5734_v61 }
 0x31b   : > { %2935 = vst.msk [vmem:[%s5486_s12 + $0x178] sm:$0xff] %vm2887_vm5, %v2851_v50  ;;  %v2654_v16 = vpop.f32.mrf.mxu0  ;;  %v3557_v35 = vpop.f32.mrf.mxu1 }
 0x31c   : > { %v2849_v37 = vsel %vm2833_vm7, %v2654_v16, -inf  ;;  %v2155_v9 = vmax.f32 %v3557_v35, 0.0  ;;  %vm2870_vm7 = vcmp.lt.s32.totalorder %v5571_v62, %v5734_v61 }
 0x31d   : > { %2933 = vst.msk [vmem:[%s5486_s12 + $0x168] sm:$0xff] %vm2887_vm5, %v2849_v37  ;;  %v3625_v32 = vpop.f32.mrf.mxu0  ;;  %v2042_v49 = vpop.f32.mrf.mxu1 }
 0x31e   : > { %v2873_v39 = vsel %vm2857_vm8, %v3625_v32, -inf  ;;  %2219 = vst [vmem:[%s5437_s26 + $0x190] sm:$0xff] %v2155_v9  ;;  %v2153_v31 = vmax.f32 %v2042_v49, 0.0  ;;  %vm2868_vm8 = vcmp.lt.s32.totalorder %v5578_v63, %v5734_v61 }
 0x31f   : > { %2938 = vst.msk [vmem:[%s5486_s12 + $0x190] sm:$0xff] %vm2887_vm5, %v2873_v39  ;;  %v2667_v40 = vpop.f32.mrf.mxu0  ;;  %v3558_v45 = vpop.f32.mrf.mxu1 }
 0x320   : > { %v2871_v26 = vsel %vm2855_vm9, %v2667_v40, -inf  ;;  %2217 = vst [vmem:[%s5437_s26 + $0x180] sm:$0xff] %v2153_v31  ;;  %v2156_v20 = vmax.f32 %v3558_v45, 0.0 }
 0x321   : > { %2936 = vst.msk [vmem:[%s5486_s12 + $0x180] sm:$0xff] %vm2887_vm5, %v2871_v26  ;;  %v3626_v30 = vpop.f32.mrf.mxu0  ;;  %v2045_v58 = vpop.f32.mrf.mxu1 }
 0x322   : > { %v2874_v53 = vsel %vm2858_vm10, %v3626_v30, -inf  ;;  %2220 = vst [vmem:[%s5437_s26 + $0x198] sm:$0xff] %v2156_v20  ;;  %v2154_v13 = vmax.f32 %v2045_v58, 0.0 }
 0x323   : > { %2939 = vst.msk [vmem:[%s5486_s12 + $0x198] sm:$0xff] %vm2887_vm5, %v2874_v53  ;;  %v2670_v7 = vpop.f32.mrf.mxu0  ;;  %v3561_v47 = vpop.f32.mrf.mxu1 }
 0x324   : > { %v2872_v33 = vsel %vm2856_vm11, %v2670_v7, -inf  ;;  %2218 = vst [vmem:[%s5437_s26 + $0x188] sm:$0xff] %v2154_v13  ;;  %v2159_v38 = vmax.f32 %v3561_v47, 0.0 }
 0x325   : > { %2937 = vst.msk [vmem:[%s5486_s12 + $0x188] sm:$0xff] %vm2887_vm5, %v2872_v33  ;;  %v3629_v23 = vpop.f32.mrf.mxu0  ;;  %v2058_v51 = vpop.f32.mrf.mxu1 }
 0x326   : > { %v2877_v1 = vsel %vm2861_vm12, %v3629_v23, -inf  ;;  %2223 = vst [vmem:[%s5437_s26 + $0x1b0] sm:$0xff] %v2159_v38  ;;  %v2157_v52 = vmax.f32 %v2058_v51, 0.0 }
 0x327   : > { %2942 = vst.msk [vmem:[%s5486_s12 + $0x1b0] sm:$0xff] %vm2887_vm5, %v2877_v1  ;;  %v2683_v41 = vpop.f32.mrf.mxu0  ;;  %v3562_v25 = vpop.f32.mrf.mxu1 }
 0x328   : > { %v2875_v19 = vsel %vm2859_vm13, %v2683_v41, -inf  ;;  %2221 = vst [vmem:[%s5437_s26 + $0x1a0] sm:$0xff] %v2157_v52  ;;  %v2160_v2 = vmax.f32 %v3562_v25, 0.0 }
 0x329   : > { %2940 = vst.msk [vmem:[%s5486_s12 + $0x1a0] sm:$0xff] %vm2887_vm5, %v2875_v19  ;;  %v3630_v24 = vpop.f32.mrf.mxu0  ;;  %v2061_v3 = vpop.f32.mrf.mxu1 }
 0x32a   : > { %v2878_v42 = vsel %vm2862_vm14, %v3630_v24, -inf  ;;  %2224 = vst [vmem:[%s5437_s26 + $0x1b8] sm:$0xff] %v2160_v2  ;;  %v2158_v8 = vmax.f32 %v2061_v3, 0.0 }
 0x32b   : > { %2943 = vst.msk [vmem:[%s5486_s12 + $0x1b8] sm:$0xff] %vm2887_vm5, %v2878_v42  ;;  %v2686_v59 = vpop.f32.mrf.mxu0  ;;  %v3565_v55 = vpop.f32.mrf.mxu1 }
 0x32c   : > { %v2876_v12 = vsel %vm2860_vm15, %v2686_v59, -inf  ;;  %2222 = vst [vmem:[%s5437_s26 + $0x1a8] sm:$0xff] %v2158_v8  ;;  %v2163_v10 = vmax.f32 %v3565_v55, 0.0 }
 0x32d   : > { %2941 = vst.msk [vmem:[%s5486_s12 + $0x1a8] sm:$0xff] %vm2887_vm5, %v2876_v12  ;;  %v3633_v57 = vpop.f32.mrf.mxu0  ;;  %v2074_v15 = vpop.f32.mrf.mxu1 }
 0x32e   : > { %v2881_v6 = vsel %vm2865_vm0, %v3633_v57, -inf  ;;  %2227 = vst [vmem:[%s5437_s26 + $0x1d0] sm:$0xff] %v2163_v10  ;;  %v2161_v4 = vmax.f32 %v2074_v15, 0.0 }
 0x32f   : > { %2946 = vst.msk [vmem:[%s5486_s12 + $0x1d0] sm:$0xff] %vm2887_vm5, %v2881_v6  ;;  %v2699_v11 = vpop.f32.mrf.mxu0  ;;  %v3566_v46 = vpop.f32.mrf.mxu1 }
 0x330   : > { %v2879_v28 = vsel %vm2863_vm1, %v2699_v11, -inf  ;;  %2225 = vst [vmem:[%s5437_s26 + $0x1c0] sm:$0xff] %v2161_v4  ;;  %v2164_v56 = vmax.f32 %v3566_v46, 0.0 }
 0x331   : > { %2944 = vst.msk [vmem:[%s5486_s12 + $0x1c0] sm:$0xff] %vm2887_vm5, %v2879_v28  ;;  %v3634_v22 = vpop.f32.mrf.mxu0  ;;  %v2077_v17 = vpop.f32.mrf.mxu1 }
 0x332   : > { %v2882_v21 = vsel %vm2866_vm2, %v3634_v22, -inf  ;;  %2228 = vst [vmem:[%s5437_s26 + $0x1d8] sm:$0xff] %v2164_v56  ;;  %v2162_v34 = vmax.f32 %v2077_v17, 0.0 }
 0x333   : > { %2947 = vst.msk [vmem:[%s5486_s12 + $0x1d8] sm:$0xff] %vm2887_vm5, %v2882_v21  ;;  %v2702_v48 = vpop.f32.mrf.mxu0  ;;  %v3569_v54 = vpop.f32.mrf.mxu1 }
 0x334   : > { %v2880_v29 = vsel %vm2864_vm3, %v2702_v48, -inf  ;;  %2226 = vst [vmem:[%s5437_s26 + $0x1c8] sm:$0xff] %v2162_v34  ;;  %v2167_v36 = vmax.f32 %v3569_v54, 0.0 }
 0x335   : > { %2945 = vst.msk [vmem:[%s5486_s12 + $0x1c8] sm:$0xff] %vm2887_vm5, %v2880_v29  ;;  %v3637_v5 = vpop.f32.mrf.mxu0  ;;  %v2090_v14 = vpop.f32.mrf.mxu1 }
 0x336   : > { %v2885_v18 = vsel %vm2869_vm4, %v3637_v5, -inf  ;;  %2231 = vst [vmem:[%s5437_s26 + $0x1f0] sm:$0xff] %v2167_v36  ;;  %v2165_v27 = vmax.f32 %v2090_v14, 0.0 }
 0x337   : > { %2950 = vst.msk [vmem:[%s5486_s12 + $0x1f0] sm:$0xff] %vm2887_vm5, %v2885_v18  ;;  %v2715_v43 = vpop.f32.mrf.mxu0  ;;  %v3570_v0 = vpop.f32.mrf.mxu1 }
 0x338   : > { %v2883_v60 = vsel %vm2867_vm6, %v2715_v43, -inf  ;;  %2229 = vst [vmem:[%s5437_s26 + $0x1e0] sm:$0xff] %v2165_v27  ;;  %v2168_v50 = vmax.f32 %v3570_v0, 0.0 }
 0x339   : > { %2948 = vst.msk [vmem:[%s5486_s12 + $0x1e0] sm:$0xff] %vm2887_vm5, %v2883_v60  ;;  %v3638_v44 = vpop.f32.mrf.mxu0  ;;  %v2093_v16 = vpop.f32.mrf.mxu1 }
 0x33a   : > { %v2886_v62 = vsel %vm2870_vm7, %v3638_v44, -inf  ;;  %2232 = vst [vmem:[%s5437_s26 + $0x1f8] sm:$0xff] %v2168_v50  ;;  %v2166_v63 = vmax.f32 %v2093_v16, 0.0 }
 0x33b   : > { %2951 = vst.msk [vmem:[%s5486_s12 + $0x1f8] sm:$0xff] %vm2887_vm5, %v2886_v62  ;;  %v2718_v37 = vpop.f32.mrf.mxu0 }
 0x33c   : > { %v2884_v61 = vsel %vm2868_vm8, %v2718_v37, -inf  ;;  %2230 = vst [vmem:[%s5437_s26 + $0x1e8] sm:$0xff] %v2166_v63 }
 0x33d   : > { %2949 = vst.msk [vmem:[%s5486_s12 + $0x1e8] sm:$0xff] %vm2887_vm5, %v2884_v61 }
 0x33e   : > { %3746 = shalt.err (!%p3743_p8)
}
 0x33f   : > { %s3747_s24 = scalar_lea.hbm %s5825_s27, 8192  ;;  %s3751_s18 = scalar_lea.hbm %s5881_s6, 16384 }
 0x340   : > { %p3748_p9 = scmp.ne.s32.totalorder %s5825_s27, %s3747_s24  ;;  %p3752_p0 = scmp.lt.s32.totalorder %s5825_s27, %s5881_s6 }
 0x341   : > { %p3753_p1 = scmp.lt.s32.totalorder %s3751_s18, %s3747_s24 }
 0x342   : > { %p3749_p12 = pnand %p3748_p9, %p3882_p10 }
 0x343   : > { %p3754_p2 = por %p3753_p1, %p3752_p0 }
 0x344   : > { %p3750_p13 = pneg %p3749_p12 }
 0x346   : > { %p3755_p3 = pnand %p3754_p2, %p3750_p13 }
 0x348   : > { %3758 = shalt.err (!%p3755_p3)
}
 0x349   : > { %s3799_s19 = smov 128   ;;  %s3800_s9 = smov 8  }
 0x34a   : > { %3675 = dma.vmem_to_hbm [thread:$0]  (%p3882_p10), %s5827_s22, 8192, %s5825_s27, %s5835_s28, %s3799_s19, %s3799_s19, %s3800_s9  }
 0x34b PF: > { %p3681_p4 = scmp.ge.s32.totalorder %s3795_s8, 2  ;;  %s3011_s25 = sand.u32 1, %s3783_s29  }
 0x34c   : > { %s3012_s10 = scalar_lea.sflag [#allocation5], %s3011_s25 }
 0x34d   : > { %p3678_p5 = pnand %p3681_p4, %p3886_p11 }
 0x34f   : > { %p3679_p6 = pneg %p3678_p5 }
 0x351   : > { %3778 = dma.done.wait (%p3679_p6), %s3012_s10, 8192  }
 0x352   : > { %3780 = vsyncadd (%p3679_p6), %s3012_s10, 4294959104  ;;  %p24_p7 = scmp.ge.s32.totalorder %s3869_s11, 4   ;;  %s6002_s29 = smov %s3787_s30 }
 0x353   : > { %s6003_s30 = smov %s3791_s0  ;;  %s6004_s0 = smov %s3880_s14 }
 0x354   : > { %s6005_s8 = smov %s3869_s11  ;;  %26 = sbr.rel (!%p24_p7) target bundleno = 18 (0x12), region = 98 }
 0x359   :  { %3026 = vsyncpa [#allocation5], 1 }
 0x35a   :  { %3028 = vsyncpa [#allocation5 + $0x1], 1 }

</bundles_post_ra>
